<compile_context>
chip_gen: v7x
topology: tpu7x:2x2x1
jax: 0.10.0
libtpu: 0.0.40
codegen_flags: <defaults>
</compile_context>

<pallas_src>
import jax
import jax.numpy as jnp
from jax.experimental import pallas as pl
from jax.experimental.pallas import tpu as pltpu


def mlp_kernel(x_ref, w1_ref, b1_ref, w2_ref, b2_ref, w3_ref, b3_ref,
               w4_ref, b4_ref, o_ref):
    # bf16 matmul inputs, f32 accumulate; elementwise (bias, ReLU) in f32.
    h = x_ref[...]                                                   # bf16
    h = jnp.dot(h, w1_ref[...], preferred_element_type=jnp.float32) + b1_ref[...]
    h = jnp.maximum(h, 0.0).astype(jnp.bfloat16)
    h = jnp.dot(h, w2_ref[...], preferred_element_type=jnp.float32) + b2_ref[...]
    h = jnp.maximum(h, 0.0).astype(jnp.bfloat16)
    h = jnp.dot(h, w3_ref[...], preferred_element_type=jnp.float32) + b3_ref[...]
    h = jnp.maximum(h, 0.0).astype(jnp.bfloat16)
    out = jnp.dot(h, w4_ref[...], preferred_element_type=jnp.float32) + b4_ref[...]
    o_ref[...] = out.astype(o_ref.dtype)


def mlp_forward(x, params, *, tile_m=None, lane_pad=128):
    (w1, b1), (w2, b2), (w3, b3), (w4, b4) = params
    B, D_in = x.shape
    D_out = w4.shape[1]

    # MXU-friendly batch tile: up to 256 rows, always a multiple of 8.
    if tile_m is None:
        tile_m = min(256, pl.cdiv(B, 8) * 8)
    B_pad = pl.cdiv(B, tile_m) * tile_m
    D_out_pad = pl.cdiv(D_out, lane_pad) * lane_pad

    # Zero-pad batch (dead compute only on the last tile) + bf16 cast for MXU.
    x_p = x if B_pad == B else jnp.pad(x, ((0, B_pad - B), (0, 0)))
    x_p = x_p.astype(jnp.bfloat16)

    # bf16 weights; f32 biases as (1, dim) rows so they broadcast in-kernel.
    w1b, w2b, w3b = (w.astype(jnp.bfloat16) for w in (w1, w2, w3))
    b1r = b1.reshape(1, -1).astype(jnp.float32)
    b2r = b2.reshape(1, -1).astype(jnp.float32)
    b3r = b3.reshape(1, -1).astype(jnp.float32)

    # Lane-dense final layer: zero-pad output columns to 128.
    w4p = jnp.zeros((w4.shape[0], D_out_pad), jnp.bfloat16)
    w4p = w4p.at[:, :D_out].set(w4.astype(jnp.bfloat16))
    b4p = jnp.zeros((1, D_out_pad), jnp.float32)
    b4p = b4p.at[:, :D_out].set(b4.astype(jnp.float32))

    def resident(arr):
        # Whole-array block, constant index -> VMEM-resident across the grid.
        return pl.BlockSpec(arr.shape, lambda i: (0, 0))

    out = pl.pallas_call(
        mlp_kernel,
        out_shape=jax.ShapeDtypeStruct((B_pad, D_out_pad), jnp.float32),
        grid_spec=pl.GridSpec(
            grid=(B_pad // tile_m,),
            in_specs=[
                pl.BlockSpec((tile_m, D_in), lambda i: (i, 0)),
                resident(w1b), resident(b1r),
                resident(w2b), resident(b2r),
                resident(w3b), resident(b3r),
                resident(w4p), resident(b4p),
            ],
            out_specs=pl.BlockSpec((tile_m, D_out_pad), lambda i: (i, 0)),
        ),
        compiler_params=pltpu.CompilerParams(
            dimension_semantics=("parallel",)),
    )(x_p, w1b, b1r, w2b, b2r, w3b, b3r, w4p, b4p)

    return out[:B, :D_out]


def init_params(key, input_size=768, number_params=7):
    dims = [input_size, 512, 256, 128, number_params]
    params = []
    for i in range(4):
        key, kw, kb = jax.random.split(key, 3)
        fan_in = dims[i]
        bound = 1.0 / jnp.sqrt(fan_in)
        w = jax.random.uniform(kw, (dims[i], dims[i + 1]), jnp.float32,
                               minval=-bound, maxval=bound)
        b = jax.random.uniform(kb, (dims[i + 1],), jnp.float32,
                               minval=-bound, maxval=bound)
        params.append((w, b))
    return params


def ref_forward_f32(x, params):
    h = x
    for i, (w, b) in enumerate(params):
        h = h @ w + b
        if i < 3:
            h = jnp.maximum(h, 0.0)
    return h


def ref_forward_bf16(x, params):
    # Matches the kernel's numerics: bf16 dot inputs, f32 accumulate/elementwise.
    h = x.astype(jnp.bfloat16)
    for i, (w, b) in enumerate(params):
        h = jnp.dot(h, w.astype(jnp.bfloat16),
                    preferred_element_type=jnp.float32) + b.astype(jnp.float32)
        if i < 3:
            h = jnp.maximum(h, 0.0)
        if i < 3:
            h = h.astype(jnp.bfloat16)
    return h


if __name__ == "__main__":
    key = jax.random.PRNGKey(0)
    kx, kp = jax.random.split(key)

    # B deliberately not a multiple of the tile to exercise the padding path
    # (pads to 512 -> grid=(2,) with tile_m=256).
    B, D_in, D_out = 300, 768, 7
    x = jax.random.normal(kx, (B, D_in), jnp.float32)
    params = init_params(kp, input_size=D_in, number_params=D_out)

    out = mlp_forward(x, params)
    out = jax.block_until_ready(out)
    assert out.shape == (B, D_out)

    # Tight check against a numerics-matched (bf16-input) reference.
    ref_bf16 = ref_forward_bf16(x, params)
    assert jnp.allclose(out, ref_bf16, atol=1e-2, rtol=1e-2)

    # Loose check against the full-f32 reference (module semantics).
    ref_f32 = ref_forward_f32(x, params)
    assert jnp.allclose(out, ref_f32, atol=5e-2, rtol=5e-2)

    print("KERNEL_OK")
</pallas_src>

<mosaic_0001>
module attributes {stable_mosaic.version = 11 : i64} {
  func.func @mlp_kernel(%arg0: i32, %arg1: memref<256x768xbf16, #tpu.memory_space<vmem>>, %arg2: memref<768x512xbf16, #tpu.memory_space<vmem>>, %arg3: memref<1x512xf32, #tpu.memory_space<vmem>>, %arg4: memref<512x256xbf16, #tpu.memory_space<vmem>>, %arg5: memref<1x256xf32, #tpu.memory_space<vmem>>, %arg6: memref<256x128xbf16, #tpu.memory_space<vmem>>, %arg7: memref<1x128xf32, #tpu.memory_space<vmem>>, %arg8: memref<128x128xbf16, #tpu.memory_space<vmem>>, %arg9: memref<1x128xf32, #tpu.memory_space<vmem>>, %arg10: memref<256x128xf32, #tpu.memory_space<vmem>>) attributes {dimension_semantics = [#tpu.dimension_semantics<parallel>], iteration_bounds = array<i64: 2>, scalar_prefetch = 0 : i64, scratch_operands = 0 : i64, tpu.core_type = #tpu.core_type<tc>, window_params = [{transform_indices = @transform_0, window_bounds = array<i64: 256, 768>}, {pipeline_mode = #tpu.pipeline_mode<synchronous>, transform_indices = @transform_1, window_bounds = array<i64: 768, 512>}, {pipeline_mode = #tpu.pipeline_mode<synchronous>, transform_indices = @transform_2, window_bounds = array<i64: 1, 512>}, {pipeline_mode = #tpu.pipeline_mode<synchronous>, transform_indices = @transform_3, window_bounds = array<i64: 512, 256>}, {pipeline_mode = #tpu.pipeline_mode<synchronous>, transform_indices = @transform_4, window_bounds = array<i64: 1, 256>}, {pipeline_mode = #tpu.pipeline_mode<synchronous>, transform_indices = @transform_5, window_bounds = array<i64: 256, 128>}, {pipeline_mode = #tpu.pipeline_mode<synchronous>, transform_indices = @transform_6, window_bounds = array<i64: 1, 128>}, {pipeline_mode = #tpu.pipeline_mode<synchronous>, transform_indices = @transform_7, window_bounds = array<i64: 128, 128>}, {pipeline_mode = #tpu.pipeline_mode<synchronous>, transform_indices = @transform_8, window_bounds = array<i64: 1, 128>}, {transform_indices = @transform_9, window_bounds = array<i64: 256, 128>}]} {
    %c0 = arith.constant 0 : index
    %c0_0 = arith.constant 0 : index
    %0 = vector.load %arg1[%c0, %c0_0] : memref<256x768xbf16, #tpu.memory_space<vmem>>, vector<256x768xbf16>
    %c0_1 = arith.constant 0 : index
    %c0_2 = arith.constant 0 : index
    %1 = vector.load %arg2[%c0_1, %c0_2] : memref<768x512xbf16, #tpu.memory_space<vmem>>, vector<768x512xbf16>
    %cst = arith.constant dense<0.000000e+00> : vector<256x512xf32>
    %2 = tpu.matmul %0, %1, %cst {dimension_numbers = #tpu.dot_dimension_numbers<[1], [0], [0], [1], [0, 0, 1, 1], [], []>} : vector<256x768xbf16>, vector<768x512xbf16>, vector<256x512xf32> -> vector<256x512xf32>
    %c0_3 = arith.constant 0 : index
    %c0_4 = arith.constant 0 : index
    %3 = vector.load %arg3[%c0_3, %c0_4] : memref<1x512xf32, #tpu.memory_space<vmem>>, vector<1x512xf32>
    %4 = vector.broadcast %3 : vector<1x512xf32> to vector<256x512xf32>
    %5 = arith.addf %2, %4 : vector<256x512xf32>
    %cst_5 = arith.constant 0.000000e+00 : f32
    %6 = vector.broadcast %cst_5 : f32 to vector<256x512xf32>
    %7 = arith.maximumf %5, %6 : vector<256x512xf32>
    %8 = arith.truncf %7 : vector<256x512xf32> to vector<256x512xbf16>
    %c0_6 = arith.constant 0 : index
    %c0_7 = arith.constant 0 : index
    %9 = vector.load %arg4[%c0_6, %c0_7] : memref<512x256xbf16, #tpu.memory_space<vmem>>, vector<512x256xbf16>
    %cst_8 = arith.constant dense<0.000000e+00> : vector<256x256xf32>
    %10 = tpu.matmul %8, %9, %cst_8 {dimension_numbers = #tpu.dot_dimension_numbers<[1], [0], [0], [1], [0, 0, 1, 1], [], []>} : vector<256x512xbf16>, vector<512x256xbf16>, vector<256x256xf32> -> vector<256x256xf32>
    %c0_9 = arith.constant 0 : index
    %c0_10 = arith.constant 0 : index
    %11 = vector.load %arg5[%c0_9, %c0_10] : memref<1x256xf32, #tpu.memory_space<vmem>>, vector<1x256xf32>
    %12 = vector.broadcast %11 : vector<1x256xf32> to vector<256x256xf32>
    %13 = arith.addf %10, %12 : vector<256x256xf32>
    %cst_11 = arith.constant 0.000000e+00 : f32
    %14 = vector.broadcast %cst_11 : f32 to vector<256x256xf32>
    %15 = arith.maximumf %13, %14 : vector<256x256xf32>
    %16 = arith.truncf %15 : vector<256x256xf32> to vector<256x256xbf16>
    %c0_12 = arith.constant 0 : index
    %c0_13 = arith.constant 0 : index
    %17 = vector.load %arg6[%c0_12, %c0_13] : memref<256x128xbf16, #tpu.memory_space<vmem>>, vector<256x128xbf16>
    %cst_14 = arith.constant dense<0.000000e+00> : vector<256x128xf32>
    %18 = tpu.matmul %16, %17, %cst_14 {dimension_numbers = #tpu.dot_dimension_numbers<[1], [0], [0], [1], [0, 0, 1, 1], [], []>} : vector<256x256xbf16>, vector<256x128xbf16>, vector<256x128xf32> -> vector<256x128xf32>
    %c0_15 = arith.constant 0 : index
    %c0_16 = arith.constant 0 : index
    %19 = vector.load %arg7[%c0_15, %c0_16] : memref<1x128xf32, #tpu.memory_space<vmem>>, vector<1x128xf32>
    %20 = vector.broadcast %19 : vector<1x128xf32> to vector<256x128xf32>
    %21 = arith.addf %18, %20 : vector<256x128xf32>
    %cst_17 = arith.constant 0.000000e+00 : f32
    %22 = vector.broadcast %cst_17 : f32 to vector<256x128xf32>
    %23 = arith.maximumf %21, %22 : vector<256x128xf32>
    %24 = arith.truncf %23 : vector<256x128xf32> to vector<256x128xbf16>
    %c0_18 = arith.constant 0 : index
    %c0_19 = arith.constant 0 : index
    %25 = vector.load %arg8[%c0_18, %c0_19] : memref<128x128xbf16, #tpu.memory_space<vmem>>, vector<128x128xbf16>
    %cst_20 = arith.constant dense<0.000000e+00> : vector<256x128xf32>
    %26 = tpu.matmul %24, %25, %cst_20 {dimension_numbers = #tpu.dot_dimension_numbers<[1], [0], [0], [1], [0, 0, 1, 1], [], []>} : vector<256x128xbf16>, vector<128x128xbf16>, vector<256x128xf32> -> vector<256x128xf32>
    %c0_21 = arith.constant 0 : index
    %c0_22 = arith.constant 0 : index
    %27 = vector.load %arg9[%c0_21, %c0_22] : memref<1x128xf32, #tpu.memory_space<vmem>>, vector<1x128xf32>
    %28 = vector.broadcast %27 : vector<1x128xf32> to vector<256x128xf32>
    %29 = arith.addf %26, %28 : vector<256x128xf32>
    %c0_23 = arith.constant 0 : index
    %c0_24 = arith.constant 0 : index
    %30 = vector.load %arg10[%c0_23, %c0_24] : memref<256x128xf32, #tpu.memory_space<vmem>>, vector<256x128xf32>
    tpu.vector_store %arg10[%c0_23, %c0_24], %29 {strides = array<i32>} : memref<256x128xf32, #tpu.memory_space<vmem>>, vector<256x128xf32>,
    return
  }
  func.func @transform_0(%arg0: i32) -> (i32, i32) {
    %c0_i32 = arith.constant 0 : i32
    %c0_i32_0 = arith.constant 0 : i32
    return %arg0, %c0_i32 : i32, i32
  }
  func.func @transform_1(%arg0: i32) -> (i32, i32) {
    %c0_i32 = arith.constant 0 : i32
    %c0_i32_0 = arith.constant 0 : i32
    %c0_i32_1 = arith.constant 0 : i32
    return %c0_i32, %c0_i32_0 : i32, i32
  }
  func.func @transform_2(%arg0: i32) -> (i32, i32) {
    %c0_i32 = arith.constant 0 : i32
    %c0_i32_0 = arith.constant 0 : i32
    %c0_i32_1 = arith.constant 0 : i32
    return %c0_i32, %c0_i32_0 : i32, i32
  }
  func.func @transform_3(%arg0: i32) -> (i32, i32) {
    %c0_i32 = arith.constant 0 : i32
    %c0_i32_0 = arith.constant 0 : i32
    %c0_i32_1 = arith.constant 0 : i32
    return %c0_i32, %c0_i32_0 : i32, i32
  }
  func.func @transform_4(%arg0: i32) -> (i32, i32) {
    %c0_i32 = arith.constant 0 : i32
    %c0_i32_0 = arith.constant 0 : i32
    %c0_i32_1 = arith.constant 0 : i32
    return %c0_i32, %c0_i32_0 : i32, i32
  }
  func.func @transform_5(%arg0: i32) -> (i32, i32) {
    %c0_i32 = arith.constant 0 : i32
    %c0_i32_0 = arith.constant 0 : i32
    %c0_i32_1 = arith.constant 0 : i32
    return %c0_i32, %c0_i32_0 : i32, i32
  }
  func.func @transform_6(%arg0: i32) -> (i32, i32) {
    %c0_i32 = arith.constant 0 : i32
    %c0_i32_0 = arith.constant 0 : i32
    %c0_i32_1 = arith.constant 0 : i32
    return %c0_i32, %c0_i32_0 : i32, i32
  }
  func.func @transform_7(%arg0: i32) -> (i32, i32) {
    %c0_i32 = arith.constant 0 : i32
    %c0_i32_0 = arith.constant 0 : i32
    %c0_i32_1 = arith.constant 0 : i32
    return %c0_i32, %c0_i32_0 : i32, i32
  }
  func.func @transform_8(%arg0: i32) -> (i32, i32) {
    %c0_i32 = arith.constant 0 : i32
    %c0_i32_0 = arith.constant 0 : i32
    %c0_i32_1 = arith.constant 0 : i32
    return %c0_i32, %c0_i32_0 : i32, i32
  }
  func.func @transform_9(%arg0: i32) -> (i32, i32) {
    %c0_i32 = arith.constant 0 : i32
    %c0_i32_0 = arith.constant 0 : i32
    return %arg0, %c0_i32 : i32, i32
  }
}

</mosaic_0001>

<bundles_post_ra>
// kernel: tpu_custom_call.1
= control target key start
LH: loop header
LB: loop body
LE: loop exit
PB: predicated region body
PF: predicated region fallthrough
CT: control target
= control target key end

     0   :  { %s8038_s0 = inlined_call_operand.hbm [shape: bf16[512,768], index: 0, kind: input, shape index: {}]   ;;  %s8039_s1 = inlined_call_operand.hbm [shape: bf16[768,512], index: 1, kind: input, shape index: {}]   ;;  %s8040_s2 = inlined_call_operand.vmem [shape: f32[1,512], index: 2, kind: input, shape index: {}]   ;;  %s8041_s3 = inlined_call_operand.hbm [shape: bf16[512,256], index: 3, kind: input, shape index: {}]   ;;  %s8042_s4 = inlined_call_operand.vmem [shape: f32[1,256], index: 4, kind: input, shape index: {}]   ;;  %s8043_s5 = inlined_call_operand.hbm [shape: bf16[256,128], index: 5, kind: input, shape index: {}]   ;;  %s8044_s6 = inlined_call_operand.vmem [shape: f32[1,128], index: 6, kind: input, shape index: {}]   ;;  %s8045_s7 = inlined_call_operand.hbm [shape: bf16[128,128], index: 7, kind: input, shape index: {}]   ;;  %s8046_s8 = inlined_call_operand.vmem [shape: f32[1,128], index: 8, kind: input, shape index: {}]   ;;  %s8047_s9 = inlined_call_operand.hbm [shape: f32[512,128], index: 9, kind: output, shape index: {}]  }
   0x1   :  { %8055 = sst [smem:[#allocation18_spill]] %s8039_s1 }
   0x2   :  { %14 = vsyncpa [#allocation3], 0 }
   0x3   :  { %16 = vsyncpa [#allocation3 + $0x1], 0 }
   0x4   :  { %17 = vsyncpa [#allocation6], 0 }
   0x5   :  { %18 = vsyncpa [#allocation9], 0 }
   0x6   :  { %19 = vsyncpa [#allocation4], 0 }
   0x7   :  { %21 = vsyncpa [#allocation4 + $0x1], 0  ;;  %s7188_s30 = smov 0   ;;  %s7190_s10 = smov 0  }
   0x8   :  { %s7192_s11 = smov 0   ;;  %s7194_s12 = smov 0  }
   0x9 LB: > { %8056 = sst [smem:[#allocation16_spill]] %s7108_s30  ;;  %s7209_s13 = sadd.s32 4294967295, %s7120_s12   ;;  %s7120_s12 = sphi %s7194_s12, %s8082_s12   ;;  %s7116_s11 = sphi %s7192_s11, %s8081_s11   ;;  %s7112_s10 = sphi %s7190_s10, %s8080_s10   ;;  %s7108_s30 = sphi %s7188_s30, %s8079_s30  }
   0xa   : > { %s5124_s14 = sadd.s32 4294967294, %s7120_s12   ;;  %p47_p0 = scmp.ne.s32.totalorder %s7112_s10, %s7108_s30 }
   0xb   : > { %p8048_p1 = scmp.eq.s32.totalorder %s7209_s13, 0  ;;  %p245_p3 = scmp.eq.s32.totalorder %s5124_s14, 1 }
   0xc   : > { %p5125_p5 = scmp.ge.s32.totalorder %s7120_s12, 1  ;;  %p252_p7 = scmp.lt.s32.totalorder %s7120_s12, 3 }
   0xd   : > { %p7218_p4 = por %p8048_p1, %p47_p0  ;;  %p7223_p6 = por %p245_p3, %p47_p0 }
   0xe   : > { %p7228_p8 = pnand %p5125_p5, %p252_p7  ;;  %s7122_s18 = smov [#allocation5]  }
   0xf   : > { %s8057_s15 = scalar_select %p7218_p4, 1, 0 }
  0x10   : > { %s8058_s16 = scalar_select %p7223_p6, 1, 0 }
  0x11   : > { %s8060_s17 = scalar_select %p7228_p8, 1, 0 }
  0x12   : > { %8059 = sst [smem:[#allocation17_spill]] %s8058_s16  ;;  %s264_s19 = sshll.u32 %s7122_s18, 4  ;;  %s7232_s19 = int_to_ptr.vmem [resolvable:$true] %s264_s19 }
  0x13   : > { %p6275_p9 = pneg %p7228_p8  ;;  %s7123_s21 = smov [#allocation8]  }
  0x14   : > { %s296_s22 = sshll.u32 %s7123_s21, 4  ;;  %s8062_s1 = sld [smem:[#allocation18_spill]]  ;;  %s7243_s22 = int_to_ptr.vmem [resolvable:$true] %s296_s22 }
  0x15   : > { %p7239_p11 = pnand %p6275_p9, %p8048_p1 }
  0x17   : > { %p7253_p13 = pneg %p7239_p11 }
  0x1a   : > { %s6904_s25 = scalar_lea.hbm %s8062_s1, 24576 }
  0x1b   : > { %p6905_p12 = scmp.ne.s32.totalorder %s8062_s1, %s6904_s25  ;;  %p6911_p5 = scmp.lt.u32.totalorder %s6904_s25, %s8062_s1 }
  0x1d   : > { %p6907_p0 = pnand %p7253_p13, %p6905_p12 }
  0x1f   : > { %p6908_p3 = pneg %p6907_p0 }
  0x21   : > { %p6913_p7 = pnand %p6911_p5, %p6908_p3 }
  0x23   : > { %6916 = shalt.err (!%p6913_p7)
}
  0x24   : > { %s6917_s18 = scalar_lea.vmem %s7232_s19, 24576  ;;  %p6925_p2 = scmp.lt.s32.totalorder %s7232_s19, %s7232_s19 }
  0x25   : > { %p6918_p9 = scmp.ne.s32.totalorder %s7232_s19, %s6917_s18  ;;  %p6926_p6 = scmp.lt.s32.totalorder %s6917_s18, %s6917_s18 }
  0x27   : > { %p6920_p10 = pnand %p6918_p9, %p7253_p13  ;;  %p6927_p12 = por %p6926_p6, %p6925_p2 }
  0x29   : > { %p6921_p1 = pneg %p6920_p10 }
  0x2b   : > { %p6928_p0 = pnand %p6927_p12, %p6921_p1 }
  0x2d   : > { %6931 = shalt.err (!%p6928_p0)
}
  0x2e   : > { %s7124_s21 = smov 256   ;;  %s7125_s23 = smov 16  }
  0x2f   : > { %6278 = dma.hbm_to_vmem [thread:$0]  (!%p7239_p11), %s8062_s1, 24576, %s7232_s19, [#allocation6], %s7124_s21, %s7124_s21, %s7125_s23  }
  0x30   : > { %s6932_s29 = scalar_lea.hbm %s8043_s5, 2048 }
  0x31   : > { %p6933_p2 = scmp.ne.s32.totalorder %s8043_s5, %s6932_s29  ;;  %p6939_p10 = scmp.lt.u32.totalorder %s6932_s29, %s8043_s5 }
  0x33   : > { %p6935_p1 = pnand %p6933_p2, %p7253_p13 }
  0x35   : > { %p6936_p6 = pneg %p6935_p1 }
  0x37   : > { %p6941_p3 = pnand %p6939_p10, %p6936_p6 }
  0x39   : > { %6944 = shalt.err (!%p6941_p3)
}
  0x3a   : > { %s6945_s19 = scalar_lea.vmem %s7243_s22, 2048  ;;  %p6953_p12 = scmp.lt.s32.totalorder %s7243_s22, %s7243_s22 }
  0x3b   : > { %p6946_p5 = scmp.ne.s32.totalorder %s7243_s22, %s6945_s19  ;;  %p6954_p0 = scmp.lt.s32.totalorder %s6945_s19, %s6945_s19 }
  0x3d   : > { %p6948_p7 = pnand %p6946_p5, %p7253_p13  ;;  %p6955_p2 = por %p6954_p0, %p6953_p12 }
  0x3f   : > { %p6949_p9 = pneg %p6948_p7 }
  0x41   : > { %p6956_p1 = pnand %p6955_p2, %p6949_p9 }
  0x43   : > { %6959 = shalt.err (!%p6956_p1)
}
  0x44   : > { %s8053_s16 = smov 64   ;;  %s8054_s30 = smov 4  }
  0x45   : > { %6284 = dma.hbm_to_vmem [thread:$0]  (!%p7239_p11), %s8043_s5, 2048, %s7243_s22, [#allocation9], %s8053_s16, %s8053_s16, %s8054_s30  }
  0x46   : > { %s7128_s24 = smov [#allocation7]   ;;  %s6960_s29 = scalar_lea.hbm %s8041_s3, 8192 }
  0x47   : > { %s280_s25 = sshll.u32 %s7128_s24, 4  ;;  %p6961_p6 = scmp.ne.s32.totalorder %s8041_s3, %s6960_s29  ;;  %s281_s25 = int_to_ptr.vmem [resolvable:$true] %s280_s25 }
  0x48   : > { %p6967_p5 = scmp.lt.u32.totalorder %s6960_s29, %s8041_s3 }
  0x49   : > { %p6963_p10 = pnand %p6961_p6, %p7253_p13 }
  0x4b   : > { %p6964_p3 = pneg %p6963_p10 }
  0x4d   : > { %p6969_p7 = pnand %p6967_p5, %p6964_p3 }
  0x4f   : > { %6972 = shalt.err (!%p6969_p7)
}
  0x50   : > { %s6973_s22 = scalar_lea.vmem %s281_s25, 8192  ;;  %p6981_p2 = scmp.lt.s32.totalorder %s281_s25, %s281_s25 }
  0x51   : > { %p6974_p9 = scmp.ne.s32.totalorder %s281_s25, %s6973_s22  ;;  %p6982_p1 = scmp.lt.s32.totalorder %s6973_s22, %s6973_s22 }
  0x53   : > { %p6976_p12 = pnand %p6974_p9, %p7253_p13  ;;  %p6983_p4 = por %p6982_p1, %p6981_p2 }
  0x55   : > { %p6977_p0 = pneg %p6976_p12 }
  0x57   : > { %p6984_p8 = pnand %p6983_p4, %p6977_p0 }
  0x59   : > { %6987 = shalt.err (!%p6984_p8)
}
  0x5a   : > { %s7129_s21 = smov 128   ;;  %s7130_s23 = smov 8  }
  0x5b   : > { %6281 = dma.hbm_to_vmem [thread:$0]  (!%p7239_p11), %s8041_s3, 8192, %s281_s25, [#allocation6], %s7129_s21, %s7129_s21, %s7130_s23  }
  0x5c   : > { %s7131_s26 = smov [#allocation10]   ;;  %s6988_s18 = scalar_lea.hbm %s8045_s7, 1024 }
  0x5d   : > { %s312_s27 = sshll.u32 %s7131_s26, 4  ;;  %p6989_p4 = scmp.ne.s32.totalorder %s8045_s7, %s6988_s18  ;;  %s313_s27 = int_to_ptr.vmem [resolvable:$true] %s312_s27 }
  0x5e   : > { %p6995_p10 = scmp.lt.u32.totalorder %s6988_s18, %s8045_s7 }
  0x5f   : > { %p6991_p8 = pnand %p6989_p4, %p7253_p13 }
  0x61   : > { %p6992_p6 = pneg %p6991_p8 }
  0x63   : > { %p6997_p3 = pnand %p6995_p10, %p6992_p6 }
  0x65   : > { %7000 = shalt.err (!%p6997_p3)
}
  0x66   : > { %s7001_s25 = scalar_lea.vmem %s313_s27, 1024  ;;  %p7009_p12 = scmp.lt.s32.totalorder %s313_s27, %s313_s27 }
  0x67   : > { %p7002_p5 = scmp.ne.s32.totalorder %s313_s27, %s7001_s25  ;;  %p7010_p0 = scmp.lt.s32.totalorder %s7001_s25, %s7001_s25 }
  0x69   : > { %p7004_p7 = pnand %p7002_p5, %p7253_p13  ;;  %p7011_p2 = por %p7010_p0, %p7009_p12 }
  0x6b   : > { %p7005_p9 = pneg %p7004_p7 }
  0x6d   : > { %p7012_p1 = pnand %p7011_p2, %p7005_p9 }
  0x6f   : > { %7015 = shalt.err (!%p7012_p1)
}
  0x70   : > { %s8064_s21 = smov 4   ;;  %s8065_s23 = smov 64  }
  0x71   : > { %6287 = dma.hbm_to_vmem [thread:$0]  (!%p7239_p11), %s8045_s7, 1024, %s313_s27, [#allocation9], %s8065_s23, %s8065_s23, %s8064_s21  }
  0x72   : > { %s7340_s28 = sadd.s32 1, %s7120_s12   ;;  %s34_s20 = sadd.s32 1, %s7116_s11 }
  0x73   : > { %s31_s1 = ssub.s32 %s7120_s12, %s7340_s28  ;;  %p41_p13 = scmp.ne.s32.totalorder %s7116_s11, %s7112_s10 }
  0x74   : > { %p32_p4 = scmp.eq.s32.totalorder %s31_s1, 0  ;;  %p42_p8 = scmp.eq.s32.totalorder %s7120_s12, 0 }
  0x75   : > { %p8066_p6 = scmp.eq.s32.totalorder %s7209_s13, 1  ;;  %p6300_p3 = scmp.lt.s32.totalorder %s7120_s12, 2 }
  0x76   : > { %s7356_s26 = scalar_select %p32_p4, %s7116_s11, %s34_s20  }
  0x77   : > { %p7350_p10 = por %p8066_p6, %p41_p13  ;;  %p43_p5 = por %p42_p8, %p41_p13 }
  0x78   : > { %s329_s29 = sand.u32 1, %s7116_s11   ;;  %s6253_s27 = smul.u32 12288, %s7120_s12 }
  0x79   : > { %s6252_s14 = smul.u32 768, %s329_s29  ;;  %p7360_p11 = pnand %p6300_p3, %p43_p5 }
  0x7a   : > { %s7367_s25 = scalar_lea.hbm %s8038_s0, %s6253_s27  ;;  %s7371_s16 = scalar_lea.sflag [#allocation3], %s329_s29 }
  0x7b   : > { %s333_s21 = scalar_lea.vmem [#allocation2], %s6252_s14  ;;  %s7016_s30 = scalar_lea.hbm %s7367_s25, 12288 }
  0x7c   : > { %s341_s23 = sshll.u32 %s333_s21, 4  ;;  %p7017_p7 = scmp.ne.s32.totalorder %s7367_s25, %s7016_s30  ;;  %s7369_s23 = int_to_ptr.vmem [resolvable:$true] %s341_s23 }
  0x7d   : > { %p7018_p9 = pneg %p7360_p11  ;;  %s7021_s27 = scalar_lea.hbm %s8038_s0, 24576 }
  0x7e   : > { %p7022_p2 = scmp.lt.u32.totalorder %s7367_s25, %s8038_s0  ;;  %p7023_p1 = scmp.lt.u32.totalorder %s7021_s27, %s7016_s30 }
  0x7f   : > { %p7019_p12 = pnand %p7018_p9, %p7017_p7  ;;  %p7025_p4 = scmp.lt.u32.totalorder %s7016_s30, %s7367_s25 }
  0x80   : > { %p7024_p13 = por %p7023_p1, %p7022_p2 }
  0x81   : > { %p7020_p0 = pneg %p7019_p12 }
  0x82   : > { %p7026_p8 = por %p7025_p4, %p7024_p13 }
  0x84   : > { %p7027_p6 = pnand %p7026_p8, %p7020_p0 }
  0x86   : > { %7030 = shalt.err (!%p7027_p6)
}
  0x87   : > { %s7031_s29 = scalar_lea.vmem %s7369_s23, 12288  ;;  %s7132_s14 = smov [#allocation2]  }
  0x88   : > { %p7032_p3 = scmp.ne.s32.totalorder %s7369_s23, %s7031_s29  ;;  %s7036_s21 = sshll.u32 %s7132_s14, 4  ;;  %s7037_s21 = int_to_ptr.vmem [resolvable:$false] %s7036_s21 }
  0x89   : > { %s7038_s20 = scalar_lea.vmem %s7037_s21, 24576  ;;  %p7039_p12 = scmp.lt.s32.totalorder %s7369_s23, %s7037_s21 }
  0x8a   : > { %p7034_p5 = pnand %p7032_p3, %p7018_p9  ;;  %p7040_p2 = scmp.lt.s32.totalorder %s7038_s20, %s7031_s29 }
  0x8c   : > { %p7035_p7 = pneg %p7034_p5  ;;  %p7041_p1 = por %p7040_p2, %p7039_p12 }
  0x8e   : > { %p7042_p13 = pnand %p7041_p1, %p7035_p7 }
  0x90   : > { %7045 = shalt.err (!%p7042_p13)
}
  0x91   : > { %s7133_s30 = smov 384   ;;  %s7134_s1 = smov 24  }
  0x92   : > { %6291 = dma.hbm_to_vmem [thread:$0]  (!%p7360_p11), %s7367_s25, 12288, %s7369_s23, %s7371_s16, %s7133_s30, %s7133_s30, %s7134_s1  }
  0x93   : > { %p8069_p9 = scmp.ne.s32.totalorder %s8060_s17, 0 }
  0x94   : > { %s7402_s27 = sand.u32 (!%p8069_p9), 1, %s7112_s10   ;;  %p8070_p0 = scmp.ne.s32.totalorder (!%p8069_p9), %s8057_s15, 0 }
  0x95   : > { %353 = sbr.rel (%p8069_p9) target bundleno = 1600 (0x640), region = 56  ;;  %s356_s22 = scalar_lea.sflag (!%p8069_p9), [#allocation3], %s7402_s27 }
  0x96   : > { %s6254_s19 = smul.u32 (!%p8069_p9), 768, %s7402_s27 }
  0x98   : > { %s7406_s29 = scalar_lea.vmem (!%p8069_p9), [#allocation2], %s6254_s19 }
  0x9c   : > { %7091 = dma.done.wait (%p8070_p0), %s356_s22, 12288  }
  0x9d   : > { %7093 = vsyncadd (%p8070_p0), %s356_s22, 4294955008  ;;  %p8071_p11 = scmp.eq.s32.totalorder %s7209_s13, 0 }
  0x9f   : > { %7095 = dma.done.wait (%p8071_p11), [#allocation6], 32768   ;;  %p8072_p4 = pmov %p8071_p11 }
  0xa1   : > { %7097 = vsyncadd (%p8072_p4), [#allocation6], 4294934528  ;;  %p8073_p8 = pmov %p8072_p4 }
  0xa2   : > { %p8074_p6 = pmov %p8072_p4 }
  0xa3   : > { %7099 = dma.done.wait (%p8073_p8), [#allocation9], 3072  }
  0xa4   : > { %7101 = vsyncadd (%p8074_p6), [#allocation9], 4294964224  ;;  %v6352_v0 = vld [vmem:[#allocation5 + $0x4] ss:$16 sps:$4 sm:$0xff]   ;;  %v6354_v1 = vld [vmem:[#allocation5 + $0xc] ss:$16 sps:$4 sm:$0xff]  }
  0xa5   : > { %2163 = vmatprep.subr.bf16.mxu0 %v6352_v0  ;;  %v6356_v2 = vld [vmem:[#allocation5] ss:$16 sps:$4 sm:$0xff]   ;;  %v6357_v3 = vld [vmem:[#allocation5 + $0x8] ss:$16 sps:$4 sm:$0xff]   ;;  %2742 = vmatprep.subr.bf16.mxu1 %v6354_v1  ;;  %v6358_v4 = vld [vmem:[#allocation5 + $0x24] ss:$16 sps:$4 sm:$0xff]  }
  0xa6   : > { %2164 = vmatpush1.bf16.msra.mxu0 %v6356_v2  ;;  %2743 = vmatpush1.bf16.msra.mxu1 %v6357_v3  ;;  %v6360_v5 = vld [vmem:[#allocation5 + $0x2c] ss:$16 sps:$4 sm:$0xff]   ;;  %v6362_v6 = vld [vmem:[#allocation5 + $0x20] ss:$16 sps:$4 sm:$0xff]   ;;  %v6363_v7 = vld [vmem:[#allocation5 + $0x28] ss:$16 sps:$4 sm:$0xff]  }
  0xa7   : > { %2165 = vmatprep.subr.bf16.mxu0 %v6358_v4  ;;  %2744 = vmatprep.subr.bf16.mxu1 %v6360_v5  ;;  %v6364_v8 = vld [vmem:[#allocation5 + $0x44] ss:$16 sps:$4 sm:$0xff]   ;;  %v6366_v9 = vld [vmem:[#allocation5 + $0x4c] ss:$16 sps:$4 sm:$0xff]   ;;  %v6368_v10 = vld [vmem:[#allocation5 + $0x40] ss:$16 sps:$4 sm:$0xff]  }
  0xa8   : > { %v6369_v11 = vld [vmem:[#allocation5 + $0x48] ss:$16 sps:$4 sm:$0xff]   ;;  %v6370_v12 = vld [vmem:[#allocation5 + $0x64] ss:$16 sps:$4 sm:$0xff]   ;;  %v6372_v13 = vld [vmem:[#allocation5 + $0x6c] ss:$16 sps:$4 sm:$0xff]  }
  0xa9   : > { %v6374_v14 = vld [vmem:[#allocation5 + $0x60] ss:$16 sps:$4 sm:$0xff]   ;;  %v6375_v15 = vld [vmem:[#allocation5 + $0x68] ss:$16 sps:$4 sm:$0xff]   ;;  %v6376_v16 = vld [vmem:[#allocation5 + $0x84] ss:$16 sps:$4 sm:$0xff]  }
  0xaa   : > { %2166 = vmatpush1.bf16.msra.mxu0 %v6362_v6  ;;  %2745 = vmatpush1.bf16.msra.mxu1 %v6363_v7  ;;  %v6378_v17 = vld [vmem:[#allocation5 + $0x8c] ss:$16 sps:$4 sm:$0xff]   ;;  %v6380_v18 = vld [vmem:[#allocation5 + $0x80] ss:$16 sps:$4 sm:$0xff]   ;;  %v6381_v19 = vld [vmem:[#allocation5 + $0x88] ss:$16 sps:$4 sm:$0xff]  }
  0xab   : > { %2167 = vmatprep.subr.bf16.mxu0 %v6364_v8  ;;  %2746 = vmatprep.subr.bf16.mxu1 %v6366_v9  ;;  %v6382_v20 = vld [vmem:[#allocation5 + $0xa4] ss:$16 sps:$4 sm:$0xff]   ;;  %v6384_v21 = vld [vmem:[#allocation5 + $0xac] ss:$16 sps:$4 sm:$0xff]   ;;  %v6386_v22 = vld [vmem:[#allocation5 + $0xa0] ss:$16 sps:$4 sm:$0xff]  }
  0xac   : > { %v6387_v23 = vld [vmem:[#allocation5 + $0xa8] ss:$16 sps:$4 sm:$0xff]   ;;  %v6388_v24 = vld [vmem:[#allocation5 + $0xc4] ss:$16 sps:$4 sm:$0xff]   ;;  %v6390_v25 = vld [vmem:[#allocation5 + $0xcc] ss:$16 sps:$4 sm:$0xff]  }
  0xad   : > { %v6392_v26 = vld [vmem:[#allocation5 + $0xc0] ss:$16 sps:$4 sm:$0xff]   ;;  %v6393_v27 = vld [vmem:[#allocation5 + $0xc8] ss:$16 sps:$4 sm:$0xff]   ;;  %v6394_v28 = vld [vmem:[#allocation5 + $0xe4] ss:$16 sps:$4 sm:$0xff]  }
  0xae   : > { %2168 = vmatpush1.bf16.msra.mxu0 %v6368_v10  ;;  %2747 = vmatpush1.bf16.msra.mxu1 %v6369_v11  ;;  %v6396_v29 = vld [vmem:[#allocation5 + $0xec] ss:$16 sps:$4 sm:$0xff]   ;;  %v6398_v30 = vld [vmem:[#allocation5 + $0xe0] ss:$16 sps:$4 sm:$0xff]   ;;  %v6399_v31 = vld [vmem:[#allocation5 + $0xe8] ss:$16 sps:$4 sm:$0xff]  }
  0xaf   : > { %2169 = vmatprep.subr.bf16.mxu0 %v6370_v12  ;;  %2748 = vmatprep.subr.bf16.mxu1 %v6372_v13  ;;  %v6400_v32 = vld [vmem:[#allocation5 + $0x104] ss:$16 sps:$4 sm:$0xff]   ;;  %v6402_v33 = vld [vmem:[#allocation5 + $0x10c] ss:$16 sps:$4 sm:$0xff]   ;;  %v6404_v34 = vld [vmem:[#allocation5 + $0x100] ss:$16 sps:$4 sm:$0xff]  }
  0xb0   : > { %v6405_v35 = vld [vmem:[#allocation5 + $0x108] ss:$16 sps:$4 sm:$0xff]   ;;  %v6406_v36 = vld [vmem:[#allocation5 + $0x124] ss:$16 sps:$4 sm:$0xff]   ;;  %v6408_v37 = vld [vmem:[#allocation5 + $0x12c] ss:$16 sps:$4 sm:$0xff]  }
  0xb1   : > { %v6410_v38 = vld [vmem:[#allocation5 + $0x120] ss:$16 sps:$4 sm:$0xff]   ;;  %v6411_v39 = vld [vmem:[#allocation5 + $0x128] ss:$16 sps:$4 sm:$0xff]   ;;  %v6412_v40 = vld [vmem:[#allocation5 + $0x144] ss:$16 sps:$4 sm:$0xff]  }
  0xb2   : > { %2170 = vmatpush1.bf16.msra.mxu0 %v6374_v14  ;;  %2749 = vmatpush1.bf16.msra.mxu1 %v6375_v15  ;;  %v6414_v41 = vld [vmem:[#allocation5 + $0x14c] ss:$16 sps:$4 sm:$0xff]   ;;  %v6416_v42 = vld [vmem:[#allocation5 + $0x140] ss:$16 sps:$4 sm:$0xff]   ;;  %v6417_v43 = vld [vmem:[#allocation5 + $0x148] ss:$16 sps:$4 sm:$0xff]  }
  0xb3   : > { %2171 = vmatprep.subr.bf16.mxu0 %v6376_v16  ;;  %2750 = vmatprep.subr.bf16.mxu1 %v6378_v17  ;;  %v6418_v44 = vld [vmem:[#allocation5 + $0x164] ss:$16 sps:$4 sm:$0xff]   ;;  %v6420_v45 = vld [vmem:[#allocation5 + $0x16c] ss:$16 sps:$4 sm:$0xff]   ;;  %v6422_v46 = vld [vmem:[#allocation5 + $0x160] ss:$16 sps:$4 sm:$0xff]  }
  0xb4   : > { %v6423_v47 = vld [vmem:[#allocation5 + $0x168] ss:$16 sps:$4 sm:$0xff]   ;;  %v6450_v48 = vld [vmem:[%s7406_s29 + $0x4] ss:$24 sps:$4 sm:$0xff]   ;;  %v6428_v51 = vld [vmem:[#allocation5 + $0x180] ss:$16 sps:$4 sm:$0xff]  }
  0xb5   : > { %v6424_v49 = vld [vmem:[#allocation5 + $0x184] ss:$16 sps:$4 sm:$0xff]   ;;  %v6426_v50 = vld [vmem:[#allocation5 + $0x18c] ss:$16 sps:$4 sm:$0xff]   ;;  %2195 = vmatprep.mubr.bf16.mxu0 %v6450_v48  ;;  %2774 = vmatprep.mubr.bf16.mxu1 %v6450_v48  ;;  %v6429_v52 = vld [vmem:[#allocation5 + $0x188] ss:$16 sps:$4 sm:$0xff]  }
  0xb6   : > { %2172 = vmatpush1.bf16.msra.mxu0 %v6380_v18  ;;  %2751 = vmatpush1.bf16.msra.mxu1 %v6381_v19  ;;  %v6430_v53 = vld [vmem:[#allocation5 + $0x1a4] ss:$16 sps:$4 sm:$0xff]   ;;  %v6432_v54 = vld [vmem:[#allocation5 + $0x1ac] ss:$16 sps:$4 sm:$0xff]   ;;  %v6434_v55 = vld [vmem:[#allocation5 + $0x1a0] ss:$16 sps:$4 sm:$0xff]  }
  0xb7   : > { %2173 = vmatprep.subr.bf16.mxu0 %v6382_v20  ;;  %2752 = vmatprep.subr.bf16.mxu1 %v6384_v21  ;;  %v6435_v56 = vld [vmem:[#allocation5 + $0x1a8] ss:$16 sps:$4 sm:$0xff]   ;;  %v6436_v57 = vld [vmem:[#allocation5 + $0x1c4] ss:$16 sps:$4 sm:$0xff]   ;;  %v6438_v58 = vld [vmem:[#allocation5 + $0x1cc] ss:$16 sps:$4 sm:$0xff]  }
  0xb8   : > { %v6440_v59 = vld [vmem:[#allocation5 + $0x1c0] ss:$16 sps:$4 sm:$0xff]   ;;  %v6441_v60 = vld [vmem:[#allocation5 + $0x1c8] ss:$16 sps:$4 sm:$0xff]   ;;  %v6442_v61 = vld [vmem:[#allocation5 + $0x1e4] ss:$16 sps:$4 sm:$0xff]  }
  0xb9   : > { %v6444_v62 = vld [vmem:[#allocation5 + $0x1ec] ss:$16 sps:$4 sm:$0xff]   ;;  %v6446_v63 = vld [vmem:[#allocation5 + $0x1e0] ss:$16 sps:$4 sm:$0xff]   ;;  %v6447_v0 = vld [vmem:[#allocation5 + $0x1e8] ss:$16 sps:$4 sm:$0xff]  }
  0xba   : > { %2174 = vmatpush1.bf16.msra.mxu0 %v6386_v22  ;;  %2753 = vmatpush1.bf16.msra.mxu1 %v6387_v23  ;;  %v6453_v1 = vld [vmem:[#allocation5 + $0x204] ss:$16 sps:$4 sm:$0xff]   ;;  %v6448_v2 = vld [vmem:[%s7406_s29] ss:$24 sps:$4 sm:$0xff]   ;;  %v6504_v8 = vld [vmem:[#allocation5 + $0x20c] ss:$16 sps:$4 sm:$0xff]  }
  0xbb   : > { %2175 = vmatprep.subr.bf16.mxu0 %v6388_v24  ;;  %2754 = vmatprep.subr.bf16.mxu1 %v6390_v25  ;;  %v6451_v3 = vld [vmem:[#allocation5 + $0x200] ss:$16 sps:$4 sm:$0xff]   ;;  %v6454_v4 = vld [vmem:[%s7406_s29 + $0x34] ss:$24 sps:$4 sm:$0xff]   ;;  %v6502_v7 = vld [vmem:[#allocation5 + $0x208] ss:$16 sps:$4 sm:$0xff]  }
  0xbc   : > { %v6459_v5 = vld [vmem:[#allocation5 + $0x224] ss:$16 sps:$4 sm:$0xff]   ;;  %v6457_v6 = vld [vmem:[#allocation5 + $0x220] ss:$16 sps:$4 sm:$0xff]   ;;  %v6507_v10 = vld [vmem:[#allocation5 + $0x22c] ss:$16 sps:$4 sm:$0xff]  }
  0xbd   : > { %v6465_v9 = vld [vmem:[#allocation5 + $0x244] ss:$16 sps:$4 sm:$0xff]   ;;  %v6456_v11 = vld [vmem:[%s7406_s29 + $0x30] ss:$24 sps:$4 sm:$0xff]   ;;  %v6516_v16 = vld [vmem:[#allocation5 + $0x24c] ss:$16 sps:$4 sm:$0xff]  }
  0xbe   : > { %2176 = vmatpush1.bf16.msra.mxu0 %v6392_v26  ;;  %2755 = vmatpush1.bf16.msra.mxu1 %v6393_v27  ;;  %v6460_v12 = vld [vmem:[%s7406_s29 + $0x64] ss:$24 sps:$4 sm:$0xff]   ;;  %v6463_v13 = vld [vmem:[#allocation5 + $0x240] ss:$16 sps:$4 sm:$0xff]   ;;  %v6505_v14 = vld [vmem:[#allocation5 + $0x228] ss:$16 sps:$4 sm:$0xff]  }
  0xbf   : > { %2177 = vmatprep.subr.bf16.mxu0 %v6394_v28  ;;  %2756 = vmatprep.subr.bf16.mxu1 %v6396_v29  ;;  %v6471_v15 = vld [vmem:[#allocation5 + $0x264] ss:$16 sps:$4 sm:$0xff]   ;;  %v6469_v17 = vld [vmem:[#allocation5 + $0x260] ss:$16 sps:$4 sm:$0xff]   ;;  %v6514_v18 = vld [vmem:[#allocation5 + $0x248] ss:$16 sps:$4 sm:$0xff]  }
  0xc0   : > { %v6477_v19 = vld [vmem:[#allocation5 + $0x284] ss:$16 sps:$4 sm:$0xff]   ;;  %v6519_v20 = vld [vmem:[#allocation5 + $0x26c] ss:$16 sps:$4 sm:$0xff]   ;;  %v6462_v21 = vld [vmem:[%s7406_s29 + $0x60] ss:$24 sps:$4 sm:$0xff]  }
  0xc1   : > { %v6466_v22 = vld [vmem:[%s7406_s29 + $0x94] ss:$24 sps:$4 sm:$0xff]   ;;  %v6475_v23 = vld [vmem:[#allocation5 + $0x280] ss:$16 sps:$4 sm:$0xff]   ;;  %v6517_v24 = vld [vmem:[#allocation5 + $0x268] ss:$16 sps:$4 sm:$0xff]  }
  0xc2   : > { %2178 = vmatpush1.bf16.msra.mxu0 %v6398_v30  ;;  %2757 = vmatpush1.bf16.msra.mxu1 %v6399_v31  ;;  %v6483_v25 = vld [vmem:[#allocation5 + $0x2a4] ss:$16 sps:$4 sm:$0xff]   ;;  %v6528_v26 = vld [vmem:[#allocation5 + $0x28c] ss:$16 sps:$4 sm:$0xff]   ;;  %v6481_v27 = vld [vmem:[#allocation5 + $0x2a0] ss:$16 sps:$4 sm:$0xff]  }
  0xc3   : > { %2179 = vmatprep.subr.bf16.mxu0 %v6400_v32  ;;  %2758 = vmatprep.subr.bf16.mxu1 %v6402_v33  ;;  %v6526_v28 = vld [vmem:[#allocation5 + $0x288] ss:$16 sps:$4 sm:$0xff]   ;;  %v6489_v29 = vld [vmem:[#allocation5 + $0x2c4] ss:$16 sps:$4 sm:$0xff]   ;;  %v6531_v30 = vld [vmem:[#allocation5 + $0x2ac] ss:$16 sps:$4 sm:$0xff]  }
  0xc4   : > { %v6468_v31 = vld [vmem:[%s7406_s29 + $0x90] ss:$24 sps:$4 sm:$0xff]   ;;  %v6472_v32 = vld [vmem:[%s7406_s29 + $0xc4] ss:$24 sps:$4 sm:$0xff]   ;;  %s5139_s14 = sshll.u32 %s7402_s27, 8  ;;  %s5523_s1 = sshll.u32 %s7209_s13, 12 }
  0xc5   : > { %v6487_v33 = vld [vmem:[#allocation5 + $0x2c0] ss:$16 sps:$4 sm:$0xff]   ;;  %v6550_v48 = vld [vmem:[#allocation5 + $0x308] ss:$16 sps:$4 sm:$0xff]   ;;  %s7923_s30 = scalar_lea.vmem [#allocation11], %s5139_s14  ;;  %s7988_s15 = scalar_lea.hbm %s8047_s9, %s5523_s1 }
  0xc6   : > { %2180 = vmatpush1.bf16.msra.mxu0 %v6404_v34  ;;  %2759 = vmatpush1.bf16.msra.mxu1 %v6405_v35  ;;  %v6529_v34 = vld [vmem:[#allocation5 + $0x2a8] ss:$16 sps:$4 sm:$0xff]   ;;  %v6495_v35 = vld [vmem:[#allocation5 + $0x2e4] ss:$16 sps:$4 sm:$0xff]   ;;  %s5013_s19 = sshll.u32 %s7923_s30, 4  ;;  %s5000_s13 = scalar_lea.sflag [#allocation4], %s7402_s27  ;;  %s7990_s19 = int_to_ptr.vmem [resolvable:$true] %s5013_s19 }
  0xc7   : > { %2181 = vmatprep.subr.bf16.mxu0 %v6406_v36  ;;  %2760 = vmatprep.subr.bf16.mxu1 %v6408_v37  ;;  %v6540_v36 = vld [vmem:[#allocation5 + $0x2cc] ss:$16 sps:$4 sm:$0xff]   ;;  %v6493_v37 = vld [vmem:[#allocation5 + $0x2e0] ss:$16 sps:$4 sm:$0xff]   ;;  %s7046_s17 = scalar_lea.vmem %s7990_s19, 4096  ;;  %s7135_s18 = smov [#allocation11]  }
  0xc8   : > { %p7047_p3 = scmp.ne.s32.totalorder %s7990_s19, %s7046_s17  ;;  %s7050_s25 = sshll.u32 %s7135_s18, 4  ;;  %s7051_s25 = int_to_ptr.vmem [resolvable:$false] %s7050_s25 }
  0xc9   : > { %s7052_s23 = scalar_lea.vmem %s7051_s25, 8192  ;;  %p7053_p12 = scmp.lt.s32.totalorder %s7990_s19, %s7051_s25 }
  0xca   : > { %2182 = vmatpush1.bf16.msra.mxu0 %v6410_v38  ;;  %2761 = vmatpush1.bf16.msra.mxu1 %v6411_v39  ;;  %v6538_v38 = vld [vmem:[#allocation5 + $0x2c8] ss:$16 sps:$4 sm:$0xff]   ;;  %v6501_v39 = vld [vmem:[#allocation5 + $0x304] ss:$16 sps:$4 sm:$0xff]   ;;  %p7048_p5 = pnand %p7047_p3, %p7350_p10  ;;  %p7054_p2 = scmp.lt.s32.totalorder %s7052_s23, %s7046_s17 }
  0xcb   : > { %2183 = vmatprep.subr.bf16.mxu0 %v6412_v40  ;;  %2762 = vmatprep.subr.bf16.mxu1 %v6414_v41  ;;  %v6543_v40 = vld [vmem:[#allocation5 + $0x2ec] ss:$16 sps:$4 sm:$0xff]   ;;  %v6474_v41 = vld [vmem:[%s7406_s29 + $0xc0] ss:$24 sps:$4 sm:$0xff]  }
  0xcc   : > { %p7049_p7 = pneg %p7048_p5  ;;  %p7055_p1 = por %p7054_p2, %p7053_p12 }
  0xce   : > { %2184 = vmatpush1.bf16.msra.mxu0 %v6416_v42  ;;  %2763 = vmatpush1.bf16.msra.mxu1 %v6417_v43  ;;  %v6478_v42 = vld [vmem:[%s7406_s29 + $0xf4] ss:$24 sps:$4 sm:$0xff]   ;;  %v6499_v43 = vld [vmem:[#allocation5 + $0x300] ss:$16 sps:$4 sm:$0xff]   ;;  %p7056_p13 = pnand %p7055_p1, %p7049_p7 }
  0xcf   : > { %2185 = vmatprep.subr.bf16.mxu0 %v6418_v44  ;;  %2764 = vmatprep.subr.bf16.mxu1 %v6420_v45  ;;  %v6541_v44 = vld [vmem:[#allocation5 + $0x2e8] ss:$16 sps:$4 sm:$0xff]   ;;  %v6513_v45 = vld [vmem:[#allocation5 + $0x324] ss:$16 sps:$4 sm:$0xff]  }
  0xd2   : > { %2186 = vmatpush1.bf16.msra.mxu0 %v6422_v46  ;;  %2765 = vmatpush1.bf16.msra.mxu1 %v6423_v47  ;;  %v6552_v46 = vld [vmem:[#allocation5 + $0x30c] ss:$16 sps:$4 sm:$0xff]   ;;  %v6511_v47 = vld [vmem:[#allocation5 + $0x320] ss:$16 sps:$4 sm:$0xff]  }
  0xd3   : > { %2187 = vmatprep.subr.bf16.mxu0 %v6424_v49  ;;  %2766 = vmatprep.subr.bf16.mxu1 %v6426_v50  ;;  %v6525_v49 = vld [vmem:[#allocation5 + $0x344] ss:$16 sps:$4 sm:$0xff]   ;;  %v6555_v50 = vld [vmem:[#allocation5 + $0x32c] ss:$16 sps:$4 sm:$0xff]  }
  0xd6   : > { %2188 = vmatpush1.bf16.msra.mxu0 %v6428_v51  ;;  %2767 = vmatpush1.bf16.msra.mxu1 %v6429_v52  ;;  %v6480_v51 = vld [vmem:[%s7406_s29 + $0xf0] ss:$24 sps:$4 sm:$0xff]   ;;  %v6484_v52 = vld [vmem:[%s7406_s29 + $0x124] ss:$24 sps:$4 sm:$0xff]  }
  0xd7   : > { %2189 = vmatprep.subr.bf16.mxu0 %v6430_v53  ;;  %2768 = vmatprep.subr.bf16.mxu1 %v6432_v54  ;;  %v6523_v53 = vld [vmem:[#allocation5 + $0x340] ss:$16 sps:$4 sm:$0xff]   ;;  %v6553_v54 = vld [vmem:[#allocation5 + $0x328] ss:$16 sps:$4 sm:$0xff]  }
  0xda   : > { %2190 = vmatpush1.bf16.msra.mxu0 %v6434_v55  ;;  %2769 = vmatpush1.bf16.msra.mxu1 %v6435_v56  ;;  %v6537_v55 = vld [vmem:[#allocation5 + $0x364] ss:$16 sps:$4 sm:$0xff]   ;;  %v6564_v56 = vld [vmem:[#allocation5 + $0x34c] ss:$16 sps:$4 sm:$0xff]  }
  0xdb   : > { %2191 = vmatprep.subr.bf16.mxu0 %v6436_v57  ;;  %2770 = vmatprep.subr.bf16.mxu1 %v6438_v58  ;;  %v6535_v57 = vld [vmem:[#allocation5 + $0x360] ss:$16 sps:$4 sm:$0xff]   ;;  %v6562_v58 = vld [vmem:[#allocation5 + $0x348] ss:$16 sps:$4 sm:$0xff]  }
  0xde   : > { %2192 = vmatpush1.bf16.msra.mxu0 %v6440_v59  ;;  %2771 = vmatpush1.bf16.msra.mxu1 %v6441_v60  ;;  %v6549_v59 = vld [vmem:[#allocation5 + $0x384] ss:$16 sps:$4 sm:$0xff]   ;;  %v6567_v60 = vld [vmem:[#allocation5 + $0x36c] ss:$16 sps:$4 sm:$0xff]  }
  0xdf   : > { %2193 = vmatprep.subr.bf16.mxu0 %v6442_v61  ;;  %2772 = vmatprep.subr.bf16.mxu1 %v6444_v62  ;;  %v6486_v61 = vld [vmem:[%s7406_s29 + $0x120] ss:$24 sps:$4 sm:$0xff]   ;;  %v6490_v62 = vld [vmem:[%s7406_s29 + $0x154] ss:$24 sps:$4 sm:$0xff]  }
  0xe2   : > { %2194 = vmatpush1.bf16.msra.mxu0 %v6446_v63  ;;  %2773 = vmatpush1.bf16.msra.mxu1 %v6447_v0  ;;  %v6547_v63 = vld [vmem:[#allocation5 + $0x380] ss:$16 sps:$4 sm:$0xff]   ;;  %v6565_v0 = vld [vmem:[#allocation5 + $0x368] ss:$16 sps:$4 sm:$0xff]  }
  0xe3   : > { %2356 = vmatprep.subr.bf16.mxu0 %v6453_v1  ;;  %2935 = vmatprep.subr.bf16.mxu1 %v6504_v8  ;;  %v6561_v1 = vld [vmem:[#allocation5 + $0x3a4] ss:$16 sps:$4 sm:$0xff]  }
  0xe4   : > { %v6496_v8 = vld [vmem:[%s7406_s29 + $0x184] ss:$24 sps:$4 sm:$0xff]  }
  0xe5   : > { %2196 = vmatmul.mubr.bf16.vlgmr.msra.gmra.mrb[0].mxu0 %v6448_v2  ;;  %2775 = vmatmul.mubr.bf16.vlgmr.msra.gmra.mrb[0].mxu1 %v6448_v2  ;;  %v6576_v2 = vld [vmem:[#allocation5 + $0x38c] ss:$16 sps:$4 sm:$0xff]  }
  0xe6   : > { %2357 = vmatpush1.bf16.msra.mxu0 %v6451_v3  ;;  %2205 = vmatprep.mubr.bf16.mxu0 %v6454_v4  ;;  %v6559_v3 = vld [vmem:[#allocation5 + $0x3a0] ss:$16 sps:$4 sm:$0xff]  }
  0xe7   : > { %2784 = vmatprep.mubr.bf16.mxu1 %v6454_v4  ;;  %2358 = vmatprep.subr.bf16.mxu0 %v6459_v5  ;;  %v6574_v4 = vld [vmem:[#allocation5 + $0x388] ss:$16 sps:$4 sm:$0xff]   ;;  %v6573_v5 = vld [vmem:[#allocation5 + $0x3c4] ss:$16 sps:$4 sm:$0xff]  }
  0xe8   : > { %2936 = vmatpush1.bf16.msra.mxu1 %v6502_v7  ;;  %v6492_v7 = vld [vmem:[%s7406_s29 + $0x150] ss:$24 sps:$4 sm:$0xff]  }
  0xe9   : > { %2937 = vmatprep.subr.bf16.mxu1 %v6507_v10  ;;  %v6577_v10 = vld [vmem:[#allocation5 + $0x3a8] ss:$16 sps:$4 sm:$0xff]  }
  0xea   : > { %2359 = vmatpush1.bf16.msra.mxu0 %v6457_v6  ;;  %v6579_v6 = vld [vmem:[#allocation5 + $0x3ac] ss:$16 sps:$4 sm:$0xff]  }
  0xeb   : > { %2360 = vmatprep.subr.bf16.mxu0 %v6465_v9  ;;  %v6571_v9 = vld [vmem:[#allocation5 + $0x3c0] ss:$16 sps:$4 sm:$0xff]  }
  0xec   : > { %2938 = vmatpush1.bf16.msra.mxu1 %v6505_v14  ;;  %v6586_v14 = vld [vmem:[#allocation5 + $0x3c8] ss:$16 sps:$4 sm:$0xff]  }
  0xed   : > { %2206 = vmatmul.mubr.bf16.gmra.mrb[4].mxu0 %v6456_v11  ;;  %2785 = vmatmul.mubr.bf16.gmra.mrb[4].mxu1 %v6456_v11  ;;  %v6585_v11 = vld [vmem:[#allocation5 + $0x3e4] ss:$16 sps:$4 sm:$0xff]  }
  0xee   : > { %2215 = vmatprep.mubr.bf16.mxu0 %v6460_v12  ;;  %2794 = vmatprep.mubr.bf16.mxu1 %v6460_v12  ;;  %v6588_v12 = vld [vmem:[#allocation5 + $0x3cc] ss:$16 sps:$4 sm:$0xff]  }
  0xef   : > { %2361 = vmatpush1.bf16.msra.mxu0 %v6463_v13  ;;  %2939 = vmatprep.subr.bf16.mxu1 %v6516_v16  ;;  %v6583_v13 = vld [vmem:[#allocation5 + $0x3e0] ss:$16 sps:$4 sm:$0xff]   ;;  %v6597_v16 = vld [vmem:[#allocation5 + $0x404] ss:$16 sps:$4 sm:$0xff]  }
  0xf0   : > { %2362 = vmatprep.subr.bf16.mxu0 %v6471_v15  ;;  %2940 = vmatpush1.bf16.msra.mxu1 %v6514_v18  ;;  %v6591_v15 = vld [vmem:[#allocation5 + $0x3ec] ss:$16 sps:$4 sm:$0xff]  }
  0xf1   : > { %2941 = vmatprep.subr.bf16.mxu1 %v6519_v20  ;;  %v6508_v18 = vld [vmem:[%s7406_s29 + $0x1b4] ss:$24 sps:$4 sm:$0xff]  }
  0xf2   : > { %v6648_v20 = vld [vmem:[#allocation5 + $0x40c] ss:$16 sps:$4 sm:$0xff]  }
  0xf3   : > { %2363 = vmatpush1.bf16.msra.mxu0 %v6469_v17  ;;  %v6498_v17 = vld [vmem:[%s7406_s29 + $0x180] ss:$24 sps:$4 sm:$0xff]  }
  0xf4   : > { %2364 = vmatprep.subr.bf16.mxu0 %v6477_v19  ;;  %2942 = vmatpush1.bf16.msra.mxu1 %v6517_v24  ;;  %v6589_v19 = vld [vmem:[#allocation5 + $0x3e8] ss:$16 sps:$4 sm:$0xff]   ;;  %v6532_v24 = vld [vmem:[%s7406_s29 + $0x214] ss:$24 sps:$4 sm:$0xff]  }
  0xf5   : > { %2216 = vmatmul.mubr.bf16.gmra.mrb[8].mxu0 %v6462_v21  ;;  %2795 = vmatmul.mubr.bf16.gmra.mrb[8].mxu1 %v6462_v21  ;;  %v6510_v21 = vld [vmem:[%s7406_s29 + $0x1b0] ss:$24 sps:$4 sm:$0xff]  }
  0xf6   : > { %2225 = vmatprep.mubr.bf16.mxu0 %v6466_v22  ;;  %2804 = vmatprep.mubr.bf16.mxu1 %v6466_v22  ;;  %v6520_v22 = vld [vmem:[%s7406_s29 + $0x1e4] ss:$24 sps:$4 sm:$0xff]  }
  0xf7   : > { %2365 = vmatpush1.bf16.msra.mxu0 %v6475_v23  ;;  %2943 = vmatprep.subr.bf16.mxu1 %v6528_v26  ;;  %v6522_v23 = vld [vmem:[%s7406_s29 + $0x1e0] ss:$24 sps:$4 sm:$0xff]   ;;  %v6544_v26 = vld [vmem:[%s7406_s29 + $0x244] ss:$24 sps:$4 sm:$0xff]  }
  0xf8   : > { %2366 = vmatprep.subr.bf16.mxu0 %v6483_v25  ;;  %2944 = vmatpush1.bf16.msra.mxu1 %v6526_v28  ;;  %v6534_v25 = vld [vmem:[%s7406_s29 + $0x210] ss:$24 sps:$4 sm:$0xff]   ;;  %v6556_v28 = vld [vmem:[%s7406_s29 + $0x274] ss:$24 sps:$4 sm:$0xff]  }
  0xf9   : > { %2945 = vmatprep.subr.bf16.mxu1 %v6531_v30  ;;  %v6568_v30 = vld [vmem:[%s7406_s29 + $0x2a4] ss:$24 sps:$4 sm:$0xff]  }
  0xfb   : > { %2367 = vmatpush1.bf16.msra.mxu0 %v6481_v27  ;;  %v6546_v27 = vld [vmem:[%s7406_s29 + $0x240] ss:$24 sps:$4 sm:$0xff]  }
  0xfc   : > { %2368 = vmatprep.subr.bf16.mxu0 %v6489_v29  ;;  %2946 = vmatpush1.bf16.msra.mxu1 %v6529_v34  ;;  %v6558_v29 = vld [vmem:[%s7406_s29 + $0x270] ss:$24 sps:$4 sm:$0xff]   ;;  %v6594_v34 = vld [vmem:[%s7406_s29 + $0xc] ss:$24 sps:$4 sm:$0xff]  }
  0xfd   : > { %2226 = vmatmul.mubr.bf16.gmra.mrb[12].mxu0 %v6468_v31  ;;  %2805 = vmatmul.mubr.bf16.gmra.mrb[12].mxu1 %v6468_v31  ;;  %v6570_v31 = vld [vmem:[%s7406_s29 + $0x2a0] ss:$24 sps:$4 sm:$0xff]  }
  0xfe   : > { %2235 = vmatprep.mubr.bf16.mxu0 %v6472_v32  ;;  %2814 = vmatprep.mubr.bf16.mxu1 %v6472_v32  ;;  %v6580_v32 = vld [vmem:[%s7406_s29 + $0x2d4] ss:$24 sps:$4 sm:$0xff]  }
  0xff   : > { %2369 = vmatpush1.bf16.msra.mxu0 %v6487_v33  ;;  %2947 = vmatprep.subr.bf16.mxu1 %v6540_v36  ;;  %v6582_v33 = vld [vmem:[%s7406_s29 + $0x2d0] ss:$24 sps:$4 sm:$0xff]  }
 0x100   : > { %2370 = vmatprep.subr.bf16.mxu0 %v6495_v35  ;;  %2948 = vmatpush1.bf16.msra.mxu1 %v6538_v38  ;;  %v6592_v35 = vld [vmem:[%s7406_s29 + $0x8] ss:$24 sps:$4 sm:$0xff]   ;;  %v6603_v38 = vld [vmem:[#allocation5 + $0x424] ss:$16 sps:$4 sm:$0xff]  }
 0x101   : > { %2949 = vmatprep.subr.bf16.mxu1 %v6543_v40  ;;  %v6595_v36 = vld [vmem:[#allocation5 + $0x400] ss:$16 sps:$4 sm:$0xff]  }
 0x102   : > { %v6601_v40 = vld [vmem:[#allocation5 + $0x420] ss:$16 sps:$4 sm:$0xff]  }
 0x103   : > { %2371 = vmatpush1.bf16.msra.mxu0 %v6493_v37  ;;  %v6598_v37 = vld [vmem:[%s7406_s29 + $0x3c] ss:$24 sps:$4 sm:$0xff]  }
 0x104   : > { %2372 = vmatprep.subr.bf16.mxu0 %v6501_v39  ;;  %2950 = vmatpush1.bf16.msra.mxu1 %v6541_v44  ;;  %v6646_v39 = vld [vmem:[#allocation5 + $0x408] ss:$16 sps:$4 sm:$0xff]  }
 0x105   : > { %2236 = vmatmul.mubr.bf16.gmra.mrb[16].mxu0 %v6474_v41  ;;  %2815 = vmatmul.mubr.bf16.gmra.mrb[16].mxu1 %v6474_v41  ;;  %v6609_v41 = vld [vmem:[#allocation5 + $0x444] ss:$16 sps:$4 sm:$0xff]   ;;  %v6600_v44 = vld [vmem:[%s7406_s29 + $0x38] ss:$24 sps:$4 sm:$0xff]  }
 0x106   : > { %2245 = vmatprep.mubr.bf16.mxu0 %v6478_v42  ;;  %2824 = vmatprep.mubr.bf16.mxu1 %v6478_v42  ;;  %v6651_v42 = vld [vmem:[#allocation5 + $0x42c] ss:$16 sps:$4 sm:$0xff]  }
 0x107   : > { %2373 = vmatpush1.bf16.msra.mxu0 %v6499_v43  ;;  %2951 = vmatprep.subr.bf16.mxu1 %v6552_v46  ;;  %v6649_v43 = vld [vmem:[#allocation5 + $0x428] ss:$16 sps:$4 sm:$0xff]   ;;  %v6607_v46 = vld [vmem:[#allocation5 + $0x440] ss:$16 sps:$4 sm:$0xff]  }
 0x108   : > { %2374 = vmatprep.subr.bf16.mxu0 %v6513_v45  ;;  %2952 = vmatpush1.bf16.msra.mxu1 %v6550_v48  ;;  %v6604_v45 = vld [vmem:[%s7406_s29 + $0x6c] ss:$24 sps:$4 sm:$0xff]  }
 0x109   : > { %2953 = vmatprep.subr.bf16.mxu1 %v6555_v50  ;;  %v6615_v48 = vld [vmem:[#allocation5 + $0x464] ss:$16 sps:$4 sm:$0xff]   ;;  %v6613_v50 = vld [vmem:[#allocation5 + $0x460] ss:$16 sps:$4 sm:$0xff]  }
 0x10b   : > { %2375 = vmatpush1.bf16.msra.mxu0 %v6511_v47  ;;  %v6660_v47 = vld [vmem:[#allocation5 + $0x44c] ss:$16 sps:$4 sm:$0xff]  }
 0x10c   : > { %2376 = vmatprep.subr.bf16.mxu0 %v6525_v49  ;;  %2954 = vmatpush1.bf16.msra.mxu1 %v6553_v54  ;;  %v6658_v49 = vld [vmem:[#allocation5 + $0x448] ss:$16 sps:$4 sm:$0xff]  }
 0x10d   : > { %2246 = vmatmul.mubr.bf16.gmra.mrb[20].mxu0 %v6480_v51  ;;  %2825 = vmatmul.mubr.bf16.gmra.mrb[20].mxu1 %v6480_v51  ;;  %v6663_v51 = vld [vmem:[#allocation5 + $0x46c] ss:$16 sps:$4 sm:$0xff]   ;;  %v6606_v54 = vld [vmem:[%s7406_s29 + $0x68] ss:$24 sps:$4 sm:$0xff]  }
 0x10e   : > { %2255 = vmatprep.mubr.bf16.mxu0 %v6484_v52  ;;  %2834 = vmatprep.mubr.bf16.mxu1 %v6484_v52  ;;  %v6621_v52 = vld [vmem:[#allocation5 + $0x484] ss:$16 sps:$4 sm:$0xff]  }
 0x10f   : > { %2377 = vmatpush1.bf16.msra.mxu0 %v6523_v53  ;;  %2955 = vmatprep.subr.bf16.mxu1 %v6564_v56  ;;  %v6661_v53 = vld [vmem:[#allocation5 + $0x468] ss:$16 sps:$4 sm:$0xff]   ;;  %v6619_v56 = vld [vmem:[#allocation5 + $0x480] ss:$16 sps:$4 sm:$0xff]  }
 0x110   : > { %2378 = vmatprep.subr.bf16.mxu0 %v6537_v55  ;;  %2956 = vmatpush1.bf16.msra.mxu1 %v6562_v58  ;;  %v6610_v55 = vld [vmem:[%s7406_s29 + $0x9c] ss:$24 sps:$4 sm:$0xff]  }
 0x111   : > { %2957 = vmatprep.subr.bf16.mxu1 %v6567_v60  ;;  %v6627_v58 = vld [vmem:[#allocation5 + $0x4a4] ss:$16 sps:$4 sm:$0xff]   ;;  %v6625_v60 = vld [vmem:[#allocation5 + $0x4a0] ss:$16 sps:$4 sm:$0xff]  }
 0x113   : > { %2379 = vmatpush1.bf16.msra.mxu0 %v6535_v57  ;;  %v6672_v57 = vld [vmem:[#allocation5 + $0x48c] ss:$16 sps:$4 sm:$0xff]  }
 0x114   : > { %2380 = vmatprep.subr.bf16.mxu0 %v6549_v59  ;;  %2958 = vmatpush1.bf16.msra.mxu1 %v6565_v0  ;;  %v6670_v59 = vld [vmem:[#allocation5 + $0x488] ss:$16 sps:$4 sm:$0xff]  }
 0x115   : > { %2256 = vmatmul.mubr.bf16.gmra.mrb[24].mxu0 %v6486_v61  ;;  %2835 = vmatmul.mubr.bf16.gmra.mrb[24].mxu1 %v6486_v61  ;;  %v6675_v61 = vld [vmem:[#allocation5 + $0x4ac] ss:$16 sps:$4 sm:$0xff]   ;;  %v6612_v0 = vld [vmem:[%s7406_s29 + $0x98] ss:$24 sps:$4 sm:$0xff]  }
 0x116   : > { %2265 = vmatprep.mubr.bf16.mxu0 %v6490_v62  ;;  %2844 = vmatprep.mubr.bf16.mxu1 %v6490_v62  ;;  %v6633_v62 = vld [vmem:[#allocation5 + $0x4c4] ss:$16 sps:$4 sm:$0xff]  }
 0x117   : > { %2381 = vmatpush1.bf16.msra.mxu0 %v6547_v63  ;;  %2959 = vmatprep.subr.bf16.mxu1 %v6576_v2  ;;  %v6673_v63 = vld [vmem:[#allocation5 + $0x4a8] ss:$16 sps:$4 sm:$0xff]   ;;  %v6631_v2 = vld [vmem:[#allocation5 + $0x4c0] ss:$16 sps:$4 sm:$0xff]  }
 0x118   : > { %2382 = vmatprep.subr.bf16.mxu0 %v6561_v1  ;;  %2960 = vmatpush1.bf16.msra.mxu1 %v6574_v4  ;;  %v6616_v1 = vld [vmem:[%s7406_s29 + $0xcc] ss:$24 sps:$4 sm:$0xff]  }
 0x119   : > { %2961 = vmatprep.subr.bf16.mxu1 %v6579_v6  ;;  %v6639_v4 = vld [vmem:[#allocation5 + $0x4e4] ss:$16 sps:$4 sm:$0xff]   ;;  %v6687_v6 = vld [vmem:[#allocation5 + $0x4ec] ss:$16 sps:$4 sm:$0xff]  }
 0x11b   : > { %2383 = vmatpush1.bf16.msra.mxu0 %v6559_v3  ;;  %v6684_v3 = vld [vmem:[#allocation5 + $0x4cc] ss:$16 sps:$4 sm:$0xff]  }
 0x11c   : > { %2384 = vmatprep.subr.bf16.mxu0 %v6573_v5  ;;  %2962 = vmatpush1.bf16.msra.mxu1 %v6577_v10  ;;  %v6682_v5 = vld [vmem:[#allocation5 + $0x4c8] ss:$16 sps:$4 sm:$0xff]  }
 0x11d   : > { %2266 = vmatmul.mubr.bf16.gmra.mrb[28].mxu0 %v6492_v7  ;;  %2845 = vmatmul.mubr.bf16.gmra.mrb[28].mxu1 %v6492_v7  ;;  %v6637_v7 = vld [vmem:[#allocation5 + $0x4e0] ss:$16 sps:$4 sm:$0xff]  }
 0x11e   : > { %2275 = vmatprep.mubr.bf16.mxu0 %v6496_v8  ;;  %2854 = vmatprep.mubr.bf16.mxu1 %v6496_v8  ;;  %v6645_v8 = vld [vmem:[#allocation5 + $0x504] ss:$16 sps:$4 sm:$0xff]   ;;  %v6618_v10 = vld [vmem:[%s7406_s29 + $0xc8] ss:$24 sps:$4 sm:$0xff]  }
 0x11f   : > { %2385 = vmatpush1.bf16.msra.mxu0 %v6571_v9  ;;  %2963 = vmatprep.subr.bf16.mxu1 %v6588_v12  ;;  %v6685_v9 = vld [vmem:[#allocation5 + $0x4e8] ss:$16 sps:$4 sm:$0xff]   ;;  %v6643_v12 = vld [vmem:[#allocation5 + $0x500] ss:$16 sps:$4 sm:$0xff]  }
 0x120   : > { %2386 = vmatprep.subr.bf16.mxu0 %v6585_v11  ;;  %2964 = vmatpush1.bf16.msra.mxu1 %v6586_v14  ;;  %v6622_v11 = vld [vmem:[%s7406_s29 + $0xfc] ss:$24 sps:$4 sm:$0xff]  }
 0x121   : > { %2965 = vmatprep.subr.bf16.mxu1 %v6591_v15  ;;  %v6657_v14 = vld [vmem:[#allocation5 + $0x524] ss:$16 sps:$4 sm:$0xff]   ;;  %v6694_v15 = vld [vmem:[#allocation5 + $0x508] ss:$16 sps:$4 sm:$0xff]  }
 0x123   : > { %2387 = vmatpush1.bf16.msra.mxu0 %v6583_v13  ;;  %v6696_v13 = vld [vmem:[#allocation5 + $0x50c] ss:$16 sps:$4 sm:$0xff]  }
 0x124   : > { %2549 = vmatprep.subr.bf16.mxu0 %v6597_v16  ;;  %2966 = vmatpush1.bf16.msra.mxu1 %v6589_v19  ;;  %v6699_v16 = vld [vmem:[#allocation5 + $0x52c] ss:$16 sps:$4 sm:$0xff]   ;;  %v6697_v19 = vld [vmem:[#allocation5 + $0x528] ss:$16 sps:$4 sm:$0xff]  }
 0x125   : > { %2276 = vmatmul.mubr.bf16.gmra.mrb[32].mxu0 %v6498_v17  ;;  %2855 = vmatmul.mubr.bf16.gmra.mrb[32].mxu1 %v6498_v17  ;;  %v6655_v17 = vld [vmem:[#allocation5 + $0x520] ss:$16 sps:$4 sm:$0xff]  }
 0x126   : > { %2285 = vmatprep.mubr.bf16.mxu0 %v6508_v18  ;;  %2864 = vmatprep.mubr.bf16.mxu1 %v6508_v18  ;;  %v6669_v18 = vld [vmem:[#allocation5 + $0x544] ss:$16 sps:$4 sm:$0xff]  }
 0x127   : > { %3128 = vmatprep.subr.bf16.mxu1 %v6648_v20  ;;  %v6624_v20 = vld [vmem:[%s7406_s29 + $0xf8] ss:$24 sps:$4 sm:$0xff]  }
 0x12d   : > { %2286 = vmatmul.mubr.bf16.gmra.mrb[36].mxu0 %v6510_v21  ;;  %2865 = vmatmul.mubr.bf16.gmra.mrb[36].mxu1 %v6510_v21  ;;  %v6628_v21 = vld [vmem:[%s7406_s29 + $0x12c] ss:$24 sps:$4 sm:$0xff]  }
 0x12e   : > { %2295 = vmatprep.mubr.bf16.mxu0 %v6520_v22  ;;  %2874 = vmatprep.mubr.bf16.mxu1 %v6520_v22  ;;  %v6667_v22 = vld [vmem:[#allocation5 + $0x540] ss:$16 sps:$4 sm:$0xff]  }
 0x135   : > { %2296 = vmatmul.mubr.bf16.gmra.mrb[40].mxu0 %v6522_v23  ;;  %2875 = vmatmul.mubr.bf16.gmra.mrb[40].mxu1 %v6522_v23  ;;  %v6708_v23 = vld [vmem:[#allocation5 + $0x54c] ss:$16 sps:$4 sm:$0xff]  }
 0x136   : > { %2305 = vmatprep.mubr.bf16.mxu0 %v6532_v24  ;;  %2884 = vmatprep.mubr.bf16.mxu1 %v6532_v24  ;;  %v6681_v24 = vld [vmem:[#allocation5 + $0x564] ss:$16 sps:$4 sm:$0xff]  }
 0x13d   : > { %2306 = vmatmul.mubr.bf16.gmra.mrb[44].mxu0 %v6534_v25  ;;  %2885 = vmatmul.mubr.bf16.gmra.mrb[44].mxu1 %v6534_v25  ;;  %v6706_v25 = vld [vmem:[#allocation5 + $0x548] ss:$16 sps:$4 sm:$0xff]  }
 0x13e   : > { %2315 = vmatprep.mubr.bf16.mxu0 %v6544_v26  ;;  %2894 = vmatprep.mubr.bf16.mxu1 %v6544_v26  ;;  %v6711_v26 = vld [vmem:[#allocation5 + $0x56c] ss:$16 sps:$4 sm:$0xff]  }
 0x145   : > { %2316 = vmatmul.mubr.bf16.gmra.mrb[48].mxu0 %v6546_v27  ;;  %2895 = vmatmul.mubr.bf16.gmra.mrb[48].mxu1 %v6546_v27  ;;  %v6679_v27 = vld [vmem:[#allocation5 + $0x560] ss:$16 sps:$4 sm:$0xff]  }
 0x146   : > { %2325 = vmatprep.mubr.bf16.mxu0 %v6556_v28  ;;  %2904 = vmatprep.mubr.bf16.mxu1 %v6556_v28  ;;  %v6693_v28 = vld [vmem:[#allocation5 + $0x584] ss:$16 sps:$4 sm:$0xff]  }
 0x14d   : > { %2326 = vmatmul.mubr.bf16.gmra.mrb[52].mxu0 %v6558_v29  ;;  %2905 = vmatmul.mubr.bf16.gmra.mrb[52].mxu1 %v6558_v29  ;;  %v6709_v29 = vld [vmem:[#allocation5 + $0x568] ss:$16 sps:$4 sm:$0xff]  }
 0x14e   : > { %2335 = vmatprep.mubr.bf16.mxu0 %v6568_v30  ;;  %2914 = vmatprep.mubr.bf16.mxu1 %v6568_v30  ;;  %v6630_v30 = vld [vmem:[%s7406_s29 + $0x128] ss:$24 sps:$4 sm:$0xff]  }
 0x155   : > { %2336 = vmatmul.mubr.bf16.gmra.mrb[56].mxu0 %v6570_v31  ;;  %2915 = vmatmul.mubr.bf16.gmra.mrb[56].mxu1 %v6570_v31  ;;  %v6634_v31 = vld [vmem:[%s7406_s29 + $0x15c] ss:$24 sps:$4 sm:$0xff]  }
 0x156   : > { %2345 = vmatprep.mubr.bf16.mxu0 %v6580_v32  ;;  %2924 = vmatprep.mubr.bf16.mxu1 %v6580_v32  ;;  %v6691_v32 = vld [vmem:[#allocation5 + $0x580] ss:$16 sps:$4 sm:$0xff]  }
 0x15d   : > { %2346 = vmatmul.mubr.bf16.gmra.mrb[60].mxu0 %v6582_v33  ;;  %2925 = vmatmul.mubr.bf16.gmra.mrb[60].mxu1 %v6582_v33  ;;  %v6720_v33 = vld [vmem:[#allocation5 + $0x58c] ss:$16 sps:$4 sm:$0xff]  }
 0x15e   : > { %2388 = vmatprep.mubr.bf16.mxu0 %v6594_v34  ;;  %2967 = vmatprep.mubr.bf16.mxu1 %v6594_v34  ;;  %v6705_v34 = vld [vmem:[#allocation5 + $0x5a4] ss:$16 sps:$4 sm:$0xff]  }
 0x165   : > { %2389 = vmatmul.mubr.bf16.vlgmr.msra.gmra.mrb[0].mxu0 %v6592_v35  ;;  %2968 = vmatmul.mubr.bf16.vlgmr.msra.gmra.mrb[0].mxu1 %v6592_v35  ;;  %v6718_v35 = vld [vmem:[#allocation5 + $0x588] ss:$16 sps:$4 sm:$0xff]  }
 0x166   : > { %2550 = vmatpush1.bf16.msra.mxu0 %v6595_v36  ;;  %2398 = vmatprep.mubr.bf16.mxu0 %v6598_v37  ;;  %v6723_v36 = vld [vmem:[#allocation5 + $0x5ac] ss:$16 sps:$4 sm:$0xff]  }
 0x167   : > { %2977 = vmatprep.mubr.bf16.mxu1 %v6598_v37  ;;  %2551 = vmatprep.subr.bf16.mxu0 %v6603_v38  ;;  %v6703_v37 = vld [vmem:[#allocation5 + $0x5a0] ss:$16 sps:$4 sm:$0xff]   ;;  %v6717_v38 = vld [vmem:[#allocation5 + $0x5c4] ss:$16 sps:$4 sm:$0xff]  }
 0x168   : > { %3129 = vmatpush1.bf16.msra.mxu1 %v6646_v39  ;;  %v6721_v39 = vld [vmem:[#allocation5 + $0x5a8] ss:$16 sps:$4 sm:$0xff]  }
 0x169   : > { %3130 = vmatprep.subr.bf16.mxu1 %v6651_v42  ;;  %v6715_v42 = vld [vmem:[#allocation5 + $0x5c0] ss:$16 sps:$4 sm:$0xff]  }
 0x16a   : > { %2552 = vmatpush1.bf16.msra.mxu0 %v6601_v40  ;;  %v6636_v40 = vld [vmem:[%s7406_s29 + $0x158] ss:$24 sps:$4 sm:$0xff]  }
 0x16b   : > { %2553 = vmatprep.subr.bf16.mxu0 %v6609_v41  ;;  %v6640_v41 = vld [vmem:[%s7406_s29 + $0x18c] ss:$24 sps:$4 sm:$0xff]  }
 0x16c   : > { %3131 = vmatpush1.bf16.msra.mxu1 %v6649_v43  ;;  %v6732_v43 = vld [vmem:[#allocation5 + $0x5cc] ss:$16 sps:$4 sm:$0xff]  }
 0x16d   : > { %2399 = vmatmul.mubr.bf16.gmra.mrb[4].mxu0 %v6600_v44  ;;  %2978 = vmatmul.mubr.bf16.gmra.mrb[4].mxu1 %v6600_v44  ;;  %v6729_v44 = vld [vmem:[#allocation5 + $0x5e4] ss:$16 sps:$4 sm:$0xff]  }
 0x16e   : > { %2408 = vmatprep.mubr.bf16.mxu0 %v6604_v45  ;;  %2987 = vmatprep.mubr.bf16.mxu1 %v6604_v45  ;;  %v6730_v45 = vld [vmem:[#allocation5 + $0x5c8] ss:$16 sps:$4 sm:$0xff]  }
 0x16f   : > { %2554 = vmatpush1.bf16.msra.mxu0 %v6607_v46  ;;  %3132 = vmatprep.subr.bf16.mxu1 %v6660_v47  ;;  %v6735_v46 = vld [vmem:[#allocation5 + $0x5ec] ss:$16 sps:$4 sm:$0xff]   ;;  %v6727_v47 = vld [vmem:[#allocation5 + $0x5e0] ss:$16 sps:$4 sm:$0xff]  }
 0x170   : > { %2555 = vmatprep.subr.bf16.mxu0 %v6615_v48  ;;  %3133 = vmatpush1.bf16.msra.mxu1 %v6658_v49  ;;  %v6733_v48 = vld [vmem:[#allocation5 + $0x5e8] ss:$16 sps:$4 sm:$0xff]  }
 0x171   : > { %3134 = vmatprep.subr.bf16.mxu1 %v6663_v51  ;;  %v6642_v49 = vld [vmem:[%s7406_s29 + $0x188] ss:$24 sps:$4 sm:$0xff]   ;;  %v6654_v51 = vld [vmem:[%s7406_s29 + $0x1b8] ss:$24 sps:$4 sm:$0xff]  }
 0x173   : > { %2556 = vmatpush1.bf16.msra.mxu0 %v6613_v50  ;;  %v6652_v50 = vld [vmem:[%s7406_s29 + $0x1bc] ss:$24 sps:$4 sm:$0xff]  }
 0x174   : > { %2557 = vmatprep.subr.bf16.mxu0 %v6621_v52  ;;  %3135 = vmatpush1.bf16.msra.mxu1 %v6661_v53  ;;  %v6664_v52 = vld [vmem:[%s7406_s29 + $0x1ec] ss:$24 sps:$4 sm:$0xff]   ;;  %v6666_v53 = vld [vmem:[%s7406_s29 + $0x1e8] ss:$24 sps:$4 sm:$0xff]  }
 0x175   : > { %2409 = vmatmul.mubr.bf16.gmra.mrb[8].mxu0 %v6606_v54  ;;  %2988 = vmatmul.mubr.bf16.gmra.mrb[8].mxu1 %v6606_v54  ;;  %v6676_v54 = vld [vmem:[%s7406_s29 + $0x21c] ss:$24 sps:$4 sm:$0xff]  }
 0x176   : > { %2418 = vmatprep.mubr.bf16.mxu0 %v6610_v55  ;;  %2997 = vmatprep.mubr.bf16.mxu1 %v6610_v55  ;;  %v6678_v55 = vld [vmem:[%s7406_s29 + $0x218] ss:$24 sps:$4 sm:$0xff]  }
 0x177   : > { %2558 = vmatpush1.bf16.msra.mxu0 %v6619_v56  ;;  %3136 = vmatprep.subr.bf16.mxu1 %v6672_v57  ;;  %v6688_v56 = vld [vmem:[%s7406_s29 + $0x24c] ss:$24 sps:$4 sm:$0xff]  }
 0x178   : > { %2559 = vmatprep.subr.bf16.mxu0 %v6627_v58  ;;  %3137 = vmatpush1.bf16.msra.mxu1 %v6670_v59  ;;  %v6774_v57 = vld [vmem:[#allocation7 + $0x4] ss:$8 sps:$4 sm:$0xff]   ;;  %v6690_v58 = vld [vmem:[%s7406_s29 + $0x248] ss:$24 sps:$4 sm:$0xff]   ;;  %v6700_v59 = vld [vmem:[%s7406_s29 + $0x27c] ss:$24 sps:$4 sm:$0xff]  }
 0x179   : > { %3138 = vmatprep.subr.bf16.mxu1 %v6675_v61  ;;  %v6712_v61 = vld [vmem:[%s7406_s29 + $0x2ac] ss:$24 sps:$4 sm:$0xff]  }
 0x17b   : > { %2560 = vmatpush1.bf16.msra.mxu0 %v6625_v60  ;;  %v6702_v60 = vld [vmem:[%s7406_s29 + $0x278] ss:$24 sps:$4 sm:$0xff]  }
 0x17c   : > { %2561 = vmatprep.subr.bf16.mxu0 %v6633_v62  ;;  %3139 = vmatpush1.bf16.msra.mxu1 %v6673_v63  ;;  %v6714_v62 = vld [vmem:[%s7406_s29 + $0x2a8] ss:$24 sps:$4 sm:$0xff]   ;;  %v6724_v63 = vld [vmem:[%s7406_s29 + $0x2dc] ss:$24 sps:$4 sm:$0xff]  }
 0x17d   : > { %2419 = vmatmul.mubr.bf16.gmra.mrb[12].mxu0 %v6612_v0  ;;  %2998 = vmatmul.mubr.bf16.gmra.mrb[12].mxu1 %v6612_v0  ;;  %v6726_v0 = vld [vmem:[%s7406_s29 + $0x2d8] ss:$24 sps:$4 sm:$0xff]  }
 0x17e   : > { %2428 = vmatprep.mubr.bf16.mxu0 %v6616_v1  ;;  %3007 = vmatprep.mubr.bf16.mxu1 %v6616_v1  ;;  %v6738_v1 = vld [vmem:[%s7406_s29 + $0x14] ss:$24 sps:$4 sm:$0xff]  }
 0x17f   : > { %2562 = vmatpush1.bf16.msra.mxu0 %v6631_v2  ;;  %3140 = vmatprep.subr.bf16.mxu1 %v6684_v3  ;;  %v6736_v2 = vld [vmem:[%s7406_s29 + $0x10] ss:$24 sps:$4 sm:$0xff]   ;;  %v6739_v3 = vld [vmem:[%s7406_s29 + $0x44] ss:$24 sps:$4 sm:$0xff]  }
 0x180   : > { %2563 = vmatprep.subr.bf16.mxu0 %v6639_v4  ;;  %3141 = vmatpush1.bf16.msra.mxu1 %v6682_v5  ;;  %v6772_v4 = vld [vmem:[#allocation7] ss:$8 sps:$4 sm:$0xff]   ;;  %v6780_v5 = vld [vmem:[#allocation7 + $0x14] ss:$8 sps:$4 sm:$0xff]  }
 0x181   : > { %3142 = vmatprep.subr.bf16.mxu1 %v6687_v6  ;;  %v6778_v6 = vld [vmem:[#allocation7 + $0x10] ss:$8 sps:$4 sm:$0xff]  }
 0x183   : > { %2564 = vmatpush1.bf16.msra.mxu0 %v6637_v7  ;;  %v6786_v7 = vld [vmem:[#allocation7 + $0x24] ss:$8 sps:$4 sm:$0xff]  }
 0x184   : > { %2565 = vmatprep.subr.bf16.mxu0 %v6645_v8  ;;  %3143 = vmatpush1.bf16.msra.mxu1 %v6685_v9  ;;  %v6741_v8 = vld [vmem:[%s7406_s29 + $0x40] ss:$24 sps:$4 sm:$0xff]   ;;  %v6742_v9 = vld [vmem:[%s7406_s29 + $0x74] ss:$24 sps:$4 sm:$0xff]  }
 0x185   : > { %2429 = vmatmul.mubr.bf16.gmra.mrb[16].mxu0 %v6618_v10  ;;  %3008 = vmatmul.mubr.bf16.gmra.mrb[16].mxu1 %v6618_v10  ;;  %v6784_v10 = vld [vmem:[#allocation7 + $0x20] ss:$8 sps:$4 sm:$0xff]  }
 0x186   : > { %2438 = vmatprep.mubr.bf16.mxu0 %v6622_v11  ;;  %3017 = vmatprep.mubr.bf16.mxu1 %v6622_v11  ;;  %v6792_v11 = vld [vmem:[#allocation7 + $0x34] ss:$8 sps:$4 sm:$0xff]  }
 0x187   : > { %2566 = vmatpush1.bf16.msra.mxu0 %v6643_v12  ;;  %3144 = vmatprep.subr.bf16.mxu1 %v6696_v13  ;;  %v6790_v12 = vld [vmem:[#allocation7 + $0x30] ss:$8 sps:$4 sm:$0xff]   ;;  %v6798_v13 = vld [vmem:[#allocation7 + $0x44] ss:$8 sps:$4 sm:$0xff]  }
 0x188   : > { %2567 = vmatprep.subr.bf16.mxu0 %v6657_v14  ;;  %3145 = vmatpush1.bf16.msra.mxu1 %v6694_v15  ;;  %v6744_v14 = vld [vmem:[%s7406_s29 + $0x70] ss:$24 sps:$4 sm:$0xff]   ;;  %v6745_v15 = vld [vmem:[%s7406_s29 + $0xa4] ss:$24 sps:$4 sm:$0xff]  }
 0x189   : > { %3146 = vmatprep.subr.bf16.mxu1 %v6699_v16  ;;  %v6796_v16 = vld [vmem:[#allocation7 + $0x40] ss:$8 sps:$4 sm:$0xff]  }
 0x18b   : > { %2568 = vmatpush1.bf16.msra.mxu0 %v6655_v17  ;;  %v6801_v17 = vld [vmem:[#allocation7 + $0x54] ss:$8 sps:$4 sm:$0xff]  }
 0x18c   : > { %2569 = vmatprep.subr.bf16.mxu0 %v6669_v18  ;;  %3147 = vmatpush1.bf16.msra.mxu1 %v6697_v19  ;;  %v6799_v18 = vld [vmem:[#allocation7 + $0x50] ss:$8 sps:$4 sm:$0xff]   ;;  %v6804_v19 = vld [vmem:[#allocation7 + $0x64] ss:$8 sps:$4 sm:$0xff]  }
 0x18d   : > { %2439 = vmatmul.mubr.bf16.gmra.mrb[20].mxu0 %v6624_v20  ;;  %3018 = vmatmul.mubr.bf16.gmra.mrb[20].mxu1 %v6624_v20  ;;  %v6747_v20 = vld [vmem:[%s7406_s29 + $0xa0] ss:$24 sps:$4 sm:$0xff]  }
 0x18e   : > { %2448 = vmatprep.mubr.bf16.mxu0 %v6628_v21  ;;  %3027 = vmatprep.mubr.bf16.mxu1 %v6628_v21  ;;  %v6748_v21 = vld [vmem:[%s7406_s29 + $0xd4] ss:$24 sps:$4 sm:$0xff]  }
 0x18f   : > { %2570 = vmatpush1.bf16.msra.mxu0 %v6667_v22  ;;  %3148 = vmatprep.subr.bf16.mxu1 %v6708_v23  ;;  %v6802_v22 = vld [vmem:[#allocation7 + $0x60] ss:$8 sps:$4 sm:$0xff]   ;;  %v6807_v23 = vld [vmem:[#allocation7 + $0x74] ss:$8 sps:$4 sm:$0xff]  }
 0x190   : > { %2571 = vmatprep.subr.bf16.mxu0 %v6681_v24  ;;  %3149 = vmatpush1.bf16.msra.mxu1 %v6706_v25  ;;  %v6805_v24 = vld [vmem:[#allocation7 + $0x70] ss:$8 sps:$4 sm:$0xff]   ;;  %v6810_v25 = vld [vmem:[#allocation7 + $0x84] ss:$8 sps:$4 sm:$0xff]  }
 0x191   : > { %3150 = vmatprep.subr.bf16.mxu1 %v6711_v26  ;;  %v6750_v26 = vld [vmem:[%s7406_s29 + $0xd0] ss:$24 sps:$4 sm:$0xff]  }
 0x193   : > { %2572 = vmatpush1.bf16.msra.mxu0 %v6679_v27  ;;  %v6751_v27 = vld [vmem:[%s7406_s29 + $0x104] ss:$24 sps:$4 sm:$0xff]  }
 0x194   : > { %2573 = vmatprep.subr.bf16.mxu0 %v6693_v28  ;;  %3151 = vmatpush1.bf16.msra.mxu1 %v6709_v29  ;;  %v6808_v28 = vld [vmem:[#allocation7 + $0x80] ss:$8 sps:$4 sm:$0xff]   ;;  %v6813_v29 = vld [vmem:[#allocation7 + $0x94] ss:$8 sps:$4 sm:$0xff]  }
 0x195   : > { %2449 = vmatmul.mubr.bf16.gmra.mrb[24].mxu0 %v6630_v30  ;;  %3028 = vmatmul.mubr.bf16.gmra.mrb[24].mxu1 %v6630_v30  ;;  %v6811_v30 = vld [vmem:[#allocation7 + $0x90] ss:$8 sps:$4 sm:$0xff]  }
 0x196   : > { %2458 = vmatprep.mubr.bf16.mxu0 %v6634_v31  ;;  %3037 = vmatprep.mubr.bf16.mxu1 %v6634_v31  ;;  %v6816_v31 = vld [vmem:[#allocation7 + $0xa4] ss:$8 sps:$4 sm:$0xff]  }
 0x197   : > { %2574 = vmatpush1.bf16.msra.mxu0 %v6691_v32  ;;  %3152 = vmatprep.subr.bf16.mxu1 %v6720_v33  ;;  %v6753_v32 = vld [vmem:[%s7406_s29 + $0x100] ss:$24 sps:$4 sm:$0xff]   ;;  %v6754_v33 = vld [vmem:[%s7406_s29 + $0x134] ss:$24 sps:$4 sm:$0xff]  }
 0x198   : > { %2575 = vmatprep.subr.bf16.mxu0 %v6705_v34  ;;  %3153 = vmatpush1.bf16.msra.mxu1 %v6718_v35  ;;  %v6814_v34 = vld [vmem:[#allocation7 + $0xa0] ss:$8 sps:$4 sm:$0xff]   ;;  %v6819_v35 = vld [vmem:[#allocation7 + $0xb4] ss:$8 sps:$4 sm:$0xff]  }
 0x199   : > { %3154 = vmatprep.subr.bf16.mxu1 %v6723_v36  ;;  %v6817_v36 = vld [vmem:[#allocation7 + $0xb0] ss:$8 sps:$4 sm:$0xff]  }
 0x19b   : > { %2576 = vmatpush1.bf16.msra.mxu0 %v6703_v37  ;;  %v6822_v37 = vld [vmem:[#allocation7 + $0xc4] ss:$8 sps:$4 sm:$0xff]  }
 0x19c   : > { %2577 = vmatprep.subr.bf16.mxu0 %v6717_v38  ;;  %3155 = vmatpush1.bf16.msra.mxu1 %v6721_v39  ;;  %v6756_v38 = vld [vmem:[%s7406_s29 + $0x130] ss:$24 sps:$4 sm:$0xff]   ;;  %v6757_v39 = vld [vmem:[%s7406_s29 + $0x164] ss:$24 sps:$4 sm:$0xff]  }
 0x19d   : > { %2459 = vmatmul.mubr.bf16.gmra.mrb[28].mxu0 %v6636_v40  ;;  %3038 = vmatmul.mubr.bf16.gmra.mrb[28].mxu1 %v6636_v40  ;;  %v6820_v40 = vld [vmem:[#allocation7 + $0xc0] ss:$8 sps:$4 sm:$0xff]  }
 0x19e   : > { %2468 = vmatprep.mubr.bf16.mxu0 %v6640_v41  ;;  %3047 = vmatprep.mubr.bf16.mxu1 %v6640_v41  ;;  %v6825_v41 = vld [vmem:[#allocation7 + $0xd4] ss:$8 sps:$4 sm:$0xff]  }
 0x19f   : > { %2578 = vmatpush1.bf16.msra.mxu0 %v6715_v42  ;;  %3156 = vmatprep.subr.bf16.mxu1 %v6732_v43  ;;  %v6823_v42 = vld [vmem:[#allocation7 + $0xd0] ss:$8 sps:$4 sm:$0xff]   ;;  %v6828_v43 = vld [vmem:[#allocation7 + $0xe4] ss:$8 sps:$4 sm:$0xff]  }
 0x1a0   : > { %2579 = vmatprep.subr.bf16.mxu0 %v6729_v44  ;;  %3157 = vmatpush1.bf16.msra.mxu1 %v6730_v45  ;;  %v6759_v44 = vld [vmem:[%s7406_s29 + $0x160] ss:$24 sps:$4 sm:$0xff]   ;;  %v6760_v45 = vld [vmem:[%s7406_s29 + $0x194] ss:$24 sps:$4 sm:$0xff]  }
 0x1a1   : > { %3158 = vmatprep.subr.bf16.mxu1 %v6735_v46  ;;  %v6826_v46 = vld [vmem:[#allocation7 + $0xe0] ss:$8 sps:$4 sm:$0xff]  }
 0x1a3   : > { %2580 = vmatpush1.bf16.msra.mxu0 %v6727_v47  ;;  %v6762_v47 = vld [vmem:[%s7406_s29 + $0x190] ss:$24 sps:$4 sm:$0xff]  }
 0x1a4   : > { %3159 = vmatpush1.bf16.msra.mxu1 %v6733_v48  ;;  %3909 = vmatprep.subr.bf16.mxu0 %v6774_v57  ;;  %v6763_v48 = vld [vmem:[%s7406_s29 + $0x1c4] ss:$24 sps:$4 sm:$0xff]  }
 0x1a5   : > { %2469 = vmatmul.mubr.bf16.gmra.mrb[32].mxu0 %v6642_v49  ;;  %3048 = vmatmul.mubr.bf16.gmra.mrb[32].mxu1 %v6642_v49  ;;  %v6765_v49 = vld [vmem:[%s7406_s29 + $0x1c0] ss:$24 sps:$4 sm:$0xff]  }
 0x1a6   : > { %2478 = vmatprep.mubr.bf16.mxu0 %v6652_v50  ;;  %3057 = vmatprep.mubr.bf16.mxu1 %v6652_v50  ;;  %v6766_v50 = vld [vmem:[%s7406_s29 + $0x1f4] ss:$24 sps:$4 sm:$0xff]  }
 0x1a7   : > { %5708 = vmatprep.subr.bf16.mxu1 %v6774_v57  ;;  %v6777_v57 = vld [vmem:[%s7406_s29 + $0x250] ss:$24 sps:$4 sm:$0xff]  }
 0x1ad   : > { %2479 = vmatmul.mubr.bf16.gmra.mrb[36].mxu0 %v6654_v51  ;;  %3058 = vmatmul.mubr.bf16.gmra.mrb[36].mxu1 %v6654_v51  ;;  %v6768_v51 = vld [vmem:[%s7406_s29 + $0x1f0] ss:$24 sps:$4 sm:$0xff]  }
 0x1ae   : > { %2488 = vmatprep.mubr.bf16.mxu0 %v6664_v52  ;;  %3067 = vmatprep.mubr.bf16.mxu1 %v6664_v52  ;;  %v6769_v52 = vld [vmem:[%s7406_s29 + $0x224] ss:$24 sps:$4 sm:$0xff]  }
 0x1b5   : > { %2489 = vmatmul.mubr.bf16.gmra.mrb[40].mxu0 %v6666_v53  ;;  %3068 = vmatmul.mubr.bf16.gmra.mrb[40].mxu1 %v6666_v53  ;;  %v6771_v53 = vld [vmem:[%s7406_s29 + $0x220] ss:$24 sps:$4 sm:$0xff]  }
 0x1b6   : > { %2498 = vmatprep.mubr.bf16.mxu0 %v6676_v54  ;;  %3077 = vmatprep.mubr.bf16.mxu1 %v6676_v54  ;;  %v6775_v54 = vld [vmem:[%s7406_s29 + $0x254] ss:$24 sps:$4 sm:$0xff]  }
 0x1bd   : > { %2499 = vmatmul.mubr.bf16.gmra.mrb[44].mxu0 %v6678_v55  ;;  %3078 = vmatmul.mubr.bf16.gmra.mrb[44].mxu1 %v6678_v55  ;;  %v6831_v55 = vld [vmem:[#allocation7 + $0xf4] ss:$8 sps:$4 sm:$0xff]  }
 0x1be   : > { %2508 = vmatprep.mubr.bf16.mxu0 %v6688_v56  ;;  %3087 = vmatprep.mubr.bf16.mxu1 %v6688_v56  ;;  %v6829_v56 = vld [vmem:[#allocation7 + $0xf0] ss:$8 sps:$4 sm:$0xff]  }
 0x1c5   : > { %2509 = vmatmul.mubr.bf16.gmra.mrb[48].mxu0 %v6690_v58  ;;  %3088 = vmatmul.mubr.bf16.gmra.mrb[48].mxu1 %v6690_v58  ;;  %v6781_v58 = vld [vmem:[%s7406_s29 + $0x284] ss:$24 sps:$4 sm:$0xff]  }
 0x1c6   : > { %2518 = vmatprep.mubr.bf16.mxu0 %v6700_v59  ;;  %3097 = vmatprep.mubr.bf16.mxu1 %v6700_v59  ;;  %v6834_v59 = vld [vmem:[#allocation7 + $0x104] ss:$8 sps:$4 sm:$0xff]  }
 0x1cd   : > { %2519 = vmatmul.mubr.bf16.gmra.mrb[52].mxu0 %v6702_v60  ;;  %3098 = vmatmul.mubr.bf16.gmra.mrb[52].mxu1 %v6702_v60  ;;  %v6783_v60 = vld [vmem:[%s7406_s29 + $0x280] ss:$24 sps:$4 sm:$0xff]  }
 0x1ce   : > { %2528 = vmatprep.mubr.bf16.mxu0 %v6712_v61  ;;  %3107 = vmatprep.mubr.bf16.mxu1 %v6712_v61  ;;  %v6787_v61 = vld [vmem:[%s7406_s29 + $0x2b4] ss:$24 sps:$4 sm:$0xff]  }
 0x1d5   : > { %2529 = vmatmul.mubr.bf16.gmra.mrb[56].mxu0 %v6714_v62  ;;  %3108 = vmatmul.mubr.bf16.gmra.mrb[56].mxu1 %v6714_v62  ;;  %v6789_v62 = vld [vmem:[%s7406_s29 + $0x2b0] ss:$24 sps:$4 sm:$0xff]  }
 0x1d6   : > { %2538 = vmatprep.mubr.bf16.mxu0 %v6724_v63  ;;  %3117 = vmatprep.mubr.bf16.mxu1 %v6724_v63  ;;  %v6793_v63 = vld [vmem:[%s7406_s29 + $0x2e4] ss:$24 sps:$4 sm:$0xff]  }
 0x1dd   : > { %2539 = vmatmul.mubr.bf16.gmra.mrb[60].mxu0 %v6726_v0  ;;  %3118 = vmatmul.mubr.bf16.gmra.mrb[60].mxu1 %v6726_v0  ;;  %v6795_v0 = vld [vmem:[%s7406_s29 + $0x2e0] ss:$24 sps:$4 sm:$0xff]  }
 0x1de   : > { %2581 = vmatprep.mubr.bf16.mxu0 %v6738_v1  ;;  %3160 = vmatprep.mubr.bf16.mxu1 %v6738_v1  ;;  %v703_v1 = vlaneseq }
 0x1e5   : > { %2582 = vmatmul.mubr.bf16.vlgmr.msra.gmra.mrb[0].mxu0 %v6736_v2  ;;  %3161 = vmatmul.mubr.bf16.vlgmr.msra.gmra.mrb[0].mxu1 %v6736_v2  ;;  %v7516_v2 = vshrl.u32 %v703_v1, 7 }
 0x1e6   : > { %2591 = vmatprep.mubr.bf16.mxu0 %v6739_v3  ;;  %3170 = vmatprep.mubr.bf16.mxu1 %v6739_v3 }
 0x1e7   : > { %3910 = vmatpush1.bf16.msra.mxu0 %v6772_v4  ;;  %5724 = vmatpush1.bf16.msra.mxu1 %v6772_v4  ;;  %v705_v3 = vsub.s32 0, %v7516_v2  ;;  %v713_v4 = vsub.s32 2, %v7516_v2 }
 0x1e8   : > { %3911 = vmatprep.subr.bf16.mxu0 %v6780_v5  ;;  %5709 = vmatprep.subr.bf16.mxu1 %v6780_v5  ;;  %v701_v5 = vld [vmem:[%s8040_s2] sm:$0xf] }
 0x1eb   : > { %3912 = vmatpush1.bf16.msra.mxu0 %v6778_v6  ;;  %5725 = vmatpush1.bf16.msra.mxu1 %v6778_v6  ;;  %v709_v6 = vsub.s32 1, %v7516_v2 }
 0x1ec   : > { %3913 = vmatprep.subr.bf16.mxu0 %v6786_v7  ;;  %5710 = vmatprep.subr.bf16.mxu1 %v6786_v7  ;;  %v717_v7 = vsub.s32 3, %v7516_v2 }
 0x1ed   : > { %2592 = vmatmul.mubr.bf16.gmra.mrb[4].mxu0 %v6741_v8  ;;  %3171 = vmatmul.mubr.bf16.gmra.mrb[4].mxu1 %v6741_v8  ;;  %v7527_v8 = vrot.slane %v701_v5, %v705_v3 }
 0x1ee   : > { %2601 = vmatprep.mubr.bf16.mxu0 %v6742_v9  ;;  %3180 = vmatprep.mubr.bf16.mxu1 %v6742_v9  ;;  %v7529_v9 = vrot.slane %v701_v5, %v713_v4 }
 0x1ef   : > { %3914 = vmatpush1.bf16.msra.mxu0 %v6784_v10  ;;  %5726 = vmatpush1.bf16.msra.mxu1 %v6784_v10  ;;  %v7533_v10 = vrot.slane %v701_v5, %v709_v6 }
 0x1f0   : > { %3915 = vmatprep.subr.bf16.mxu0 %v6792_v11  ;;  %5711 = vmatprep.subr.bf16.mxu1 %v6792_v11  ;;  %v7535_v11 = vrot.slane %v701_v5, %v717_v7 }
 0x1f3   : > { %3916 = vmatpush1.bf16.msra.mxu0 %v6790_v12  ;;  %5727 = vmatpush1.bf16.msra.mxu1 %v6790_v12 }
 0x1f4   : > { %3917 = vmatprep.subr.bf16.mxu0 %v6798_v13  ;;  %5712 = vmatprep.subr.bf16.mxu1 %v6798_v13 }
 0x1f5   : > { %2602 = vmatmul.mubr.bf16.gmra.mrb[8].mxu0 %v6744_v14  ;;  %3181 = vmatmul.mubr.bf16.gmra.mrb[8].mxu1 %v6744_v14 }
 0x1f6   : > { %2611 = vmatprep.mubr.bf16.mxu0 %v6745_v15  ;;  %3190 = vmatprep.mubr.bf16.mxu1 %v6745_v15 }
 0x1f7   : > { %3918 = vmatpush1.bf16.msra.mxu0 %v6796_v16  ;;  %5728 = vmatpush1.bf16.msra.mxu1 %v6796_v16 }
 0x1f8   : > { %3919 = vmatprep.subr.bf16.mxu0 %v6801_v17  ;;  %5713 = vmatprep.subr.bf16.mxu1 %v6801_v17 }
 0x1fb   : > { %3920 = vmatpush1.bf16.msra.mxu0 %v6799_v18  ;;  %5729 = vmatpush1.bf16.msra.mxu1 %v6799_v18 }
 0x1fc   : > { %3921 = vmatprep.subr.bf16.mxu0 %v6804_v19  ;;  %5714 = vmatprep.subr.bf16.mxu1 %v6804_v19 }
 0x1fd   : > { %2612 = vmatmul.mubr.bf16.gmra.mrb[12].mxu0 %v6747_v20  ;;  %3191 = vmatmul.mubr.bf16.gmra.mrb[12].mxu1 %v6747_v20 }
 0x1fe   : > { %2621 = vmatprep.mubr.bf16.mxu0 %v6748_v21  ;;  %3200 = vmatprep.mubr.bf16.mxu1 %v6748_v21 }
 0x1ff   : > { %3922 = vmatpush1.bf16.msra.mxu0 %v6802_v22  ;;  %5730 = vmatpush1.bf16.msra.mxu1 %v6802_v22 }
 0x200   : > { %3923 = vmatprep.subr.bf16.mxu0 %v6807_v23  ;;  %5715 = vmatprep.subr.bf16.mxu1 %v6807_v23 }
 0x203   : > { %3924 = vmatpush1.bf16.msra.mxu0 %v6805_v24  ;;  %5731 = vmatpush1.bf16.msra.mxu1 %v6805_v24 }
 0x204   : > { %3925 = vmatprep.subr.bf16.mxu0 %v6810_v25  ;;  %5716 = vmatprep.subr.bf16.mxu1 %v6810_v25 }
 0x205   : > { %2622 = vmatmul.mubr.bf16.gmra.mrb[16].mxu0 %v6750_v26  ;;  %3201 = vmatmul.mubr.bf16.gmra.mrb[16].mxu1 %v6750_v26 }
 0x206   : > { %2631 = vmatprep.mubr.bf16.mxu0 %v6751_v27  ;;  %3210 = vmatprep.mubr.bf16.mxu1 %v6751_v27 }
 0x207   : > { %3926 = vmatpush1.bf16.msra.mxu0 %v6808_v28  ;;  %5732 = vmatpush1.bf16.msra.mxu1 %v6808_v28 }
 0x208   : > { %3927 = vmatprep.subr.bf16.mxu0 %v6813_v29  ;;  %5717 = vmatprep.subr.bf16.mxu1 %v6813_v29 }
 0x20b   : > { %3928 = vmatpush1.bf16.msra.mxu0 %v6811_v30  ;;  %5733 = vmatpush1.bf16.msra.mxu1 %v6811_v30 }
 0x20c   : > { %3929 = vmatprep.subr.bf16.mxu0 %v6816_v31  ;;  %5718 = vmatprep.subr.bf16.mxu1 %v6816_v31 }
 0x20d   : > { %2632 = vmatmul.mubr.bf16.gmra.mrb[20].mxu0 %v6753_v32  ;;  %3211 = vmatmul.mubr.bf16.gmra.mrb[20].mxu1 %v6753_v32 }
 0x20e   : > { %2641 = vmatprep.mubr.bf16.mxu0 %v6754_v33  ;;  %3220 = vmatprep.mubr.bf16.mxu1 %v6754_v33 }
 0x20f   : > { %3930 = vmatpush1.bf16.msra.mxu0 %v6814_v34  ;;  %5734 = vmatpush1.bf16.msra.mxu1 %v6814_v34 }
 0x210   : > { %3931 = vmatprep.subr.bf16.mxu0 %v6819_v35  ;;  %5719 = vmatprep.subr.bf16.mxu1 %v6819_v35 }
 0x213   : > { %3932 = vmatpush1.bf16.msra.mxu0 %v6817_v36  ;;  %5735 = vmatpush1.bf16.msra.mxu1 %v6817_v36 }
 0x214   : > { %3933 = vmatprep.subr.bf16.mxu0 %v6822_v37  ;;  %5720 = vmatprep.subr.bf16.mxu1 %v6822_v37 }
 0x215   : > { %2642 = vmatmul.mubr.bf16.gmra.mrb[24].mxu0 %v6756_v38  ;;  %3221 = vmatmul.mubr.bf16.gmra.mrb[24].mxu1 %v6756_v38 }
 0x216   : > { %2651 = vmatprep.mubr.bf16.mxu0 %v6757_v39  ;;  %3230 = vmatprep.mubr.bf16.mxu1 %v6757_v39 }
 0x217   : > { %3934 = vmatpush1.bf16.msra.mxu0 %v6820_v40  ;;  %5736 = vmatpush1.bf16.msra.mxu1 %v6820_v40 }
 0x218   : > { %3935 = vmatprep.subr.bf16.mxu0 %v6825_v41  ;;  %5721 = vmatprep.subr.bf16.mxu1 %v6825_v41 }
 0x21b   : > { %3936 = vmatpush1.bf16.msra.mxu0 %v6823_v42  ;;  %5737 = vmatpush1.bf16.msra.mxu1 %v6823_v42  ;;  %v6832_v42 = vld [vmem:[#allocation7 + $0x100] ss:$8 sps:$4 sm:$0xff]  }
 0x21c   : > { %3937 = vmatprep.subr.bf16.mxu0 %v6828_v43  ;;  %5722 = vmatprep.subr.bf16.mxu1 %v6828_v43 }
 0x21d   : > { %2652 = vmatmul.mubr.bf16.gmra.mrb[28].mxu0 %v6759_v44  ;;  %3231 = vmatmul.mubr.bf16.gmra.mrb[28].mxu1 %v6759_v44 }
 0x21e   : > { %2661 = vmatprep.mubr.bf16.mxu0 %v6760_v45  ;;  %3240 = vmatprep.mubr.bf16.mxu1 %v6760_v45 }
 0x21f   : > { %3938 = vmatpush1.bf16.msra.mxu0 %v6826_v46  ;;  %5738 = vmatpush1.bf16.msra.mxu1 %v6826_v46 }
 0x220   : > { %3939 = vmatprep.subr.bf16.mxu0 %v6831_v55  ;;  %5723 = vmatprep.subr.bf16.mxu1 %v6831_v55 }
 0x223   : > { %3940 = vmatpush1.bf16.msra.mxu0 %v6829_v56  ;;  %5739 = vmatpush1.bf16.msra.mxu1 %v6829_v56 }
 0x224   : > { %4102 = vmatprep.subr.bf16.mxu0 %v6834_v59 }
 0x225   : > { %2662 = vmatmul.mubr.bf16.gmra.mrb[32].mxu0 %v6762_v47  ;;  %3241 = vmatmul.mubr.bf16.gmra.mrb[32].mxu1 %v6762_v47  ;;  %v6837_v47 = vld [vmem:[#allocation7 + $0x114] ss:$8 sps:$4 sm:$0xff]  }
 0x226   : > { %2671 = vmatprep.mubr.bf16.mxu0 %v6763_v48  ;;  %3250 = vmatprep.mubr.bf16.mxu1 %v6763_v48 }
 0x22d   : > { %2672 = vmatmul.mubr.bf16.gmra.mrb[36].mxu0 %v6765_v49  ;;  %3251 = vmatmul.mubr.bf16.gmra.mrb[36].mxu1 %v6765_v49 }
 0x22e   : > { %2681 = vmatprep.mubr.bf16.mxu0 %v6766_v50  ;;  %3260 = vmatprep.mubr.bf16.mxu1 %v6766_v50 }
 0x235   : > { %2682 = vmatmul.mubr.bf16.gmra.mrb[40].mxu0 %v6768_v51  ;;  %3261 = vmatmul.mubr.bf16.gmra.mrb[40].mxu1 %v6768_v51 }
 0x236   : > { %2691 = vmatprep.mubr.bf16.mxu0 %v6769_v52  ;;  %3270 = vmatprep.mubr.bf16.mxu1 %v6769_v52 }
 0x23d   : > { %2692 = vmatmul.mubr.bf16.gmra.mrb[44].mxu0 %v6771_v53  ;;  %3271 = vmatmul.mubr.bf16.gmra.mrb[44].mxu1 %v6771_v53 }
 0x23e   : > { %2701 = vmatprep.mubr.bf16.mxu0 %v6775_v54  ;;  %3280 = vmatprep.mubr.bf16.mxu1 %v6775_v54 }
 0x245   : > { %2702 = vmatmul.mubr.bf16.gmra.mrb[48].mxu0 %v6777_v57  ;;  %3281 = vmatmul.mubr.bf16.gmra.mrb[48].mxu1 %v6777_v57 }
 0x246   : > { %2711 = vmatprep.mubr.bf16.mxu0 %v6781_v58  ;;  %3290 = vmatprep.mubr.bf16.mxu1 %v6781_v58  ;;  %v6835_v58 = vld [vmem:[#allocation7 + $0x110] ss:$8 sps:$4 sm:$0xff]  }
 0x24d   : > { %2712 = vmatmul.mubr.bf16.gmra.mrb[52].mxu0 %v6783_v60  ;;  %3291 = vmatmul.mubr.bf16.gmra.mrb[52].mxu1 %v6783_v60 }
 0x24e   : > { %2721 = vmatprep.mubr.bf16.mxu0 %v6787_v61  ;;  %3300 = vmatprep.mubr.bf16.mxu1 %v6787_v61 }
 0x255   : > { %2722 = vmatmul.mubr.bf16.gmra.mrb[56].mxu0 %v6789_v62  ;;  %3301 = vmatmul.mubr.bf16.gmra.mrb[56].mxu1 %v6789_v62 }
 0x256   : > { %2731 = vmatprep.mubr.bf16.mxu0 %v6793_v63  ;;  %3310 = vmatprep.mubr.bf16.mxu1 %v6793_v63  ;;  %v6840_v63 = vld [vmem:[#allocation7 + $0x124] ss:$8 sps:$4 sm:$0xff]  }
 0x25d   : > { %2732 = vmatmul.mubr.bf16.gmra.mrb[60].mxu0 %v6795_v0  ;;  %3311 = vmatmul.mubr.bf16.gmra.mrb[60].mxu1 %v6795_v0 }
 0x2b8   : > { %v2583_v12 = vpop.f32.mrb[0].mxu0  ;;  %v3162_v13 = vpop.f32.mrb[0].mxu1 }
 0x2b9   : > { %v5740_v14 = vadd.f32 %v2583_v12, %v7527_v8  ;;  %v5804_v15 = vadd.f32 %v3162_v13, %v7529_v9  ;;  %v2585_v16 = vpop.f32.mrb[1].mxu0  ;;  %v3164_v17 = vpop.f32.mrb[1].mxu1 }
 0x2ba   : > { %v5741_v18 = vadd.f32 %v2585_v16, %v7533_v10  ;;  %v5805_v19 = vadd.f32 %v3164_v17, %v7535_v11  ;;  %v2587_v20 = vpop.f32.mrb[2].mxu0  ;;  %v3166_v21 = vpop.f32.mrb[2].mxu1  ;;  %v6838_v17 = vld [vmem:[#allocation7 + $0x120] ss:$8 sps:$4 sm:$0xff]  }
 0x2bb   : > { %v5742_v22 = vadd.f32 %v2587_v20, %v7527_v8  ;;  %v5806_v23 = vadd.f32 %v3166_v21, %v7529_v9  ;;  %v2589_v24 = vpop.f32.mrb[3].mxu0  ;;  %v3168_v25 = vpop.f32.mrb[3].mxu1  ;;  %v3321_v28 = vmax.f32 %v5740_v14, 0.0  ;;  %v3323_v29 = vmax.f32 %v5804_v15, 0.0 }
 0x2bc   : > { %v5743_v26 = vadd.f32 %v2589_v24, %v7533_v10  ;;  %v5807_v27 = vadd.f32 %v3168_v25, %v7535_v11  ;;  %v3322_v32 = vmax.f32 %v5741_v18, 0.0  ;;  %v3324_v33 = vmax.f32 %v5805_v19, 0.0 }
 0x2bd   : > { %v3325_v30 = vmax.f32 %v5742_v22, 0.0  ;;  %v3327_v31 = vmax.f32 %v5806_v23, 0.0  ;;  %v6843_v22 = vld [vmem:[#allocation7 + $0x134] ss:$8 sps:$4 sm:$0xff]  }
 0x2be   : > { %v3326_v34 = vmax.f32 %v5743_v26, 0.0  ;;  %v3328_v35 = vmax.f32 %v5807_v27, 0.0 }
 0x2bf   : > { %v3449_v36 = vpack.c.bf16 %v3325_v30, %v3321_v28  ;;  %v7545_v37 = vpack.c.bf16 %v3327_v31, %v3323_v29 }
 0x2c0   : > { %v3450_v38 = vpack.c.bf16 %v3326_v34, %v3322_v32  ;;  %v7547_v39 = vpack.c.bf16 %v3328_v35, %v3324_v33  ;;  %v2593_v40 = vpop.f32.mrb[4].mxu0  ;;  %v3172_v41 = vpop.f32.mrb[4].mxu1  ;;  %v6841_v33 = vld [vmem:[#allocation7 + $0x130] ss:$8 sps:$4 sm:$0xff]  }
 0x2c1   : > { %v5744_v43 = vadd.f32 %v2593_v40, %v7527_v8  ;;  %v5808_v44 = vadd.f32 %v3172_v41, %v7529_v9  ;;  %v2595_v45 = vpop.f32.mrb[5].mxu0  ;;  %v3174_v46 = vpop.f32.mrb[5].mxu1  ;;  %v6846_v40 = vld [vmem:[#allocation7 + $0x144] ss:$8 sps:$4 sm:$0xff]  }
 0x2c2   : > { %v5745_v48 = vadd.f32 %v2595_v45, %v7533_v10  ;;  %v5809_v49 = vadd.f32 %v3174_v46, %v7535_v11  ;;  %v2597_v50 = vpop.f32.mrb[6].mxu0  ;;  %v3176_v51 = vpop.f32.mrb[6].mxu1  ;;  %3941 = vmatprep.mubr.bf16.mxu0 %v3450_v38 }
 0x2c3   : > { %v5746_v52 = vadd.f32 %v2597_v50, %v7527_v8  ;;  %v5810_v53 = vadd.f32 %v3176_v51, %v7529_v9  ;;  %v2599_v54 = vpop.f32.mrb[7].mxu0  ;;  %v3178_v55 = vpop.f32.mrb[7].mxu1  ;;  %3942 = vmatmul.mubr.bf16.vlgmr.msra.gmra.mrb[64].mxu0 %v3449_v36  ;;  %v3329_v59 = vmax.f32 %v5744_v43, 0.0  ;;  %v3331_v60 = vmax.f32 %v5808_v44, 0.0  ;;  %v6844_v51 = vld [vmem:[#allocation7 + $0x140] ss:$8 sps:$4 sm:$0xff]  }
 0x2c4   : > { %v5747_v56 = vadd.f32 %v2599_v54, %v7533_v10  ;;  %v5811_v57 = vadd.f32 %v3178_v55, %v7535_v11  ;;  %4103 = vmatpush1.bf16.msra.mxu0 %v6832_v42  ;;  %v3330_v0 = vmax.f32 %v5745_v48, 0.0  ;;  %v3332_v1 = vmax.f32 %v5809_v49, 0.0 }
 0x2c5   : > { %v3333_v61 = vmax.f32 %v5746_v52, 0.0  ;;  %v3335_v62 = vmax.f32 %v5810_v53, 0.0  ;;  %4104 = vmatprep.subr.bf16.mxu0 %v6837_v47 }
 0x2c6   : > { %v3334_v4 = vmax.f32 %v5747_v56, 0.0  ;;  %v3336_v5 = vmax.f32 %v5811_v57, 0.0  ;;  %v6849_v56 = vld [vmem:[#allocation7 + $0x154] ss:$8 sps:$4 sm:$0xff]  }
 0x2c7   : > { %v3453_v7 = vpack.c.bf16 %v3333_v61, %v3329_v59  ;;  %v7557_v12 = vpack.c.bf16 %v3335_v62, %v3331_v60 }
 0x2c8   : > { %v3454_v13 = vpack.c.bf16 %v3334_v4, %v3330_v0  ;;  %v7559_v14 = vpack.c.bf16 %v3336_v5, %v3332_v1  ;;  %v2603_v15 = vpop.f32.mrb[8].mxu0  ;;  %v3182_v16 = vpop.f32.mrb[8].mxu1  ;;  %4105 = vmatpush1.bf16.msra.mxu0 %v6835_v58  ;;  %v6847_v5 = vld [vmem:[#allocation7 + $0x150] ss:$8 sps:$4 sm:$0xff]  }
 0x2c9   : > { %v5748_v18 = vadd.f32 %v2603_v15, %v7527_v8  ;;  %v5812_v19 = vadd.f32 %v3182_v16, %v7529_v9  ;;  %v2605_v20 = vpop.f32.mrb[9].mxu0  ;;  %v3184_v21 = vpop.f32.mrb[9].mxu1  ;;  %4106 = vmatprep.subr.bf16.mxu0 %v6840_v63 }
 0x2ca   : > { %v5749_v23 = vadd.f32 %v2605_v20, %v7533_v10  ;;  %v5813_v24 = vadd.f32 %v3184_v21, %v7535_v11  ;;  %v2607_v25 = vpop.f32.mrb[10].mxu0  ;;  %v3186_v26 = vpop.f32.mrb[10].mxu1  ;;  %3951 = vmatprep.mubr.bf16.mxu0 %v3454_v13 }
 0x2cb   : > { %v5750_v27 = vadd.f32 %v2607_v25, %v7527_v8  ;;  %v5814_v28 = vadd.f32 %v3186_v26, %v7529_v9  ;;  %v2609_v29 = vpop.f32.mrb[11].mxu0  ;;  %v3188_v30 = vpop.f32.mrb[11].mxu1  ;;  %3952 = vmatmul.mubr.bf16.gmra.mrb[68].mxu0 %v3453_v7  ;;  %v3337_v34 = vmax.f32 %v5748_v18, 0.0  ;;  %v3339_v35 = vmax.f32 %v5812_v19, 0.0 }
 0x2cc   : > { %v5751_v31 = vadd.f32 %v2609_v29, %v7533_v10  ;;  %v5815_v32 = vadd.f32 %v3188_v30, %v7535_v11  ;;  %4107 = vmatpush1.bf16.msra.mxu0 %v6838_v17  ;;  %v3338_v41 = vmax.f32 %v5749_v23, 0.0  ;;  %v3340_v42 = vmax.f32 %v5813_v24, 0.0  ;;  %v6852_v17 = vld [vmem:[#allocation7 + $0x164] ss:$8 sps:$4 sm:$0xff]  }
 0x2cd   : > { %v3341_v36 = vmax.f32 %v5750_v27, 0.0  ;;  %v3343_v38 = vmax.f32 %v5814_v28, 0.0  ;;  %4108 = vmatprep.subr.bf16.mxu0 %v6843_v22  ;;  %v6850_v28 = vld [vmem:[#allocation7 + $0x160] ss:$8 sps:$4 sm:$0xff]  }
 0x2ce   : > { %v3342_v43 = vmax.f32 %v5751_v31, 0.0  ;;  %v3344_v44 = vmax.f32 %v5815_v32, 0.0 }
 0x2cf   : > { %v3457_v45 = vpack.c.bf16 %v3341_v36, %v3337_v34  ;;  %v7569_v46 = vpack.c.bf16 %v3343_v38, %v3339_v35 }
 0x2d0   : > { %v3458_v47 = vpack.c.bf16 %v3342_v43, %v3338_v41  ;;  %v7571_v48 = vpack.c.bf16 %v3344_v44, %v3340_v42  ;;  %v2613_v49 = vpop.f32.mrb[12].mxu0  ;;  %v3192_v50 = vpop.f32.mrb[12].mxu1  ;;  %4109 = vmatpush1.bf16.msra.mxu0 %v6841_v33  ;;  %v6855_v33 = vld [vmem:[#allocation7 + $0x174] ss:$8 sps:$4 sm:$0xff]  }
 0x2d1   : > { %v5752_v52 = vadd.f32 %v2613_v49, %v7527_v8  ;;  %v5816_v53 = vadd.f32 %v3192_v50, %v7529_v9  ;;  %v2615_v54 = vpop.f32.mrb[13].mxu0  ;;  %v3194_v55 = vpop.f32.mrb[13].mxu1  ;;  %4110 = vmatprep.subr.bf16.mxu0 %v6846_v40 }
 0x2d2   : > { %v5753_v57 = vadd.f32 %v2615_v54, %v7533_v10  ;;  %v5817_v58 = vadd.f32 %v3194_v55, %v7535_v11  ;;  %v2617_v59 = vpop.f32.mrb[14].mxu0  ;;  %v3196_v60 = vpop.f32.mrb[14].mxu1  ;;  %3961 = vmatprep.mubr.bf16.mxu0 %v3458_v47  ;;  %v6853_v47 = vld [vmem:[#allocation7 + $0x170] ss:$8 sps:$4 sm:$0xff]  }
 0x2d3   : > { %v5754_v61 = vadd.f32 %v2617_v59, %v7527_v8  ;;  %v5818_v62 = vadd.f32 %v3196_v60, %v7529_v9  ;;  %v2619_v63 = vpop.f32.mrb[15].mxu0  ;;  %v3198_v0 = vpop.f32.mrb[15].mxu1  ;;  %3962 = vmatmul.mubr.bf16.gmra.mrb[72].mxu0 %v3457_v45  ;;  %v3345_v7 = vmax.f32 %v5752_v52, 0.0  ;;  %v3347_v13 = vmax.f32 %v5816_v53, 0.0  ;;  %v6858_v53 = vld [vmem:[#allocation7 + $0x184] ss:$8 sps:$4 sm:$0xff]  }
 0x2d4   : > { %v5755_v1 = vadd.f32 %v2619_v63, %v7533_v10  ;;  %v5819_v4 = vadd.f32 %v3198_v0, %v7535_v11  ;;  %4111 = vmatpush1.bf16.msra.mxu0 %v6844_v51  ;;  %v3346_v18 = vmax.f32 %v5753_v57, 0.0  ;;  %v3348_v19 = vmax.f32 %v5817_v58, 0.0  ;;  %v6856_v0 = vld [vmem:[#allocation7 + $0x180] ss:$8 sps:$4 sm:$0xff]  }
 0x2d5   : > { %v3349_v15 = vmax.f32 %v5754_v61, 0.0  ;;  %v3351_v16 = vmax.f32 %v5818_v62, 0.0  ;;  %4112 = vmatprep.subr.bf16.mxu0 %v6849_v56 }
 0x2d6   : > { %v3350_v20 = vmax.f32 %v5755_v1, 0.0  ;;  %v3352_v21 = vmax.f32 %v5819_v4, 0.0 }
 0x2d7   : > { %v3461_v22 = vpack.c.bf16 %v3349_v15, %v3345_v7  ;;  %v7581_v23 = vpack.c.bf16 %v3351_v16, %v3347_v13  ;;  %v6861_v13 = vld [vmem:[#allocation7 + $0x194] ss:$8 sps:$4 sm:$0xff]  }
 0x2d8   : > { %v3462_v24 = vpack.c.bf16 %v3350_v20, %v3346_v18  ;;  %v7583_v25 = vpack.c.bf16 %v3352_v21, %v3348_v19  ;;  %v2623_v26 = vpop.f32.mrb[16].mxu0  ;;  %v3202_v27 = vpop.f32.mrb[16].mxu1  ;;  %4113 = vmatpush1.bf16.msra.mxu0 %v6847_v5 }
 0x2d9   : > { %v5756_v29 = vadd.f32 %v2623_v26, %v7527_v8  ;;  %v5820_v30 = vadd.f32 %v3202_v27, %v7529_v9  ;;  %v2625_v31 = vpop.f32.mrb[17].mxu0  ;;  %v3204_v32 = vpop.f32.mrb[17].mxu1  ;;  %4114 = vmatprep.subr.bf16.mxu0 %v6852_v17  ;;  %v6859_v27 = vld [vmem:[#allocation7 + $0x190] ss:$8 sps:$4 sm:$0xff]  }
 0x2da   : > { %v5757_v34 = vadd.f32 %v2625_v31, %v7533_v10  ;;  %v5821_v35 = vadd.f32 %v3204_v32, %v7535_v11  ;;  %v2627_v36 = vpop.f32.mrb[18].mxu0  ;;  %v3206_v38 = vpop.f32.mrb[18].mxu1  ;;  %3971 = vmatprep.mubr.bf16.mxu0 %v3462_v24  ;;  %v6864_v32 = vld [vmem:[#allocation7 + $0x1a4] ss:$8 sps:$4 sm:$0xff]  }
 0x2db   : > { %v5758_v40 = vadd.f32 %v2627_v36, %v7527_v8  ;;  %v5822_v41 = vadd.f32 %v3206_v38, %v7529_v9  ;;  %v2629_v42 = vpop.f32.mrb[19].mxu0  ;;  %v3208_v43 = vpop.f32.mrb[19].mxu1  ;;  %3972 = vmatmul.mubr.bf16.gmra.mrb[76].mxu0 %v3461_v22  ;;  %v3353_v49 = vmax.f32 %v5756_v29, 0.0  ;;  %v3355_v50 = vmax.f32 %v5820_v30, 0.0 }
 0x2dc   : > { %v5759_v44 = vadd.f32 %v2629_v42, %v7533_v10  ;;  %v5823_v45 = vadd.f32 %v3208_v43, %v7535_v11  ;;  %4115 = vmatpush1.bf16.msra.mxu0 %v6850_v28  ;;  %v3354_v54 = vmax.f32 %v5757_v34, 0.0  ;;  %v3356_v55 = vmax.f32 %v5821_v35, 0.0 }
 0x2dd   : > { %v3357_v51 = vmax.f32 %v5758_v40, 0.0  ;;  %v3359_v52 = vmax.f32 %v5822_v41, 0.0  ;;  %4116 = vmatprep.subr.bf16.mxu0 %v6855_v33 }
 0x2de   : > { %v3358_v56 = vmax.f32 %v5759_v44, 0.0  ;;  %v3360_v57 = vmax.f32 %v5823_v45, 0.0  ;;  %v6862_v45 = vld [vmem:[#allocation7 + $0x1a0] ss:$8 sps:$4 sm:$0xff]  }
 0x2df   : > { %v3465_v58 = vpack.c.bf16 %v3357_v51, %v3353_v49  ;;  %v7593_v59 = vpack.c.bf16 %v3359_v52, %v3355_v50  ;;  %v6867_v52 = vld [vmem:[#allocation7 + $0x1b4] ss:$8 sps:$4 sm:$0xff]  }
 0x2e0   : > { %v3466_v60 = vpack.c.bf16 %v3358_v56, %v3354_v54  ;;  %v7595_v61 = vpack.c.bf16 %v3360_v57, %v3356_v55  ;;  %v2633_v62 = vpop.f32.mrb[20].mxu0  ;;  %v3212_v63 = vpop.f32.mrb[20].mxu1  ;;  %4117 = vmatpush1.bf16.msra.mxu0 %v6853_v47 }
 0x2e1   : > { %v5760_v1 = vadd.f32 %v2633_v62, %v7527_v8  ;;  %v5824_v4 = vadd.f32 %v3212_v63, %v7529_v9  ;;  %v2635_v5 = vpop.f32.mrb[21].mxu0  ;;  %v3214_v7 = vpop.f32.mrb[21].mxu1  ;;  %4118 = vmatprep.subr.bf16.mxu0 %v6858_v53 }
 0x2e2   : > { %v5761_v15 = vadd.f32 %v2635_v5, %v7533_v10  ;;  %v5825_v16 = vadd.f32 %v3214_v7, %v7535_v11  ;;  %v2637_v17 = vpop.f32.mrb[22].mxu0  ;;  %v3216_v18 = vpop.f32.mrb[22].mxu1  ;;  %3981 = vmatprep.mubr.bf16.mxu0 %v3466_v60 }
 0x2e3   : > { %v5762_v19 = vadd.f32 %v2637_v17, %v7527_v8  ;;  %v5826_v20 = vadd.f32 %v3216_v18, %v7529_v9  ;;  %v2639_v21 = vpop.f32.mrb[23].mxu0  ;;  %v3218_v22 = vpop.f32.mrb[23].mxu1  ;;  %3982 = vmatmul.mubr.bf16.gmra.mrb[80].mxu0 %v3465_v58  ;;  %v3361_v28 = vmax.f32 %v5760_v1, 0.0  ;;  %v3363_v29 = vmax.f32 %v5824_v4, 0.0  ;;  %v6865_v1 = vld [vmem:[#allocation7 + $0x1b0] ss:$8 sps:$4 sm:$0xff]  }
 0x2e4   : > { %v5763_v24 = vadd.f32 %v2639_v21, %v7533_v10  ;;  %v5827_v26 = vadd.f32 %v3218_v22, %v7535_v11  ;;  %4119 = vmatpush1.bf16.msra.mxu0 %v6856_v0  ;;  %v3362_v33 = vmax.f32 %v5761_v15, 0.0  ;;  %v3364_v34 = vmax.f32 %v5825_v16, 0.0  ;;  %v6870_v15 = vld [vmem:[#allocation7 + $0x1c4] ss:$8 sps:$4 sm:$0xff]  }
 0x2e5   : > { %v3365_v30 = vmax.f32 %v5762_v19, 0.0  ;;  %v3367_v31 = vmax.f32 %v5826_v20, 0.0  ;;  %4120 = vmatprep.subr.bf16.mxu0 %v6861_v13 }
 0x2e6   : > { %v3366_v35 = vmax.f32 %v5763_v24, 0.0  ;;  %v3368_v36 = vmax.f32 %v5827_v26, 0.0 }
 0x2e7   : > { %v3469_v38 = vpack.c.bf16 %v3365_v30, %v3361_v28  ;;  %v7605_v40 = vpack.c.bf16 %v3367_v31, %v3363_v29  ;;  %v6868_v28 = vld [vmem:[#allocation7 + $0x1c0] ss:$8 sps:$4 sm:$0xff]  }
 0x2e8   : > { %v3470_v41 = vpack.c.bf16 %v3366_v35, %v3362_v33  ;;  %v7607_v42 = vpack.c.bf16 %v3368_v36, %v3364_v34  ;;  %v2643_v43 = vpop.f32.mrb[24].mxu0  ;;  %v3222_v44 = vpop.f32.mrb[24].mxu1  ;;  %4121 = vmatpush1.bf16.msra.mxu0 %v6859_v27  ;;  %v6873_v33 = vld [vmem:[#allocation7 + $0x1d4] ss:$8 sps:$4 sm:$0xff]  }
 0x2e9   : > { %v5764_v47 = vadd.f32 %v2643_v43, %v7527_v8  ;;  %v5828_v49 = vadd.f32 %v3222_v44, %v7529_v9  ;;  %v2645_v50 = vpop.f32.mrb[25].mxu0  ;;  %v3224_v51 = vpop.f32.mrb[25].mxu1  ;;  %4122 = vmatprep.subr.bf16.mxu0 %v6864_v32 }
 0x2ea   : > { %v5765_v53 = vadd.f32 %v2645_v50, %v7533_v10  ;;  %v5829_v54 = vadd.f32 %v3224_v51, %v7535_v11  ;;  %v2647_v55 = vpop.f32.mrb[26].mxu0  ;;  %v3226_v56 = vpop.f32.mrb[26].mxu1  ;;  %3991 = vmatprep.mubr.bf16.mxu0 %v3470_v41  ;;  %v6871_v50 = vld [vmem:[#allocation7 + $0x1d0] ss:$8 sps:$4 sm:$0xff]  }
 0x2eb   : > { %v5766_v57 = vadd.f32 %v2647_v55, %v7527_v8  ;;  %v5830_v58 = vadd.f32 %v3226_v56, %v7529_v9  ;;  %v2649_v60 = vpop.f32.mrb[27].mxu0  ;;  %v3228_v62 = vpop.f32.mrb[27].mxu1  ;;  %3992 = vmatmul.mubr.bf16.gmra.mrb[84].mxu0 %v3469_v38  ;;  %v3369_v4 = vmax.f32 %v5764_v47, 0.0  ;;  %v3371_v5 = vmax.f32 %v5828_v49, 0.0  ;;  %v6876_v55 = vld [vmem:[#allocation7 + $0x1e4] ss:$8 sps:$4 sm:$0xff]  }
 0x2ec   : > { %v5767_v63 = vadd.f32 %v2649_v60, %v7533_v10  ;;  %v5831_v0 = vadd.f32 %v3228_v62, %v7535_v11  ;;  %4123 = vmatpush1.bf16.msra.mxu0 %v6862_v45  ;;  %v3370_v16 = vmax.f32 %v5765_v53, 0.0  ;;  %v3372_v17 = vmax.f32 %v5829_v54, 0.0 }
 0x2ed   : > { %v3373_v7 = vmax.f32 %v5766_v57, 0.0  ;;  %v3375_v13 = vmax.f32 %v5830_v58, 0.0  ;;  %4124 = vmatprep.subr.bf16.mxu0 %v6867_v52 }
 0x2ee   : > { %v3374_v18 = vmax.f32 %v5767_v63, 0.0  ;;  %v3376_v19 = vmax.f32 %v5831_v0, 0.0 }
 0x2ef   : > { %v3473_v20 = vpack.c.bf16 %v3373_v7, %v3369_v4  ;;  %v7617_v21 = vpack.c.bf16 %v3375_v13, %v3371_v5  ;;  %v6874_v7 = vld [vmem:[#allocation7 + $0x1e0] ss:$8 sps:$4 sm:$0xff]  }
 0x2f0   : > { %v3474_v22 = vpack.c.bf16 %v3374_v18, %v3370_v16  ;;  %v7619_v24 = vpack.c.bf16 %v3376_v19, %v3372_v17  ;;  %v2653_v26 = vpop.f32.mrb[28].mxu0  ;;  %v3232_v27 = vpop.f32.mrb[28].mxu1  ;;  %4125 = vmatpush1.bf16.msra.mxu0 %v6865_v1  ;;  %v6879_v18 = vld [vmem:[#allocation7 + $0x1f4] ss:$8 sps:$4 sm:$0xff]  }
 0x2f1   : > { %v5768_v29 = vadd.f32 %v2653_v26, %v7527_v8  ;;  %v5832_v30 = vadd.f32 %v3232_v27, %v7529_v9  ;;  %v2655_v31 = vpop.f32.mrb[29].mxu0  ;;  %v3234_v32 = vpop.f32.mrb[29].mxu1  ;;  %4126 = vmatprep.subr.bf16.mxu0 %v6870_v15 }
 0x2f2   : > { %v5769_v34 = vadd.f32 %v2655_v31, %v7533_v10  ;;  %v5833_v35 = vadd.f32 %v3234_v32, %v7535_v11  ;;  %v2657_v36 = vpop.f32.mrb[30].mxu0  ;;  %v3236_v38 = vpop.f32.mrb[30].mxu1  ;;  %4001 = vmatprep.mubr.bf16.mxu0 %v3474_v22 }
 0x2f3   : > { %v5770_v41 = vadd.f32 %v2657_v36, %v7527_v8  ;;  %v5834_v43 = vadd.f32 %v3236_v38, %v7529_v9  ;;  %v2659_v44 = vpop.f32.mrb[31].mxu0  ;;  %v3238_v45 = vpop.f32.mrb[31].mxu1  ;;  %4002 = vmatmul.mubr.bf16.gmra.mrb[88].mxu0 %v3473_v20  ;;  %v3377_v51 = vmax.f32 %v5768_v29, 0.0  ;;  %v3379_v52 = vmax.f32 %v5832_v30, 0.0 }
 0x2f4   : > { %v5771_v47 = vadd.f32 %v2659_v44, %v7533_v10  ;;  %v5835_v49 = vadd.f32 %v3238_v45, %v7535_v11  ;;  %4127 = vmatpush1.bf16.msra.mxu0 %v6868_v28  ;;  %v3378_v56 = vmax.f32 %v5769_v34, 0.0  ;;  %v3380_v57 = vmax.f32 %v5833_v35, 0.0 }
 0x2f5   : > { %v3381_v53 = vmax.f32 %v5770_v41, 0.0  ;;  %v3383_v54 = vmax.f32 %v5834_v43, 0.0  ;;  %4128 = vmatprep.subr.bf16.mxu0 %v6873_v33  ;;  %v6877_v33 = vld [vmem:[#allocation7 + $0x1f0] ss:$8 sps:$4 sm:$0xff]  }
 0x2f6   : > { %v3382_v58 = vmax.f32 %v5771_v47, 0.0  ;;  %v3384_v60 = vmax.f32 %v5835_v49, 0.0 }
 0x2f7   : > { %v3477_v62 = vpack.c.bf16 %v3381_v53, %v3377_v51  ;;  %v7629_v63 = vpack.c.bf16 %v3383_v54, %v3379_v52 }
 0x2f8   : > { %v3478_v0 = vpack.c.bf16 %v3382_v58, %v3378_v56  ;;  %v7631_v1 = vpack.c.bf16 %v3384_v60, %v3380_v57  ;;  %v2663_v4 = vpop.f32.mrb[32].mxu0  ;;  %v3242_v5 = vpop.f32.mrb[32].mxu1  ;;  %4129 = vmatpush1.bf16.msra.mxu0 %v6871_v50 }
 0x2f9   : > { %v5772_v13 = vadd.f32 %v2663_v4, %v7527_v8  ;;  %v5836_v15 = vadd.f32 %v3242_v5, %v7529_v9  ;;  %v2665_v16 = vpop.f32.mrb[33].mxu0  ;;  %v3244_v17 = vpop.f32.mrb[33].mxu1  ;;  %4130 = vmatprep.subr.bf16.mxu0 %v6876_v55 }
 0x2fa   : > { %v5773_v19 = vadd.f32 %v2665_v16, %v7533_v10  ;;  %v5837_v20 = vadd.f32 %v3244_v17, %v7535_v11  ;;  %v2667_v22 = vpop.f32.mrb[34].mxu0  ;;  %v3246_v26 = vpop.f32.mrb[34].mxu1  ;;  %4011 = vmatprep.mubr.bf16.mxu0 %v3478_v0 }
 0x2fb   : > { %v5774_v27 = vadd.f32 %v2667_v22, %v7527_v8  ;;  %v5838_v28 = vadd.f32 %v3246_v26, %v7529_v9  ;;  %v2669_v29 = vpop.f32.mrb[35].mxu0  ;;  %v3248_v30 = vpop.f32.mrb[35].mxu1  ;;  %4012 = vmatmul.mubr.bf16.gmra.mrb[92].mxu0 %v3477_v62  ;;  %v3385_v34 = vmax.f32 %v5772_v13, 0.0  ;;  %v3387_v35 = vmax.f32 %v5836_v15, 0.0 }
 0x2fc   : > { %v5775_v31 = vadd.f32 %v2669_v29, %v7533_v10  ;;  %v5839_v32 = vadd.f32 %v3248_v30, %v7535_v11  ;;  %4131 = vmatpush1.bf16.msra.mxu0 %v6874_v7  ;;  %v3386_v41 = vmax.f32 %v5773_v19, 0.0  ;;  %v3388_v43 = vmax.f32 %v5837_v20, 0.0 }
 0x2fd   : > { %v3389_v36 = vmax.f32 %v5774_v27, 0.0  ;;  %v3391_v38 = vmax.f32 %v5838_v28, 0.0  ;;  %4132 = vmatprep.subr.bf16.mxu0 %v6879_v18 }
 0x2fe   : > { %v3390_v44 = vmax.f32 %v5775_v31, 0.0  ;;  %v3392_v45 = vmax.f32 %v5839_v32, 0.0 }
 0x2ff   : > { %v3481_v47 = vpack.c.bf16 %v3389_v36, %v3385_v34  ;;  %v7641_v49 = vpack.c.bf16 %v3391_v38, %v3387_v35 }
 0x300   : > { %v3482_v50 = vpack.c.bf16 %v3390_v44, %v3386_v41  ;;  %v7643_v51 = vpack.c.bf16 %v3392_v45, %v3388_v43  ;;  %v2673_v52 = vpop.f32.mrb[36].mxu0  ;;  %v3252_v53 = vpop.f32.mrb[36].mxu1  ;;  %4133 = vmatpush1.bf16.msra.mxu0 %v6877_v33 }
 0x301   : > { %v5776_v54 = vadd.f32 %v2673_v52, %v7527_v8  ;;  %v5840_v55 = vadd.f32 %v3252_v53, %v7529_v9  ;;  %v2675_v56 = vpop.f32.mrb[37].mxu0  ;;  %v3254_v57 = vpop.f32.mrb[37].mxu1 }
 0x302   : > { %v5777_v58 = vadd.f32 %v2675_v56, %v7533_v10  ;;  %v5841_v60 = vadd.f32 %v3254_v57, %v7535_v11  ;;  %v2677_v62 = vpop.f32.mrb[38].mxu0  ;;  %v3256_v0 = vpop.f32.mrb[38].mxu1  ;;  %4021 = vmatprep.mubr.bf16.mxu0 %v3482_v50 }
 0x303   : > { %v5778_v4 = vadd.f32 %v2677_v62, %v7527_v8  ;;  %v5842_v5 = vadd.f32 %v3256_v0, %v7529_v9  ;;  %v2679_v7 = vpop.f32.mrb[39].mxu0  ;;  %v3258_v13 = vpop.f32.mrb[39].mxu1  ;;  %4022 = vmatmul.mubr.bf16.gmra.mrb[96].mxu0 %v3481_v47  ;;  %v3393_v17 = vmax.f32 %v5776_v54, 0.0  ;;  %v3395_v18 = vmax.f32 %v5840_v55, 0.0 }
 0x304   : > { %v5779_v15 = vadd.f32 %v2679_v7, %v7533_v10  ;;  %v5843_v16 = vadd.f32 %v3258_v13, %v7535_v11  ;;  %v3394_v22 = vmax.f32 %v5777_v58, 0.0  ;;  %v3396_v26 = vmax.f32 %v5841_v60, 0.0 }
 0x305   : > { %v3397_v19 = vmax.f32 %v5778_v4, 0.0  ;;  %v3399_v20 = vmax.f32 %v5842_v5, 0.0 }
 0x306   : > { %v3398_v27 = vmax.f32 %v5779_v15, 0.0  ;;  %v3400_v28 = vmax.f32 %v5843_v16, 0.0 }
 0x307   : > { %v3485_v29 = vpack.c.bf16 %v3397_v19, %v3393_v17  ;;  %v7653_v30 = vpack.c.bf16 %v3399_v20, %v3395_v18 }
 0x308   : > { %v3486_v31 = vpack.c.bf16 %v3398_v27, %v3394_v22  ;;  %v7655_v32 = vpack.c.bf16 %v3400_v28, %v3396_v26  ;;  %v2683_v33 = vpop.f32.mrb[40].mxu0  ;;  %v3262_v34 = vpop.f32.mrb[40].mxu1 }
 0x309   : > { %v5780_v35 = vadd.f32 %v2683_v33, %v7527_v8  ;;  %v5844_v36 = vadd.f32 %v3262_v34, %v7529_v9  ;;  %v2685_v38 = vpop.f32.mrb[41].mxu0  ;;  %v3264_v41 = vpop.f32.mrb[41].mxu1 }
 0x30a   : > { %v5781_v43 = vadd.f32 %v2685_v38, %v7533_v10  ;;  %v5845_v44 = vadd.f32 %v3264_v41, %v7535_v11  ;;  %v2687_v45 = vpop.f32.mrb[42].mxu0  ;;  %v3266_v47 = vpop.f32.mrb[42].mxu1  ;;  %4031 = vmatprep.mubr.bf16.mxu0 %v3486_v31 }
 0x30b   : > { %v5782_v50 = vadd.f32 %v2687_v45, %v7527_v8  ;;  %v5846_v52 = vadd.f32 %v3266_v47, %v7529_v9  ;;  %v2689_v53 = vpop.f32.mrb[43].mxu0  ;;  %v3268_v54 = vpop.f32.mrb[43].mxu1  ;;  %4032 = vmatmul.mubr.bf16.gmra.mrb[100].mxu0 %v3485_v29  ;;  %v3401_v57 = vmax.f32 %v5780_v35, 0.0  ;;  %v3403_v58 = vmax.f32 %v5844_v36, 0.0 }
 0x30c   : > { %v5783_v55 = vadd.f32 %v2689_v53, %v7533_v10  ;;  %v5847_v56 = vadd.f32 %v3268_v54, %v7535_v11  ;;  %v3402_v0 = vmax.f32 %v5781_v43, 0.0  ;;  %v3404_v4 = vmax.f32 %v5845_v44, 0.0 }
 0x30d   : > { %v3405_v60 = vmax.f32 %v5782_v50, 0.0  ;;  %v3407_v62 = vmax.f32 %v5846_v52, 0.0 }
 0x30e   : > { %v3406_v5 = vmax.f32 %v5783_v55, 0.0  ;;  %v3408_v7 = vmax.f32 %v5847_v56, 0.0 }
 0x30f   : > { %v3489_v13 = vpack.c.bf16 %v3405_v60, %v3401_v57  ;;  %v7665_v15 = vpack.c.bf16 %v3407_v62, %v3403_v58 }
 0x310   : > { %v3490_v16 = vpack.c.bf16 %v3406_v5, %v3402_v0  ;;  %v7667_v17 = vpack.c.bf16 %v3408_v7, %v3404_v4  ;;  %v2693_v18 = vpop.f32.mrb[44].mxu0  ;;  %v3272_v19 = vpop.f32.mrb[44].mxu1 }
 0x311   : > { %v5784_v20 = vadd.f32 %v2693_v18, %v7527_v8  ;;  %v5848_v22 = vadd.f32 %v3272_v19, %v7529_v9  ;;  %v2695_v26 = vpop.f32.mrb[45].mxu0  ;;  %v3274_v27 = vpop.f32.mrb[45].mxu1 }
 0x312   : > { %v5785_v28 = vadd.f32 %v2695_v26, %v7533_v10  ;;  %v5849_v29 = vadd.f32 %v3274_v27, %v7535_v11  ;;  %v2697_v31 = vpop.f32.mrb[46].mxu0  ;;  %v3276_v33 = vpop.f32.mrb[46].mxu1  ;;  %4041 = vmatprep.mubr.bf16.mxu0 %v3490_v16 }
 0x313   : > { %v5786_v34 = vadd.f32 %v2697_v31, %v7527_v8  ;;  %v5850_v35 = vadd.f32 %v3276_v33, %v7529_v9  ;;  %v2699_v36 = vpop.f32.mrb[47].mxu0  ;;  %v3278_v38 = vpop.f32.mrb[47].mxu1  ;;  %4042 = vmatmul.mubr.bf16.gmra.mrb[104].mxu0 %v3489_v13  ;;  %v3409_v44 = vmax.f32 %v5784_v20, 0.0  ;;  %v3411_v45 = vmax.f32 %v5848_v22, 0.0 }
 0x314   : > { %v5787_v41 = vadd.f32 %v2699_v36, %v7533_v10  ;;  %v5851_v43 = vadd.f32 %v3278_v38, %v7535_v11  ;;  %v3410_v52 = vmax.f32 %v5785_v28, 0.0  ;;  %v3412_v53 = vmax.f32 %v5849_v29, 0.0  ;;  %v6880_v29 = vld [vmem:[#allocation8 + $0x40] sm:$0xff]  }
 0x315   : > { %v3413_v47 = vmax.f32 %v5786_v34, 0.0  ;;  %v3415_v50 = vmax.f32 %v5850_v35, 0.0  ;;  %5524 = vmatprep.subr.bf16.mxu1 %v6880_v29 }
 0x316   : > { %v3414_v54 = vmax.f32 %v5787_v41, 0.0  ;;  %v3416_v55 = vmax.f32 %v5851_v43, 0.0 }
 0x317   : > { %v3493_v56 = vpack.c.bf16 %v3413_v47, %v3409_v44  ;;  %v7677_v57 = vpack.c.bf16 %v3415_v50, %v3411_v45 }
 0x318   : > { %v3494_v58 = vpack.c.bf16 %v3414_v54, %v3410_v52  ;;  %v7679_v60 = vpack.c.bf16 %v3416_v55, %v3412_v53  ;;  %v2703_v62 = vpop.f32.mrb[48].mxu0  ;;  %v3282_v0 = vpop.f32.mrb[48].mxu1 }
 0x319   : > { %v5788_v4 = vadd.f32 %v2703_v62, %v7527_v8  ;;  %v5852_v5 = vadd.f32 %v3282_v0, %v7529_v9  ;;  %v2705_v7 = vpop.f32.mrb[49].mxu0  ;;  %v3284_v13 = vpop.f32.mrb[49].mxu1 }
 0x31a   : > { %v5789_v16 = vadd.f32 %v2705_v7, %v7533_v10  ;;  %v5853_v18 = vadd.f32 %v3284_v13, %v7535_v11  ;;  %v2707_v19 = vpop.f32.mrb[50].mxu0  ;;  %v3286_v20 = vpop.f32.mrb[50].mxu1  ;;  %4051 = vmatprep.mubr.bf16.mxu0 %v3494_v58 }
 0x31b   : > { %v5790_v22 = vadd.f32 %v2707_v19, %v7527_v8  ;;  %v5854_v26 = vadd.f32 %v3286_v20, %v7529_v9  ;;  %v2709_v27 = vpop.f32.mrb[51].mxu0  ;;  %v3288_v28 = vpop.f32.mrb[51].mxu1  ;;  %4052 = vmatmul.mubr.bf16.gmra.mrb[108].mxu0 %v3493_v56  ;;  %v3417_v34 = vmax.f32 %v5788_v4, 0.0  ;;  %v3419_v35 = vmax.f32 %v5852_v5, 0.0  ;;  %v6881_v56 = vld [vmem:[#allocation8] sm:$0xff]   ;;  %v6882_v4 = vld [vmem:[#allocation8 + $0x48] sm:$0xff]  }
 0x31c   : > { %v5791_v31 = vadd.f32 %v2709_v27, %v7533_v10  ;;  %v5855_v33 = vadd.f32 %v3288_v28, %v7535_v11  ;;  %4134 = vmatprep.mubr.bf16.mxu0 %v7547_v39  ;;  %v3418_v41 = vmax.f32 %v5789_v16, 0.0  ;;  %v3420_v43 = vmax.f32 %v5853_v18, 0.0  ;;  %v6883_v28 = vld [vmem:[#allocation8 + $0x8] sm:$0xff]  }
 0x31d   : > { %v3421_v36 = vmax.f32 %v5790_v22, 0.0  ;;  %v3423_v38 = vmax.f32 %v5854_v26, 0.0 }
 0x31e   : > { %v3422_v44 = vmax.f32 %v5791_v31, 0.0  ;;  %v3424_v45 = vmax.f32 %v5855_v33, 0.0 }
 0x31f   : > { %v3497_v47 = vpack.c.bf16 %v3421_v36, %v3417_v34  ;;  %v7690_v50 = vpack.c.bf16 %v3423_v38, %v3419_v35  ;;  %v6884_v35 = vld [vmem:[#allocation8 + $0x50] sm:$0xff]  }
 0x320   : > { %v3498_v52 = vpack.c.bf16 %v3422_v44, %v3418_v41  ;;  %v7692_v53 = vpack.c.bf16 %v3424_v45, %v3420_v43  ;;  %v2713_v54 = vpop.f32.mrb[52].mxu0  ;;  %v3292_v55 = vpop.f32.mrb[52].mxu1 }
 0x321   : > { %v5792_v39 = vadd.f32 %v2713_v54, %v7527_v8  ;;  %v5856_v58 = vadd.f32 %v3292_v55, %v7529_v9  ;;  %v2715_v62 = vpop.f32.mrb[53].mxu0  ;;  %v3294_v0 = vpop.f32.mrb[53].mxu1  ;;  %v6885_v54 = vld [vmem:[#allocation8 + $0x10] sm:$0xff]  }
 0x322   : > { %v5793_v5 = vadd.f32 %v2715_v62, %v7533_v10  ;;  %v5857_v7 = vadd.f32 %v3294_v0, %v7535_v11  ;;  %v2717_v13 = vpop.f32.mrb[54].mxu0  ;;  %v3296_v16 = vpop.f32.mrb[54].mxu1  ;;  %4061 = vmatprep.mubr.bf16.mxu1 %v3498_v52  ;;  %v6886_v62 = vld [vmem:[#allocation8 + $0x58] sm:$0xff]  }
 0x323   : > { %v5794_v18 = vadd.f32 %v2717_v13, %v7527_v8  ;;  %v5858_v19 = vadd.f32 %v3296_v16, %v7529_v9  ;;  %v2719_v20 = vpop.f32.mrb[55].mxu0  ;;  %v3298_v22 = vpop.f32.mrb[55].mxu1  ;;  %4062 = vmatmul.mubr.bf16.vlgmr.msra.gmra.mrb[64].mxu1 %v3497_v47  ;;  %4135 = vmatmul.mubr.bf16.vlgmr.msra.gmra.mrb[64].mxu0 %v7545_v37  ;;  %v3425_v29 = vmax.f32 %v5792_v39, 0.0  ;;  %v3427_v31 = vmax.f32 %v5856_v58, 0.0 }
 0x324   : > { %v5795_v26 = vadd.f32 %v2719_v20, %v7533_v10  ;;  %v5859_v27 = vadd.f32 %v3298_v22, %v7535_v11  ;;  %4144 = vmatprep.mubr.bf16.mxu0 %v7559_v14  ;;  %5525 = vmatpush3.bf16.msra.mxu1 %v6881_v56  ;;  %v3426_v36 = vmax.f32 %v5793_v5, 0.0  ;;  %v3428_v38 = vmax.f32 %v5857_v7, 0.0 }
 0x325   : > { %v3429_v33 = vmax.f32 %v5794_v18, 0.0  ;;  %v3431_v34 = vmax.f32 %v5858_v19, 0.0  ;;  %5526 = vmatprep.subr.bf16.mxu1 %v6882_v4 }
 0x326   : > { %v3430_v41 = vmax.f32 %v5795_v26, 0.0  ;;  %v3432_v43 = vmax.f32 %v5859_v27, 0.0  ;;  %v6887_v26 = vld [vmem:[#allocation8 + $0x18] sm:$0xff]  }
 0x327   : > { %v3501_v44 = vpack.c.bf16 %v3429_v33, %v3425_v29  ;;  %v7704_v37 = vpack.c.bf16 %v3431_v34, %v3427_v31  ;;  %v6888_v33 = vld [vmem:[#allocation8 + $0x60] sm:$0xff]  }
 0x328   : > { %v3502_v45 = vpack.c.bf16 %v3430_v41, %v3426_v36  ;;  %v7706_v47 = vpack.c.bf16 %v3432_v43, %v3428_v38  ;;  %v2723_v52 = vpop.f32.mrb[56].mxu0  ;;  %v3302_v14 = vpop.f32.mrb[56].mxu1  ;;  %5527 = vmatpush3.bf16.msra.mxu1 %v6883_v28 }
 0x329   : > { %v5796_v55 = vadd.f32 %v2723_v52, %v7527_v8  ;;  %v5860_v56 = vadd.f32 %v3302_v14, %v7529_v9  ;;  %v2725_v39 = vpop.f32.mrb[57].mxu0  ;;  %v3304_v58 = vpop.f32.mrb[57].mxu1  ;;  %5528 = vmatprep.subr.bf16.mxu1 %v6884_v35  ;;  %v6889_v52 = vld [vmem:[#allocation8 + $0x20] sm:$0xff]  }
 0x32a   : > { %v5797_v0 = vadd.f32 %v2725_v39, %v7533_v10  ;;  %v5861_v4 = vadd.f32 %v3304_v58, %v7535_v11  ;;  %v2727_v5 = vpop.f32.mrb[58].mxu0  ;;  %v3306_v7 = vpop.f32.mrb[58].mxu1  ;;  %4071 = vmatprep.mubr.bf16.mxu1 %v3502_v45  ;;  %v6890_v39 = vld [vmem:[#allocation8 + $0x68] sm:$0xff]  }
 0x32b   : > { %v5798_v13 = vadd.f32 %v2727_v5, %v7527_v8  ;;  %v5862_v16 = vadd.f32 %v3306_v7, %v7529_v9  ;;  %v2729_v18 = vpop.f32.mrb[59].mxu0  ;;  %v3308_v19 = vpop.f32.mrb[59].mxu1  ;;  %4072 = vmatmul.mubr.bf16.gmra.mrb[68].mxu1 %v3501_v44  ;;  %4145 = vmatmul.mubr.bf16.gmra.mrb[68].mxu0 %v7557_v12  ;;  %v3433_v27 = vmax.f32 %v5796_v55, 0.0  ;;  %v3435_v28 = vmax.f32 %v5860_v56, 0.0 }
 0x32c   : > { %v5799_v20 = vadd.f32 %v2729_v18, %v7533_v10  ;;  %v5863_v22 = vadd.f32 %v3308_v19, %v7535_v11  ;;  %4154 = vmatprep.mubr.bf16.mxu0 %v7571_v48  ;;  %5529 = vmatpush3.bf16.msra.mxu1 %v6885_v54  ;;  %v3434_v34 = vmax.f32 %v5797_v0, 0.0  ;;  %v3436_v35 = vmax.f32 %v5861_v4, 0.0 }
 0x32d   : > { %v3437_v29 = vmax.f32 %v5798_v13, 0.0  ;;  %v3439_v31 = vmax.f32 %v5862_v16, 0.0  ;;  %5530 = vmatprep.subr.bf16.mxu1 %v6886_v62 }
 0x32e   : > { %v3438_v36 = vmax.f32 %v5799_v20, 0.0  ;;  %v3440_v38 = vmax.f32 %v5863_v22, 0.0 }
 0x32f   : > { %v3505_v41 = vpack.c.bf16 %v3437_v29, %v3433_v27  ;;  %v7718_v12 = vpack.c.bf16 %v3439_v31, %v3435_v28 }
 0x330   : > { %v3506_v43 = vpack.c.bf16 %v3438_v36, %v3434_v34  ;;  %v7720_v44 = vpack.c.bf16 %v3440_v38, %v3436_v35  ;;  %v2733_v45 = vpop.f32.mrb[60].mxu0  ;;  %v3312_v48 = vpop.f32.mrb[60].mxu1  ;;  %5531 = vmatpush3.bf16.msra.mxu1 %v6887_v26 }
 0x331   : > { %v5800_v14 = vadd.f32 %v2733_v45, %v7527_v8  ;;  %v5864_v54 = vadd.f32 %v3312_v48, %v7529_v9  ;;  %v2735_v55 = vpop.f32.mrb[61].mxu0  ;;  %v3314_v56 = vpop.f32.mrb[61].mxu1  ;;  %5532 = vmatprep.subr.bf16.mxu1 %v6888_v33 }
 0x332   : > { %v5801_v58 = vadd.f32 %v2735_v55, %v7533_v10  ;;  %v5865_v62 = vadd.f32 %v3314_v56, %v7535_v11  ;;  %v2737_v0 = vpop.f32.mrb[62].mxu0  ;;  %v3316_v4 = vpop.f32.mrb[62].mxu1  ;;  %4081 = vmatprep.mubr.bf16.mxu1 %v3506_v43  ;;  %v6897_v43 = vld [vmem:[#allocation10 + $0x8] sm:$0xff]  }
 0x333   : > { %v5802_v5 = vadd.f32 %v2737_v0, %v7527_v8  ;;  %v5866_v7 = vadd.f32 %v3316_v4, %v7529_v9  ;;  %v2739_v13 = vpop.f32.mrb[63].mxu0  ;;  %v3318_v16 = vpop.f32.mrb[63].mxu1  ;;  %4082 = vmatmul.mubr.bf16.gmra.mrb[72].mxu1 %v3505_v41  ;;  %4155 = vmatmul.mubr.bf16.gmra.mrb[72].mxu0 %v7569_v46  ;;  %v3441_v20 = vmax.f32 %v5800_v14, 0.0  ;;  %v3443_v22 = vmax.f32 %v5864_v54, 0.0 }
 0x334   : > { %v5803_v18 = vadd.f32 %v2739_v13, %v7533_v10  ;;  %v5867_v19 = vadd.f32 %v3318_v16, %v7535_v11  ;;  %4164 = vmatprep.mubr.bf16.mxu0 %v7583_v25  ;;  %5533 = vmatpush3.bf16.msra.mxu1 %v6889_v52  ;;  %v3442_v8 = vmax.f32 %v5801_v58, 0.0  ;;  %v3444_v28 = vmax.f32 %v5865_v62, 0.0  ;;  %v6891_v10 = vld [vmem:[#allocation8 + $0x28] sm:$0xff]   ;;  %v6892_v11 = vld [vmem:[#allocation8 + $0x70] sm:$0xff]   ;;  %v6894_v25 = vld [vmem:[#allocation8 + $0x78] sm:$0xff]  }
 0x335   : > { %v3445_v26 = vmax.f32 %v5802_v5, 0.0  ;;  %v3447_v27 = vmax.f32 %v5866_v7, 0.0  ;;  %5534 = vmatprep.subr.bf16.mxu1 %v6890_v39  ;;  %v6898_v58 = vld [vmem:[#allocation10 + $0x10] sm:$0xff]  }
 0x336   : > { %v3446_v9 = vmax.f32 %v5803_v18, 0.0  ;;  %v3448_v29 = vmax.f32 %v5867_v19, 0.0 }
 0x337   : > { %v3509_v31 = vpack.c.bf16 %v3445_v26, %v3441_v20  ;;  %v3511_v33 = vpack.c.bf16 %v3447_v27, %v3443_v22  ;;  %v6899_v20 = vld [vmem:[#allocation10 + $0x18] sm:$0xff]  }
 0x338   : > { %v3510_v34 = vpack.c.bf16 %v3446_v9, %v3442_v8  ;;  %v3512_v46 = vpack.c.bf16 %v3448_v29, %v3444_v28  ;;  %5535 = vmatpush3.bf16.msra.mxu1 %v6891_v10 }
 0x339   : > { %5536 = vmatprep.subr.bf16.mxu1 %v6892_v11 }
 0x33a   : > { %4091 = vmatprep.mubr.bf16.mxu1 %v3510_v34 }
 0x33b   : > { %4092 = vmatmul.mubr.bf16.gmra.mrb[76].mxu1 %v3509_v31  ;;  %4165 = vmatmul.mubr.bf16.gmra.mrb[76].mxu0 %v7581_v23  ;;  %v6893_v23 = vld [vmem:[#allocation8 + $0x30] sm:$0xff]  }
 0x33c   : > { %4174 = vmatprep.mubr.bf16.mxu0 %v7595_v61  ;;  %5537 = vmatpush3.bf16.msra.mxu1 %v6893_v23  ;;  %v3577_v61 = vld [vmem:[%s8042_s4] sm:$0x3] }
 0x33d   : > { %5538 = vmatprep.subr.bf16.mxu1 %v6894_v25 }
 0x343   : > { %4175 = vmatmul.mubr.bf16.gmra.mrb[80].mxu0 %v7593_v59  ;;  %v6895_v59 = vld [vmem:[#allocation8 + $0x38] sm:$0xff]  }
 0x344   : > { %4184 = vmatprep.mubr.bf16.mxu0 %v7607_v42  ;;  %5539 = vmatpush3.bf16.msra.mxu1 %v6895_v59  ;;  %v7764_v42 = vrot.slane %v3577_v61, %v709_v6  ;;  %v6896_v6 = vld [vmem:[#allocation10] sm:$0xff]  }
 0x345   : > { %5660 = vmatprep.subr.bf16.mxu1 %v6896_v6 }
 0x34b   : > { %4185 = vmatmul.mubr.bf16.gmra.mrb[84].mxu0 %v7605_v40  ;;  %v7760_v40 = vrot.slane %v3577_v61, %v705_v3 }
 0x34c   : > { %4194 = vmatprep.mubr.bf16.mxu0 %v7619_v24 }
 0x353   : > { %4195 = vmatmul.mubr.bf16.gmra.mrb[88].mxu0 %v7617_v21 }
 0x354   : > { %4204 = vmatprep.mubr.bf16.mxu0 %v7631_v1 }
 0x35b   : > { %4205 = vmatmul.mubr.bf16.gmra.mrb[92].mxu0 %v7629_v63 }
 0x35c   : > { %4214 = vmatprep.mubr.bf16.mxu0 %v7643_v51 }
 0x363   : > { %4215 = vmatmul.mubr.bf16.gmra.mrb[96].mxu0 %v7641_v49 }
 0x364   : > { %4224 = vmatprep.mubr.bf16.mxu0 %v7655_v32 }
 0x36b   : > { %4225 = vmatmul.mubr.bf16.gmra.mrb[100].mxu0 %v7653_v30 }
 0x36c   : > { %4234 = vmatprep.mubr.bf16.mxu0 %v7667_v17 }
 0x373   : > { %4235 = vmatmul.mubr.bf16.gmra.mrb[104].mxu0 %v7665_v15 }
 0x374   : > { %4244 = vmatprep.mubr.bf16.mxu0 %v7679_v60 }
 0x37b   : > { %4245 = vmatmul.mubr.bf16.gmra.mrb[108].mxu0 %v7677_v57 }
 0x37c   : > { %4254 = vmatprep.mubr.bf16.mxu0 %v7692_v53 }
 0x383   : > { %4255 = vmatmul.mubr.bf16.gmra.mrb[112].mxu0 %v7690_v50 }
 0x384   : > { %4264 = vmatprep.mubr.bf16.mxu0 %v7706_v47 }
 0x38b   : > { %4265 = vmatmul.mubr.bf16.gmra.mrb[116].mxu0 %v7704_v37 }
 0x38c   : > { %4274 = vmatprep.mubr.bf16.mxu0 %v7720_v44 }
 0x393   : > { %4275 = vmatmul.mubr.bf16.gmra.mrb[120].mxu0 %v7718_v12 }
 0x394   : > { %4284 = vmatprep.mubr.bf16.mxu0 %v3512_v46 }
 0x39b   : > { %4285 = vmatmul.mubr.bf16.gmra.mrb[124].mxu0 %v3511_v33 }
 0x3f6   : > { %v7766_v21 = vpop.f32.mrb[64].mxu1  ;;  %v4136_v24 = vpop.f32.mrb[64].mxu0 }
 0x3f7   : > { %v5868_v63 = vadd.f32 %v4136_v24, %v7760_v40  ;;  %v7769_v1 = vpop.f32.mrb[65].mxu1  ;;  %v4138_v49 = vpop.f32.mrb[65].mxu0 }
 0x3f8   : > { %v5869_v51 = vadd.f32 %v4138_v49, %v7764_v42  ;;  %v7772_v30 = vpop.f32.mrb[66].mxu1  ;;  %v4140_v32 = vpop.f32.mrb[66].mxu0 }
 0x3f9   : > { %v5870_v3 = vadd.f32 %v4140_v32, %v7760_v40  ;;  %v7775_v15 = vpop.f32.mrb[67].mxu1  ;;  %v4142_v2 = vpop.f32.mrb[67].mxu0  ;;  %v4295_v57 = vmax.f32 %v5868_v63, 0.0 }
 0x3fa   : > { %v5871_v17 = vadd.f32 %v4142_v2, %v7764_v42  ;;  %v4296_v50 = vmax.f32 %v5869_v51, 0.0 }
 0x3fb   : > { %v4297_v60 = vmax.f32 %v5870_v3, 0.0 }
 0x3fc   : > { %v4298_v53 = vmax.f32 %v5871_v17, 0.0 }
 0x3fd   : > { %v4359_v37 = vpack.c.bf16 %v4297_v60, %v4295_v57 }
 0x3fe   : > { %v4360_v47 = vpack.c.bf16 %v4298_v53, %v4296_v50  ;;  %v7778_v35 = vpop.f32.mrb[68].mxu1  ;;  %v4146_v36 = vpop.f32.mrb[68].mxu0 }
 0x3ff   : > { %v5872_v38 = vadd.f32 %v4146_v36, %v7760_v40  ;;  %v7781_v41 = vpop.f32.mrb[69].mxu1  ;;  %v4148_v12 = vpop.f32.mrb[69].mxu0 }
 0x400   : > { %v5873_v44 = vadd.f32 %v4148_v12, %v7764_v42  ;;  %v7784_v45 = vpop.f32.mrb[70].mxu1  ;;  %v4150_v48 = vpop.f32.mrb[70].mxu0  ;;  %4558 = vmatprep.mubr.bf16.mxu1 %v4360_v47 }
 0x401   : > { %v5874_v52 = vadd.f32 %v4150_v48, %v7760_v40  ;;  %v7787_v14 = vpop.f32.mrb[71].mxu1  ;;  %v4152_v54 = vpop.f32.mrb[71].mxu0  ;;  %4559 = vmatmul.mubr.bf16.vlgmr.msra.gmra.mrb[80].mxu1 %v4359_v37  ;;  %v4299_v56 = vmax.f32 %v5872_v38, 0.0 }
 0x402   : > { %v5875_v55 = vadd.f32 %v4152_v54, %v7764_v42  ;;  %5661 = vmatpush3.bf16.msra.mxu1 %v6896_v6  ;;  %v4300_v62 = vmax.f32 %v5873_v44, 0.0 }
 0x403   : > { %v4301_v39 = vmax.f32 %v5874_v52, 0.0  ;;  %5662 = vmatprep.subr.bf16.mxu1 %v6897_v43 }
 0x404   : > { %v4302_v0 = vmax.f32 %v5875_v55, 0.0 }
 0x405   : > { %v4361_v4 = vpack.c.bf16 %v4301_v39, %v4299_v56 }
 0x406   : > { %v4362_v5 = vpack.c.bf16 %v4302_v0, %v4300_v62  ;;  %v7790_v7 = vpop.f32.mrb[72].mxu1  ;;  %v4156_v13 = vpop.f32.mrb[72].mxu0  ;;  %5663 = vmatpush3.bf16.msra.mxu1 %v6897_v43 }
 0x407   : > { %v5876_v16 = vadd.f32 %v4156_v13, %v7760_v40  ;;  %v7793_v18 = vpop.f32.mrb[73].mxu1  ;;  %v4158_v19 = vpop.f32.mrb[73].mxu0  ;;  %5664 = vmatprep.subr.bf16.mxu1 %v6898_v58 }
 0x408   : > { %v5877_v22 = vadd.f32 %v4158_v19, %v7764_v42  ;;  %v7796_v26 = vpop.f32.mrb[74].mxu1  ;;  %v4160_v27 = vpop.f32.mrb[74].mxu0  ;;  %4566 = vmatprep.mubr.bf16.mxu1 %v4362_v5 }
 0x409   : > { %v5878_v8 = vadd.f32 %v4160_v27, %v7760_v40  ;;  %v7799_v28 = vpop.f32.mrb[75].mxu1  ;;  %v4162_v9 = vpop.f32.mrb[75].mxu0  ;;  %4567 = vmatmul.mubr.bf16.gmra.mrb[84].mxu1 %v4361_v4  ;;  %v4303_v31 = vmax.f32 %v5876_v16, 0.0 }
 0x40a   : > { %v5879_v29 = vadd.f32 %v4162_v9, %v7764_v42  ;;  %5665 = vmatpush3.bf16.msra.mxu1 %v6898_v58  ;;  %v4304_v34 = vmax.f32 %v5877_v22, 0.0 }
 0x40b   : > { %v4305_v33 = vmax.f32 %v5878_v8, 0.0  ;;  %5666 = vmatprep.subr.bf16.mxu1 %v6899_v20 }
 0x40c   : > { %v4306_v46 = vmax.f32 %v5879_v29, 0.0 }
 0x40d   : > { %v4363_v10 = vpack.c.bf16 %v4305_v33, %v4303_v31 }
 0x40e   : > { %v4364_v11 = vpack.c.bf16 %v4306_v46, %v4304_v34  ;;  %v7802_v23 = vpop.f32.mrb[76].mxu1  ;;  %v4166_v25 = vpop.f32.mrb[76].mxu0  ;;  %5667 = vmatpush3.bf16.msra.mxu1 %v6899_v20 }
 0x40f   : > { %v5880_v59 = vadd.f32 %v4166_v25, %v7760_v40  ;;  %v7805_v61 = vpop.f32.mrb[77].mxu1  ;;  %v4168_v24 = vpop.f32.mrb[77].mxu0 }
 0x410   : > { %v5881_v63 = vadd.f32 %v4168_v24, %v7764_v42  ;;  %v7808_v49 = vpop.f32.mrb[78].mxu1  ;;  %v4170_v51 = vpop.f32.mrb[78].mxu0  ;;  %4574 = vmatprep.mubr.bf16.mxu1 %v4364_v11 }
 0x411   : > { %v5882_v32 = vadd.f32 %v4170_v51, %v7760_v40  ;;  %v7811_v3 = vpop.f32.mrb[79].mxu1  ;;  %v4172_v2 = vpop.f32.mrb[79].mxu0  ;;  %4575 = vmatmul.mubr.bf16.gmra.mrb[88].mxu1 %v4363_v10  ;;  %v4307_v17 = vmax.f32 %v5880_v59, 0.0 }
 0x412   : > { %v5883_v6 = vadd.f32 %v4172_v2, %v7764_v42  ;;  %v4308_v60 = vmax.f32 %v5881_v63, 0.0 }
 0x413   : > { %v4309_v57 = vmax.f32 %v5882_v32, 0.0 }
 0x414   : > { %v4310_v50 = vmax.f32 %v5883_v6, 0.0 }
 0x415   : > { %v4365_v53 = vpack.c.bf16 %v4309_v57, %v4307_v17 }
 0x416   : > { %v4366_v37 = vpack.c.bf16 %v4310_v50, %v4308_v60  ;;  %v4176_v47 = vpop.f32.mrb[80].mxu0 }
 0x417   : > { %v5884_v36 = vadd.f32 %v4176_v47, %v7760_v40  ;;  %v4178_v38 = vpop.f32.mrb[81].mxu0 }
 0x418   : > { %v5885_v12 = vadd.f32 %v4178_v38, %v7764_v42  ;;  %v4180_v43 = vpop.f32.mrb[82].mxu0  ;;  %4582 = vmatprep.mubr.bf16.mxu1 %v4366_v37 }
 0x419   : > { %v5886_v44 = vadd.f32 %v4180_v43, %v7760_v40  ;;  %v4182_v48 = vpop.f32.mrb[83].mxu0  ;;  %4583 = vmatmul.mubr.bf16.gmra.mrb[92].mxu1 %v4365_v53  ;;  %v4311_v54 = vmax.f32 %v5884_v36, 0.0 }
 0x41a   : > { %v5887_v52 = vadd.f32 %v4182_v48, %v7764_v42  ;;  %v4312_v56 = vmax.f32 %v5885_v12, 0.0 }
 0x41b   : > { %v4313_v55 = vmax.f32 %v5886_v44, 0.0 }
 0x41c   : > { %v4314_v39 = vmax.f32 %v5887_v52, 0.0 }
 0x41d   : > { %v4367_v58 = vpack.c.bf16 %v4313_v55, %v4311_v54 }
 0x41e   : > { %v4368_v62 = vpack.c.bf16 %v4314_v39, %v4312_v56  ;;  %v4186_v0 = vpop.f32.mrb[84].mxu0 }
 0x41f   : > { %v5888_v4 = vadd.f32 %v4186_v0, %v7760_v40  ;;  %v4188_v5 = vpop.f32.mrb[85].mxu0 }
 0x420   : > { %v5889_v13 = vadd.f32 %v4188_v5, %v7764_v42  ;;  %v4190_v16 = vpop.f32.mrb[86].mxu0  ;;  %4590 = vmatprep.mubr.bf16.mxu1 %v4368_v62 }
 0x421   : > { %v5890_v19 = vadd.f32 %v4190_v16, %v7760_v40  ;;  %v4192_v20 = vpop.f32.mrb[87].mxu0  ;;  %4591 = vmatmul.mubr.bf16.gmra.mrb[96].mxu1 %v4367_v58  ;;  %v4315_v27 = vmax.f32 %v5888_v4, 0.0 }
 0x422   : > { %v5891_v22 = vadd.f32 %v4192_v20, %v7764_v42  ;;  %v4316_v9 = vmax.f32 %v5889_v13, 0.0 }
 0x423   : > { %v4317_v8 = vmax.f32 %v5890_v19, 0.0 }
 0x424   : > { %v4318_v29 = vmax.f32 %v5891_v22, 0.0 }
 0x425   : > { %v4369_v31 = vpack.c.bf16 %v4317_v8, %v4315_v27 }
 0x426   : > { %v4370_v33 = vpack.c.bf16 %v4318_v29, %v4316_v9  ;;  %v4196_v34 = vpop.f32.mrb[88].mxu0 }
 0x427   : > { %v5892_v46 = vadd.f32 %v4196_v34, %v7760_v40  ;;  %v4198_v10 = vpop.f32.mrb[89].mxu0 }
 0x428   : > { %v5893_v11 = vadd.f32 %v4198_v10, %v7764_v42  ;;  %v4200_v25 = vpop.f32.mrb[90].mxu0  ;;  %4598 = vmatprep.mubr.bf16.mxu1 %v4370_v33 }
 0x429   : > { %v5894_v59 = vadd.f32 %v4200_v25, %v7760_v40  ;;  %v4202_v24 = vpop.f32.mrb[91].mxu0  ;;  %4599 = vmatmul.mubr.bf16.gmra.mrb[100].mxu1 %v4369_v31  ;;  %v4319_v51 = vmax.f32 %v5892_v46, 0.0 }
 0x42a   : > { %v5895_v63 = vadd.f32 %v4202_v24, %v7764_v42  ;;  %v4320_v2 = vmax.f32 %v5893_v11, 0.0 }
 0x42b   : > { %v4321_v32 = vmax.f32 %v5894_v59, 0.0 }
 0x42c   : > { %v4322_v6 = vmax.f32 %v5895_v63, 0.0 }
 0x42d   : > { %v4371_v17 = vpack.c.bf16 %v4321_v32, %v4319_v51 }
 0x42e   : > { %v4372_v57 = vpack.c.bf16 %v4322_v6, %v4320_v2  ;;  %v4206_v60 = vpop.f32.mrb[92].mxu0 }
 0x42f   : > { %v5896_v50 = vadd.f32 %v4206_v60, %v7760_v40  ;;  %v4208_v53 = vpop.f32.mrb[93].mxu0 }
 0x430   : > { %v5897_v37 = vadd.f32 %v4208_v53, %v7764_v42  ;;  %v4210_v47 = vpop.f32.mrb[94].mxu0  ;;  %4606 = vmatprep.mubr.bf16.mxu1 %v4372_v57 }
 0x431   : > { %v5898_v36 = vadd.f32 %v4210_v47, %v7760_v40  ;;  %v4212_v38 = vpop.f32.mrb[95].mxu0  ;;  %4607 = vmatmul.mubr.bf16.gmra.mrb[104].mxu1 %v4371_v17  ;;  %v4323_v43 = vmax.f32 %v5896_v50, 0.0 }
 0x432   : > { %v5899_v12 = vadd.f32 %v4212_v38, %v7764_v42  ;;  %v4324_v48 = vmax.f32 %v5897_v37, 0.0 }
 0x433   : > { %v4325_v44 = vmax.f32 %v5898_v36, 0.0 }
 0x434   : > { %v4326_v52 = vmax.f32 %v5899_v12, 0.0 }
 0x435   : > { %v4373_v54 = vpack.c.bf16 %v4325_v44, %v4323_v43 }
 0x436   : > { %v4374_v55 = vpack.c.bf16 %v4326_v52, %v4324_v48  ;;  %v4216_v56 = vpop.f32.mrb[96].mxu0 }
 0x437   : > { %v5900_v39 = vadd.f32 %v4216_v56, %v7760_v40  ;;  %v4218_v58 = vpop.f32.mrb[97].mxu0 }
 0x438   : > { %v5901_v62 = vadd.f32 %v4218_v58, %v7764_v42  ;;  %v4220_v0 = vpop.f32.mrb[98].mxu0  ;;  %4614 = vmatprep.mubr.bf16.mxu1 %v4374_v55 }
 0x439   : > { %v5902_v4 = vadd.f32 %v4220_v0, %v7760_v40  ;;  %v4222_v5 = vpop.f32.mrb[99].mxu0  ;;  %4615 = vmatmul.mubr.bf16.gmra.mrb[108].mxu1 %v4373_v54  ;;  %v4327_v16 = vmax.f32 %v5900_v39, 0.0 }
 0x43a   : > { %v5903_v13 = vadd.f32 %v4222_v5, %v7764_v42  ;;  %v4328_v20 = vmax.f32 %v5901_v62, 0.0 }
 0x43b   : > { %v4329_v19 = vmax.f32 %v5902_v4, 0.0 }
 0x43c   : > { %v4330_v22 = vmax.f32 %v5903_v13, 0.0 }
 0x43d   : > { %v4375_v27 = vpack.c.bf16 %v4329_v19, %v4327_v16  ;;  %v4064_v16 = vadd.f32 %v7766_v21, %v7760_v40 }
 0x43e   : > { %v4376_v8 = vpack.c.bf16 %v4330_v22, %v4328_v20  ;;  %v4226_v9 = vpop.f32.mrb[100].mxu0  ;;  %v4066_v20 = vadd.f32 %v7769_v1, %v7764_v42  ;;  %v6901_v1 = vld [vmem:[#allocation10 + $0x28] sm:$0xff]  }
 0x43f   : > { %v5904_v29 = vadd.f32 %v4226_v9, %v7760_v40  ;;  %v4228_v31 = vpop.f32.mrb[101].mxu0  ;;  %v4068_v9 = vadd.f32 %v7772_v30, %v7760_v40  ;;  %v4074_v30 = vadd.f32 %v7778_v35, %v7760_v40 }
 0x440   : > { %v5905_v33 = vadd.f32 %v4228_v31, %v7764_v42  ;;  %v4230_v34 = vpop.f32.mrb[102].mxu0  ;;  %4622 = vmatprep.mubr.bf16.mxu1 %v4376_v8  ;;  %v6900_v8 = vld [vmem:[#allocation10 + $0x20] sm:$0xff]  }
 0x441   : > { %v5906_v46 = vadd.f32 %v4230_v34, %v7760_v40  ;;  %v4232_v10 = vpop.f32.mrb[103].mxu0  ;;  %4623 = vmatmul.mubr.bf16.gmra.mrb[112].mxu1 %v4375_v27  ;;  %v4331_v25 = vmax.f32 %v5904_v29, 0.0  ;;  %5668 = vmatprep.subr.bf16.mxu1 %v6900_v8 }
 0x442   : > { %v5907_v11 = vadd.f32 %v4232_v10, %v7764_v42  ;;  %v4332_v24 = vmax.f32 %v5905_v33, 0.0  ;;  %v4070_v33 = vadd.f32 %v7775_v15, %v7764_v42  ;;  %5669 = vmatpush3.bf16.msra.mxu1 %v6900_v8  ;;  %v4076_v15 = vadd.f32 %v7781_v41, %v7764_v42 }
 0x443   : > { %v4333_v59 = vmax.f32 %v5906_v46, 0.0  ;;  %5670 = vmatprep.subr.bf16.mxu1 %v6901_v1  ;;  %v4098_v8 = vadd.f32 %v7808_v49, %v7760_v40 }
 0x444   : > { %v4334_v63 = vmax.f32 %v5907_v11, 0.0 }
 0x445   : > { %v4377_v51 = vpack.c.bf16 %v4333_v59, %v4331_v25 }
 0x446   : > { %v4378_v32 = vpack.c.bf16 %v4334_v63, %v4332_v24  ;;  %v4236_v2 = vpop.f32.mrb[104].mxu0  ;;  %5671 = vmatpush3.bf16.msra.mxu1 %v6901_v1 }
 0x447   : > { %v5908_v6 = vadd.f32 %v4236_v2, %v7760_v40  ;;  %v4238_v17 = vpop.f32.mrb[105].mxu0 }
 0x448   : > { %v5909_v57 = vadd.f32 %v4238_v17, %v7764_v42  ;;  %v4240_v60 = vpop.f32.mrb[106].mxu0  ;;  %4630 = vmatprep.mubr.bf16.mxu1 %v4378_v32  ;;  %v4078_v17 = vadd.f32 %v7784_v45, %v7760_v40  ;;  %v4084_v45 = vadd.f32 %v7790_v7, %v7760_v40 }
 0x449   : > { %v5910_v50 = vadd.f32 %v4240_v60, %v7760_v40  ;;  %v4242_v53 = vpop.f32.mrb[107].mxu0  ;;  %4631 = vmatmul.mubr.bf16.gmra.mrb[116].mxu1 %v4377_v51  ;;  %v4335_v47 = vmax.f32 %v5908_v6, 0.0  ;;  %v6902_v6 = vld [vmem:[#allocation10 + $0x30] sm:$0xff]  }
 0x44a   : > { %v5911_v37 = vadd.f32 %v4242_v53, %v7764_v42  ;;  %v4336_v38 = vmax.f32 %v5909_v57, 0.0  ;;  %5672 = vmatprep.subr.bf16.mxu1 %v6902_v6 }
 0x44b   : > { %v4337_v36 = vmax.f32 %v5910_v50, 0.0  ;;  %v4080_v50 = vadd.f32 %v7787_v14, %v7764_v42  ;;  %5673 = vmatpush3.bf16.msra.mxu1 %v6902_v6  ;;  %v4086_v14 = vadd.f32 %v7793_v18, %v7764_v42 }
 0x44c   : > { %v4338_v12 = vmax.f32 %v5911_v37, 0.0 }
 0x44d   : > { %v4379_v43 = vpack.c.bf16 %v4337_v36, %v4335_v47  ;;  %v6903_v36 = vld [vmem:[#allocation10 + $0x38] sm:$0xff]  }
 0x44e   : > { %v4380_v44 = vpack.c.bf16 %v4338_v12, %v4336_v38  ;;  %v4246_v48 = vpop.f32.mrb[108].mxu0  ;;  %5674 = vmatprep.subr.bf16.mxu1 %v6903_v36 }
 0x44f   : > { %v5912_v52 = vadd.f32 %v4246_v48, %v7760_v40  ;;  %v4248_v54 = vpop.f32.mrb[109].mxu0  ;;  %5675 = vmatpush3.bf16.msra.mxu1 %v6903_v36 }
 0x450   : > { %v5913_v55 = vadd.f32 %v4248_v54, %v7764_v42  ;;  %v4250_v56 = vpop.f32.mrb[110].mxu0  ;;  %4638 = vmatprep.mubr.bf16.mxu1 %v4380_v44 }
 0x451   : > { %v5914_v39 = vadd.f32 %v4250_v56, %v7760_v40  ;;  %v4252_v58 = vpop.f32.mrb[111].mxu0  ;;  %4639 = vmatmul.mubr.bf16.gmra.mrb[120].mxu1 %v4379_v43  ;;  %v4339_v0 = vmax.f32 %v5912_v52, 0.0 }
 0x452   : > { %v5915_v62 = vadd.f32 %v4252_v58, %v7764_v42  ;;  %v4340_v5 = vmax.f32 %v5913_v55, 0.0  ;;  %v4088_v55 = vadd.f32 %v7796_v26, %v7760_v40  ;;  %v4090_v58 = vadd.f32 %v7799_v28, %v7764_v42 }
 0x453   : > { %v4341_v4 = vmax.f32 %v5914_v39, 0.0 }
 0x454   : > { %v4342_v13 = vmax.f32 %v5915_v62, 0.0 }
 0x455   : > { %v4381_v19 = vpack.c.bf16 %v4341_v4, %v4339_v0 }
 0x456   : > { %v4382_v22 = vpack.c.bf16 %v4342_v13, %v4340_v5  ;;  %v4256_v27 = vpop.f32.mrb[112].mxu0 }
 0x457   : > { %v4257_v29 = vadd.f32 %v4256_v27, %v4064_v16  ;;  %v4258_v31 = vpop.f32.mrb[113].mxu0 }
 0x458   : > { %v4259_v34 = vadd.f32 %v4258_v31, %v4066_v20  ;;  %v4260_v46 = vpop.f32.mrb[114].mxu0  ;;  %4646 = vmatprep.mubr.bf16.mxu1 %v4382_v22  ;;  %v4094_v20 = vadd.f32 %v7802_v23, %v7760_v40  ;;  %v4096_v22 = vadd.f32 %v7805_v61, %v7764_v42  ;;  %v4100_v31 = vadd.f32 %v7811_v3, %v7764_v42  ;;  %v7881_v42 = vld [vmem:[%s8044_s6] ss:$0 sm:$0xff] }
 0x459   : > { %v4261_v21 = vadd.f32 %v4260_v46, %v4068_v9  ;;  %v4262_v10 = vpop.f32.mrb[115].mxu0  ;;  %4647 = vmatmul.mubr.bf16.gmra.mrb[124].mxu1 %v4381_v19  ;;  %v4343_v25 = vmax.f32 %v4257_v29, 0.0 }
 0x45a   : > { %v4263_v11 = vadd.f32 %v4262_v10, %v4070_v33  ;;  %v4344_v24 = vmax.f32 %v4259_v34, 0.0 }
 0x45b   : > { %v4345_v59 = vmax.f32 %v4261_v21, 0.0 }
 0x45c   : > { %v4346_v63 = vmax.f32 %v4263_v11, 0.0 }
 0x45d   : > { %v4383_v51 = vpack.c.bf16 %v4345_v59, %v4343_v25 }
 0x45e   : > { %v4384_v32 = vpack.c.bf16 %v4346_v63, %v4344_v24  ;;  %v4266_v2 = vpop.f32.mrb[116].mxu0 }
 0x45f   : > { %v4267_v57 = vadd.f32 %v4266_v2, %v4074_v30  ;;  %v4268_v60 = vpop.f32.mrb[117].mxu0 }
 0x460   : > { %v4269_v53 = vadd.f32 %v4268_v60, %v4076_v15  ;;  %v4270_v37 = vpop.f32.mrb[118].mxu0  ;;  %4654 = vmatprep.mubr.bf16.mxu1 %v4384_v32 }
 0x461   : > { %v4271_v35 = vadd.f32 %v4270_v37, %v4078_v17  ;;  %v4272_v47 = vpop.f32.mrb[119].mxu0  ;;  %4655 = vmatmul.mubr.bf16.gmra.mrb[128].mxu1 %v4383_v51  ;;  %v4347_v38 = vmax.f32 %v4267_v57, 0.0 }
 0x462   : > { %v4273_v41 = vadd.f32 %v4272_v47, %v4080_v50  ;;  %v4348_v43 = vmax.f32 %v4269_v53, 0.0 }
 0x463   : > { %v4349_v12 = vmax.f32 %v4271_v35, 0.0 }
 0x464   : > { %v4350_v44 = vmax.f32 %v4273_v41, 0.0 }
 0x465   : > { %v4385_v48 = vpack.c.bf16 %v4349_v12, %v4347_v38 }
 0x466   : > { %v4386_v52 = vpack.c.bf16 %v4350_v44, %v4348_v43  ;;  %v4276_v54 = vpop.f32.mrb[120].mxu0 }
 0x467   : > { %v4277_v56 = vadd.f32 %v4276_v54, %v4084_v45  ;;  %v4278_v39 = vpop.f32.mrb[121].mxu0 }
 0x468   : > { %v4279_v62 = vadd.f32 %v4278_v39, %v4086_v14  ;;  %v4280_v0 = vpop.f32.mrb[122].mxu0  ;;  %4662 = vmatprep.mubr.bf16.mxu1 %v4386_v52 }
 0x469   : > { %v4281_v4 = vadd.f32 %v4280_v0, %v4088_v55  ;;  %v4282_v7 = vpop.f32.mrb[123].mxu0  ;;  %4663 = vmatmul.mubr.bf16.gmra.mrb[132].mxu1 %v4385_v48  ;;  %v4351_v13 = vmax.f32 %v4277_v56, 0.0 }
 0x46a   : > { %v4283_v5 = vadd.f32 %v4282_v7, %v4090_v58  ;;  %v4352_v16 = vmax.f32 %v4279_v62, 0.0 }
 0x46b   : > { %v4353_v18 = vmax.f32 %v4281_v4, 0.0 }
 0x46c   : > { %v4354_v19 = vmax.f32 %v4283_v5, 0.0 }
 0x46d   : > { %v4387_v26 = vpack.c.bf16 %v4353_v18, %v4351_v13 }
 0x46e   : > { %v4388_v27 = vpack.c.bf16 %v4354_v19, %v4352_v16  ;;  %v4286_v28 = vpop.f32.mrb[124].mxu0 }
 0x46f   : > { %v4287_v9 = vadd.f32 %v4286_v28, %v4094_v20  ;;  %v4288_v29 = vpop.f32.mrb[125].mxu0 }
 0x470   : > { %v4289_v33 = vadd.f32 %v4288_v29, %v4096_v22  ;;  %v4290_v34 = vpop.f32.mrb[126].mxu0  ;;  %4670 = vmatprep.mubr.bf16.mxu1 %v4388_v27 }
 0x471   : > { %v4291_v46 = vadd.f32 %v4290_v34, %v4098_v8  ;;  %v4292_v21 = vpop.f32.mrb[127].mxu0  ;;  %4671 = vmatmul.mubr.bf16.gmra.mrb[136].mxu1 %v4387_v26  ;;  %v4355_v10 = vmax.f32 %v4287_v9, 0.0 }
 0x472   : > { %v4293_v23 = vadd.f32 %v4292_v21, %v4100_v31  ;;  %v4356_v61 = vmax.f32 %v4289_v33, 0.0 }
 0x473   : > { %v4357_v11 = vmax.f32 %v4291_v46, 0.0 }
 0x474   : > { %v4358_v1 = vmax.f32 %v4293_v23, 0.0 }
 0x475   : > { %v4389_v25 = vpack.c.bf16 %v4357_v11, %v4355_v10 }
 0x476   : > { %v4390_v59 = vpack.c.bf16 %v4358_v1, %v4356_v61 }
 0x478   : > { %4678 = vmatprep.mubr.bf16.mxu1 %v4390_v59 }
 0x479   : > { %4679 = vmatmul.mubr.bf16.gmra.mrb[140].mxu1 %v4389_v25 }
 0x4d4   : > { %v5540_v40 = vpop.f32.mrb[80].mxu1 }
 0x4d5   : > { %v5541_v49 = vpop.f32.mrb[81].mxu1 }
 0x4d6   : > { %v5542_v3 = vadd.f32 %v5541_v49, %v5540_v40  ;;  %v5543_v24 = vpop.f32.mrb[82].mxu1 }
 0x4d7   : > { %v5544_v63 = vpop.f32.mrb[83].mxu1 }
 0x4d8   : > { %v4561_v30 = vadd.f32 %v5542_v3, %v7881_v42  ;;  %v5545_v51 = vadd.f32 %v5544_v63, %v5543_v24 }
 0x4da   : > { %v4564_v15 = vadd.f32 %v5545_v51, %v7881_v42  ;;  %v4687_v32 = vmax.f32 %v4561_v30, 0.0 }
 0x4dc   : > { %v4688_v2 = vmax.f32 %v4564_v15, 0.0  ;;  %v5546_v6 = vpop.f32.mrb[84].mxu1 }
 0x4dd   : > { %v5547_v17 = vpop.f32.mrb[85].mxu1 }
 0x4de   : > { %v5548_v57 = vadd.f32 %v5547_v17, %v5546_v6  ;;  %v5549_v60 = vpop.f32.mrb[86].mxu1  ;;  %v4719_v50 = vpack.c.bf16 %v4688_v2, %v4687_v32 }
 0x4df   : > { %v5550_v53 = vpop.f32.mrb[87].mxu1 }
 0x4e0   : > { %v4569_v37 = vadd.f32 %v5548_v57, %v7881_v42  ;;  %v5551_v35 = vadd.f32 %v5550_v53, %v5549_v60  ;;  %5676 = vmatprep.mubr.bf16.mxu1 %v4719_v50 }
 0x4e2   : > { %v4572_v47 = vadd.f32 %v5551_v35, %v7881_v42  ;;  %v4689_v41 = vmax.f32 %v4569_v37, 0.0 }
 0x4e4   : > { %v4690_v36 = vmax.f32 %v4572_v47, 0.0  ;;  %v5552_v38 = vpop.f32.mrb[88].mxu1 }
 0x4e5   : > { %v5553_v12 = vpop.f32.mrb[89].mxu1 }
 0x4e6   : > { %v4720_v43 = vpack.c.bf16 %v4690_v36, %v4689_v41  ;;  %v5554_v44 = vadd.f32 %v5553_v12, %v5552_v38  ;;  %v5555_v45 = vpop.f32.mrb[90].mxu1 }
 0x4e7   : > { %v5556_v48 = vpop.f32.mrb[91].mxu1 }
 0x4e8   : > { %v4577_v14 = vadd.f32 %v5554_v44, %v7881_v42  ;;  %v5557_v52 = vadd.f32 %v5556_v48, %v5555_v45  ;;  %5677 = vmatmul.mubr.bf16.vlgmr.msra.gmra.mrb[144].mxu1 %v4720_v43 }
 0x4ea   : > { %v4580_v54 = vadd.f32 %v5557_v52, %v7881_v42  ;;  %v4691_v55 = vmax.f32 %v4577_v14, 0.0 }
 0x4ec   : > { %v4692_v56 = vmax.f32 %v4580_v54, 0.0  ;;  %v5558_v39 = vpop.f32.mrb[92].mxu1 }
 0x4ed   : > { %v5559_v58 = vpop.f32.mrb[93].mxu1 }
 0x4ee   : > { %v5560_v62 = vadd.f32 %v5559_v58, %v5558_v39  ;;  %v5561_v0 = vpop.f32.mrb[94].mxu1  ;;  %v4721_v4 = vpack.c.bf16 %v4692_v56, %v4691_v55 }
 0x4ef   : > { %v5562_v7 = vpop.f32.mrb[95].mxu1 }
 0x4f0   : > { %v4585_v5 = vadd.f32 %v5560_v62, %v7881_v42  ;;  %v5563_v13 = vadd.f32 %v5562_v7, %v5561_v0  ;;  %5680 = vmatprep.mubr.bf16.mxu1 %v4721_v4 }
 0x4f2   : > { %v4588_v18 = vadd.f32 %v5563_v13, %v7881_v42  ;;  %v4693_v16 = vmax.f32 %v4585_v5, 0.0 }
 0x4f4   : > { %v4694_v19 = vmax.f32 %v4588_v18, 0.0  ;;  %v5564_v20 = vpop.f32.mrb[96].mxu1 }
 0x4f5   : > { %v5565_v26 = vpop.f32.mrb[97].mxu1 }
 0x4f6   : > { %v5566_v22 = vadd.f32 %v5565_v26, %v5564_v20  ;;  %v5567_v27 = vpop.f32.mrb[98].mxu1  ;;  %v4722_v28 = vpack.c.bf16 %v4694_v19, %v4693_v16 }
 0x4f7   : > { %v5568_v8 = vpop.f32.mrb[99].mxu1 }
 0x4f8   : > { %v4593_v9 = vadd.f32 %v5566_v22, %v7881_v42  ;;  %v5569_v29 = vadd.f32 %v5568_v8, %v5567_v27  ;;  %5681 = vmatmul.mubr.bf16.gmra.mrb[148].mxu1 %v4722_v28 }
 0x4fa   : > { %v4596_v31 = vadd.f32 %v5569_v29, %v7881_v42  ;;  %v4695_v33 = vmax.f32 %v4593_v9, 0.0 }
 0x4fc   : > { %v4696_v34 = vmax.f32 %v4596_v31, 0.0  ;;  %v5570_v46 = vpop.f32.mrb[100].mxu1 }
 0x4fd   : > { %v5571_v21 = vpop.f32.mrb[101].mxu1 }
 0x4fe   : > { %v5572_v23 = vadd.f32 %v5571_v21, %v5570_v46  ;;  %v5573_v10 = vpop.f32.mrb[102].mxu1  ;;  %v4723_v11 = vpack.c.bf16 %v4696_v34, %v4695_v33 }
 0x4ff   : > { %v5574_v61 = vpop.f32.mrb[103].mxu1 }
 0x500   : > { %v4601_v1 = vadd.f32 %v5572_v23, %v7881_v42  ;;  %v5575_v25 = vadd.f32 %v5574_v61, %v5573_v10  ;;  %5684 = vmatprep.mubr.bf16.mxu1 %v4723_v11 }
 0x502   : > { %v4604_v59 = vadd.f32 %v5575_v25, %v7881_v42  ;;  %v4697_v40 = vmax.f32 %v4601_v1, 0.0 }
 0x504   : > { %v4698_v49 = vmax.f32 %v4604_v59, 0.0  ;;  %v5576_v3 = vpop.f32.mrb[104].mxu1 }
 0x505   : > { %v5577_v24 = vpop.f32.mrb[105].mxu1 }
 0x506   : > { %v5578_v63 = vadd.f32 %v5577_v24, %v5576_v3  ;;  %v5579_v30 = vpop.f32.mrb[106].mxu1  ;;  %v4724_v51 = vpack.c.bf16 %v4698_v49, %v4697_v40 }
 0x507   : > { %v5580_v15 = vpop.f32.mrb[107].mxu1 }
 0x508   : > { %v4609_v32 = vadd.f32 %v5578_v63, %v7881_v42  ;;  %v5581_v2 = vadd.f32 %v5580_v15, %v5579_v30  ;;  %5685 = vmatmul.mubr.bf16.gmra.mrb[152].mxu1 %v4724_v51 }
 0x50a   : > { %v4612_v6 = vadd.f32 %v5581_v2, %v7881_v42  ;;  %v4699_v17 = vmax.f32 %v4609_v32, 0.0 }
 0x50c   : > { %v4700_v57 = vmax.f32 %v4612_v6, 0.0  ;;  %v5582_v60 = vpop.f32.mrb[108].mxu1 }
 0x50d   : > { %v5583_v50 = vpop.f32.mrb[109].mxu1 }
 0x50e   : > { %v5584_v53 = vadd.f32 %v5583_v50, %v5582_v60  ;;  %v5585_v37 = vpop.f32.mrb[110].mxu1  ;;  %v4725_v35 = vpack.c.bf16 %v4700_v57, %v4699_v17 }
 0x50f   : > { %v5586_v47 = vpop.f32.mrb[111].mxu1 }
 0x510   : > { %v4617_v41 = vadd.f32 %v5584_v53, %v7881_v42  ;;  %v5587_v36 = vadd.f32 %v5586_v47, %v5585_v37  ;;  %5688 = vmatprep.mubr.bf16.mxu1 %v4725_v35 }
 0x512   : > { %v4620_v38 = vadd.f32 %v5587_v36, %v7881_v42  ;;  %v4701_v12 = vmax.f32 %v4617_v41, 0.0 }
 0x514   : > { %v4702_v43 = vmax.f32 %v4620_v38, 0.0  ;;  %v5588_v44 = vpop.f32.mrb[112].mxu1 }
 0x515   : > { %v5589_v45 = vpop.f32.mrb[113].mxu1 }
 0x516   : > { %v5590_v48 = vadd.f32 %v5589_v45, %v5588_v44  ;;  %v5591_v14 = vpop.f32.mrb[114].mxu1  ;;  %v4726_v52 = vpack.c.bf16 %v4702_v43, %v4701_v12 }
 0x517   : > { %v5592_v54 = vpop.f32.mrb[115].mxu1 }
 0x518   : > { %v4625_v55 = vadd.f32 %v5590_v48, %v7881_v42  ;;  %v5593_v56 = vadd.f32 %v5592_v54, %v5591_v14  ;;  %5689 = vmatmul.mubr.bf16.gmra.mrb[156].mxu1 %v4726_v52 }
 0x51a   : > { %v4628_v39 = vadd.f32 %v5593_v56, %v7881_v42  ;;  %v4703_v58 = vmax.f32 %v4625_v55, 0.0 }
 0x51c   : > { %v4704_v62 = vmax.f32 %v4628_v39, 0.0  ;;  %v5594_v0 = vpop.f32.mrb[116].mxu1 }
 0x51d   : > { %v5595_v4 = vpop.f32.mrb[117].mxu1 }
 0x51e   : > { %v5596_v7 = vadd.f32 %v5595_v4, %v5594_v0  ;;  %v5597_v5 = vpop.f32.mrb[118].mxu1  ;;  %v4727_v13 = vpack.c.bf16 %v4704_v62, %v4703_v58 }
 0x51f   : > { %v5598_v18 = vpop.f32.mrb[119].mxu1 }
 0x520   : > { %v4633_v16 = vadd.f32 %v5596_v7, %v7881_v42  ;;  %v5599_v19 = vadd.f32 %v5598_v18, %v5597_v5  ;;  %5692 = vmatprep.mubr.bf16.mxu1 %v4727_v13 }
 0x522   : > { %v4636_v20 = vadd.f32 %v5599_v19, %v7881_v42  ;;  %v4705_v26 = vmax.f32 %v4633_v16, 0.0 }
 0x524   : > { %v4706_v22 = vmax.f32 %v4636_v20, 0.0  ;;  %v5600_v27 = vpop.f32.mrb[120].mxu1 }
 0x525   : > { %v5601_v28 = vpop.f32.mrb[121].mxu1 }
 0x526   : > { %v5602_v8 = vadd.f32 %v5601_v28, %v5600_v27  ;;  %v5603_v9 = vpop.f32.mrb[122].mxu1  ;;  %v4728_v29 = vpack.c.bf16 %v4706_v22, %v4705_v26 }
 0x527   : > { %v5604_v31 = vpop.f32.mrb[123].mxu1 }
 0x528   : > { %v4641_v33 = vadd.f32 %v5602_v8, %v7881_v42  ;;  %v5605_v34 = vadd.f32 %v5604_v31, %v5603_v9  ;;  %5693 = vmatmul.mubr.bf16.gmra.mrb[160].mxu1 %v4728_v29  ;;  %v7919_v29 = vld [vmem:[%s8046_s8] ss:$0 sm:$0xff] }
 0x52a   : > { %v4644_v46 = vadd.f32 %v5605_v34, %v7881_v42  ;;  %v4707_v21 = vmax.f32 %v4641_v33, 0.0 }
 0x52c   : > { %v4708_v23 = vmax.f32 %v4644_v46, 0.0  ;;  %v5606_v10 = vpop.f32.mrb[124].mxu1 }
 0x52d   : > { %v5607_v11 = vpop.f32.mrb[125].mxu1 }
 0x52e   : > { %v5608_v61 = vadd.f32 %v5607_v11, %v5606_v10  ;;  %v5609_v1 = vpop.f32.mrb[126].mxu1  ;;  %v4729_v25 = vpack.c.bf16 %v4708_v23, %v4707_v21 }
 0x52f   : > { %v5610_v59 = vpop.f32.mrb[127].mxu1 }
 0x530   : > { %v4649_v40 = vadd.f32 %v5608_v61, %v7881_v42  ;;  %v5611_v49 = vadd.f32 %v5610_v59, %v5609_v1  ;;  %5696 = vmatprep.mubr.bf16.mxu1 %v4729_v25 }
 0x532   : > { %v4652_v3 = vadd.f32 %v5611_v49, %v7881_v42  ;;  %v4709_v24 = vmax.f32 %v4649_v40, 0.0 }
 0x534   : > { %v4710_v63 = vmax.f32 %v4652_v3, 0.0  ;;  %v5612_v30 = vpop.f32.mrb[128].mxu1 }
 0x535   : > { %v5613_v51 = vpop.f32.mrb[129].mxu1 }
 0x536   : > { %v5614_v15 = vadd.f32 %v5613_v51, %v5612_v30  ;;  %v5615_v32 = vpop.f32.mrb[130].mxu1  ;;  %v4730_v2 = vpack.c.bf16 %v4710_v63, %v4709_v24 }
 0x537   : > { %v5616_v6 = vpop.f32.mrb[131].mxu1 }
 0x538   : > { %v4657_v17 = vadd.f32 %v5614_v15, %v7881_v42  ;;  %v5617_v57 = vadd.f32 %v5616_v6, %v5615_v32  ;;  %5697 = vmatmul.mubr.bf16.gmra.mrb[164].mxu1 %v4730_v2 }
 0x53a   : > { %v4660_v60 = vadd.f32 %v5617_v57, %v7881_v42  ;;  %v4711_v50 = vmax.f32 %v4657_v17, 0.0 }
 0x53c   : > { %v4712_v53 = vmax.f32 %v4660_v60, 0.0  ;;  %v5618_v37 = vpop.f32.mrb[132].mxu1 }
 0x53d   : > { %v5619_v35 = vpop.f32.mrb[133].mxu1 }
 0x53e   : > { %v5620_v47 = vadd.f32 %v5619_v35, %v5618_v37  ;;  %v5621_v41 = vpop.f32.mrb[134].mxu1  ;;  %v4731_v36 = vpack.c.bf16 %v4712_v53, %v4711_v50 }
 0x53f   : > { %v5622_v38 = vpop.f32.mrb[135].mxu1 }
 0x540   : > { %v4665_v12 = vadd.f32 %v5620_v47, %v7881_v42  ;;  %v5623_v43 = vadd.f32 %v5622_v38, %v5621_v41  ;;  %5700 = vmatprep.mubr.bf16.mxu1 %v4731_v36 }
 0x542   : > { %v4668_v44 = vadd.f32 %v5623_v43, %v7881_v42  ;;  %v4713_v45 = vmax.f32 %v4665_v12, 0.0 }
 0x544   : > { %v4714_v48 = vmax.f32 %v4668_v44, 0.0  ;;  %v5624_v14 = vpop.f32.mrb[136].mxu1 }
 0x545   : > { %v5625_v52 = vpop.f32.mrb[137].mxu1 }
 0x546   : > { %v5626_v54 = vadd.f32 %v5625_v52, %v5624_v14  ;;  %v5627_v55 = vpop.f32.mrb[138].mxu1  ;;  %v4732_v56 = vpack.c.bf16 %v4714_v48, %v4713_v45 }
 0x547   : > { %v5628_v39 = vpop.f32.mrb[139].mxu1 }
 0x548   : > { %v4673_v58 = vadd.f32 %v5626_v54, %v7881_v42  ;;  %v5629_v62 = vadd.f32 %v5628_v39, %v5627_v55  ;;  %5701 = vmatmul.mubr.bf16.gmra.mrb[168].mxu1 %v4732_v56 }
 0x54a   : > { %v4676_v0 = vadd.f32 %v5629_v62, %v7881_v42  ;;  %v4715_v4 = vmax.f32 %v4673_v58, 0.0 }
 0x54c   : > { %v4716_v7 = vmax.f32 %v4676_v0, 0.0  ;;  %v5630_v5 = vpop.f32.mrb[140].mxu1 }
 0x54d   : > { %v5631_v13 = vpop.f32.mrb[141].mxu1 }
 0x54e   : > { %v5632_v18 = vadd.f32 %v5631_v13, %v5630_v5  ;;  %v5633_v16 = vpop.f32.mrb[142].mxu1  ;;  %v4733_v19 = vpack.c.bf16 %v4716_v7, %v4715_v4 }
 0x54f   : > { %v5634_v20 = vpop.f32.mrb[143].mxu1 }
 0x550   : > { %v4681_v26 = vadd.f32 %v5632_v18, %v7881_v42  ;;  %v5635_v22 = vadd.f32 %v5634_v20, %v5633_v16  ;;  %5704 = vmatprep.mubr.bf16.mxu1 %v4733_v19 }
 0x552   : > { %v4684_v27 = vadd.f32 %v5635_v22, %v7881_v42  ;;  %v4717_v28 = vmax.f32 %v4681_v26, 0.0 }
 0x554   : > { %v4718_v8 = vmax.f32 %v4684_v27, 0.0 }
 0x556   : > { %v4734_v9 = vpack.c.bf16 %v4718_v8, %v4717_v28 }
 0x558   : > { %5705 = vmatmul.mubr.bf16.gmra.mrb[172].mxu1 %v4734_v9 }
 0x5bb   : > { %v5678_v31 = vpop.f32.mrb[144].mxu1 }
 0x5bc   : > { %v4849_v33 = vadd.f32 %v5678_v31, %v7919_v29  ;;  %v4840_v34 = vpop.f32.mrb[145].mxu1 }
 0x5bd   : > { %v4841_v46 = vadd.f32 %v7919_v29, %v4840_v34  ;;  %v5679_v21 = vpop.f32.mrb[146].mxu1 }
 0x5be   : > { %4969 = vst [vmem:[%s7923_s30 + $0x10] sm:$0xff] %v4849_v33  ;;  %v4852_v42 = vadd.f32 %v5679_v21, %v7919_v29  ;;  %v4843_v23 = vpop.f32.mrb[147].mxu1 }
 0x5bf   : > { %4967 = vst [vmem:[%s7923_s30] sm:$0xff] %v4841_v46  ;;  %v4844_v10 = vadd.f32 %v7919_v29, %v4843_v23 }
 0x5c0   : > { %4970 = vst [vmem:[%s7923_s30 + $0x18] sm:$0xff] %v4852_v42 }
 0x5c1   : > { %4968 = vst [vmem:[%s7923_s30 + $0x8] sm:$0xff] %v4844_v10 }
 0x5cb   : > { %v5682_v11 = vpop.f32.mrb[148].mxu1 }
 0x5cc   : > { %v4865_v61 = vadd.f32 %v5682_v11, %v7919_v29  ;;  %v4856_v1 = vpop.f32.mrb[149].mxu1 }
 0x5cd   : > { %v4857_v25 = vadd.f32 %v7919_v29, %v4856_v1  ;;  %v5683_v59 = vpop.f32.mrb[150].mxu1 }
 0x5ce   : > { %4973 = vst [vmem:[%s7923_s30 + $0x30] sm:$0xff] %v4865_v61  ;;  %v4868_v40 = vadd.f32 %v5683_v59, %v7919_v29  ;;  %v4859_v49 = vpop.f32.mrb[151].mxu1 }
 0x5cf   : > { %4971 = vst [vmem:[%s7923_s30 + $0x20] sm:$0xff] %v4857_v25  ;;  %v4860_v3 = vadd.f32 %v7919_v29, %v4859_v49 }
 0x5d0   : > { %4974 = vst [vmem:[%s7923_s30 + $0x38] sm:$0xff] %v4868_v40 }
 0x5d1   : > { %4972 = vst [vmem:[%s7923_s30 + $0x28] sm:$0xff] %v4860_v3 }
 0x5db   : > { %v5686_v24 = vpop.f32.mrb[152].mxu1 }
 0x5dc   : > { %v4881_v63 = vadd.f32 %v5686_v24, %v7919_v29  ;;  %v4872_v30 = vpop.f32.mrb[153].mxu1 }
 0x5dd   : > { %v4873_v51 = vadd.f32 %v7919_v29, %v4872_v30  ;;  %v5687_v15 = vpop.f32.mrb[154].mxu1 }
 0x5de   : > { %4977 = vst [vmem:[%s7923_s30 + $0x50] sm:$0xff] %v4881_v63  ;;  %v4884_v32 = vadd.f32 %v5687_v15, %v7919_v29  ;;  %v4875_v2 = vpop.f32.mrb[155].mxu1 }
 0x5df   : > { %4975 = vst [vmem:[%s7923_s30 + $0x40] sm:$0xff] %v4873_v51  ;;  %v4876_v6 = vadd.f32 %v7919_v29, %v4875_v2 }
 0x5e0   : > { %4978 = vst [vmem:[%s7923_s30 + $0x58] sm:$0xff] %v4884_v32 }
 0x5e1   : > { %4976 = vst [vmem:[%s7923_s30 + $0x48] sm:$0xff] %v4876_v6 }
 0x5eb   : > { %v5690_v17 = vpop.f32.mrb[156].mxu1 }
 0x5ec   : > { %v4897_v57 = vadd.f32 %v5690_v17, %v7919_v29  ;;  %v4888_v60 = vpop.f32.mrb[157].mxu1 }
 0x5ed   : > { %v4889_v50 = vadd.f32 %v7919_v29, %v4888_v60  ;;  %v5691_v53 = vpop.f32.mrb[158].mxu1 }
 0x5ee   : > { %4981 = vst [vmem:[%s7923_s30 + $0x70] sm:$0xff] %v4897_v57  ;;  %v4900_v37 = vadd.f32 %v5691_v53, %v7919_v29  ;;  %v4891_v35 = vpop.f32.mrb[159].mxu1 }
 0x5ef   : > { %4979 = vst [vmem:[%s7923_s30 + $0x60] sm:$0xff] %v4889_v50  ;;  %v4892_v47 = vadd.f32 %v7919_v29, %v4891_v35 }
 0x5f0   : > { %4982 = vst [vmem:[%s7923_s30 + $0x78] sm:$0xff] %v4900_v37 }
 0x5f1   : > { %4980 = vst [vmem:[%s7923_s30 + $0x68] sm:$0xff] %v4892_v47 }
 0x5fb   : > { %v5694_v41 = vpop.f32.mrb[160].mxu1 }
 0x5fc   : > { %v4913_v36 = vadd.f32 %v5694_v41, %v7919_v29  ;;  %v4904_v38 = vpop.f32.mrb[161].mxu1 }
 0x5fd   : > { %v4905_v12 = vadd.f32 %v7919_v29, %v4904_v38  ;;  %v5695_v43 = vpop.f32.mrb[162].mxu1 }
 0x5fe   : > { %4985 = vst [vmem:[%s7923_s30 + $0x90] sm:$0xff] %v4913_v36  ;;  %v4916_v44 = vadd.f32 %v5695_v43, %v7919_v29  ;;  %v4907_v45 = vpop.f32.mrb[163].mxu1 }
 0x5ff   : > { %4983 = vst [vmem:[%s7923_s30 + $0x80] sm:$0xff] %v4905_v12  ;;  %v4908_v48 = vadd.f32 %v7919_v29, %v4907_v45 }
 0x600   : > { %4986 = vst [vmem:[%s7923_s30 + $0x98] sm:$0xff] %v4916_v44 }
 0x601   : > { %4984 = vst [vmem:[%s7923_s30 + $0x88] sm:$0xff] %v4908_v48 }
 0x60b   : > { %v5698_v14 = vpop.f32.mrb[164].mxu1 }
 0x60c   : > { %v4929_v52 = vadd.f32 %v5698_v14, %v7919_v29  ;;  %v4920_v54 = vpop.f32.mrb[165].mxu1 }
 0x60d   : > { %v4921_v55 = vadd.f32 %v7919_v29, %v4920_v54  ;;  %v5699_v56 = vpop.f32.mrb[166].mxu1 }
 0x60e   : > { %4989 = vst [vmem:[%s7923_s30 + $0xb0] sm:$0xff] %v4929_v52  ;;  %v4932_v39 = vadd.f32 %v5699_v56, %v7919_v29  ;;  %v4923_v58 = vpop.f32.mrb[167].mxu1 }
 0x60f   : > { %4987 = vst [vmem:[%s7923_s30 + $0xa0] sm:$0xff] %v4921_v55  ;;  %v4924_v62 = vadd.f32 %v7919_v29, %v4923_v58 }
 0x610   : > { %4990 = vst [vmem:[%s7923_s30 + $0xb8] sm:$0xff] %v4932_v39 }
 0x611   : > { %4988 = vst [vmem:[%s7923_s30 + $0xa8] sm:$0xff] %v4924_v62 }
 0x61b   : > { %v5702_v0 = vpop.f32.mrb[168].mxu1 }
 0x61c   : > { %v4945_v4 = vadd.f32 %v5702_v0, %v7919_v29  ;;  %v4936_v7 = vpop.f32.mrb[169].mxu1 }
 0x61d   : > { %v4937_v5 = vadd.f32 %v7919_v29, %v4936_v7  ;;  %v5703_v13 = vpop.f32.mrb[170].mxu1 }
 0x61e   : > { %4993 = vst [vmem:[%s7923_s30 + $0xd0] sm:$0xff] %v4945_v4  ;;  %v4948_v18 = vadd.f32 %v5703_v13, %v7919_v29  ;;  %v4939_v16 = vpop.f32.mrb[171].mxu1 }
 0x61f   : > { %4991 = vst [vmem:[%s7923_s30 + $0xc0] sm:$0xff] %v4937_v5  ;;  %v4940_v19 = vadd.f32 %v7919_v29, %v4939_v16 }
 0x620   : > { %4994 = vst [vmem:[%s7923_s30 + $0xd8] sm:$0xff] %v4948_v18 }
 0x621   : > { %4992 = vst [vmem:[%s7923_s30 + $0xc8] sm:$0xff] %v4940_v19 }
 0x62b   : > { %v5706_v20 = vpop.f32.mrb[172].mxu1 }
 0x62c   : > { %v4961_v26 = vadd.f32 %v5706_v20, %v7919_v29  ;;  %v4952_v22 = vpop.f32.mrb[173].mxu1 }
 0x62d   : > { %v4953_v27 = vadd.f32 %v7919_v29, %v4952_v22  ;;  %v5707_v28 = vpop.f32.mrb[174].mxu1 }
 0x62e   : > { %4997 = vst [vmem:[%s7923_s30 + $0xf0] sm:$0xff] %v4961_v26  ;;  %v4964_v8 = vadd.f32 %v5707_v28, %v7919_v29  ;;  %v4955_v9 = vpop.f32.mrb[175].mxu1 }
 0x62f   : > { %4995 = vst [vmem:[%s7923_s30 + $0xe0] sm:$0xff] %v4953_v27  ;;  %v4956_v31 = vadd.f32 %v7919_v29, %v4955_v9 }
 0x630   : > { %4998 = vst [vmem:[%s7923_s30 + $0xf8] sm:$0xff] %v4964_v8 }
 0x631   : > { %4996 = vst [vmem:[%s7923_s30 + $0xe8] sm:$0xff] %v4956_v31 }
 0x632   : > { %7059 = shalt.err (!%p7056_p13)
}
 0x633   : > { %s7060_s16 = scalar_lea.hbm %s7988_s15, 4096  ;;  %s7064_s20 = scalar_lea.hbm %s8047_s9, 8192 }
 0x634   : > { %p7061_p9 = scmp.ne.s32.totalorder %s7988_s15, %s7060_s16  ;;  %p7065_p4 = scmp.lt.u32.totalorder %s7988_s15, %s8047_s9 }
 0x635   : > { %p7066_p8 = scmp.lt.u32.totalorder %s7064_s20, %s7060_s16  ;;  %p7068_p3 = scmp.lt.u32.totalorder %s7060_s16, %s7988_s15 }
 0x636   : > { %p7062_p0 = pnand %p7061_p9, %p7350_p10 }
 0x637   : > { %p7067_p6 = por %p7066_p8, %p7065_p4 }
 0x638   : > { %p7063_p11 = pneg %p7062_p0 }
 0x639   : > { %p7069_p5 = por %p7068_p3, %p7067_p6 }
 0x63b   : > { %p7070_p7 = pnand %p7069_p5, %p7063_p11 }
 0x63d   : > { %7073 = shalt.err (!%p7070_p7)
}
 0x63e   : > { %s7136_s22 = smov 128   ;;  %s7137_s29 = smov 8  }
 0x63f   : > { %6273 = dma.vmem_to_hbm [thread:$0]  (%p7350_p10), %s7990_s19, 4096, %s7988_s15, %s5000_s13, %s7136_s22, %s7136_s22, %s7137_s29  }
 0x640 PF: > { %s8075_s17 = sld [smem:[#allocation16_spill]]  ;;  %s8076_s18 = sld [smem:[#allocation17_spill]] }
 0x641   : > { %p8078_p2 = scmp.ge.s32.totalorder %s7120_s12, 2 }
 0x646   : > { %s5028_s25 = sand.u32 1, %s8075_s17   ;;  %p8077_p12 = scmp.ne.s32.totalorder %s8076_s18, 0 }
 0x647   : > { %s5029_s23 = scalar_lea.sflag [#allocation4], %s5028_s25 }
 0x648   : > { %p6293_p1 = pnand %p8078_p2, %p8077_p12 }
 0x64a   : > { %7103 = dma.done.wait (!%p6293_p1), %s5029_s23, 4096  }
 0x64b   : > { %7105 = vsyncadd (!%p6293_p1), %s5029_s23, 4294963200  ;;  %p24_p13 = scmp.ge.s32.totalorder %s7340_s28, 4   ;;  %s8079_s30 = smov %s7112_s10 }
 0x64c   : > { %s8080_s10 = smov %s7116_s11  ;;  %s8081_s11 = smov %s7356_s26 }
 0x64d   : > { %s8082_s12 = smov %s7340_s28  ;;  %26 = sbr.rel (!%p24_p13) target bundleno = 9 (0x9), region = 117 }
 0x654   :  { %5034 = vsyncpa [#allocation3], 1 }
 0x655   :  { %5036 = vsyncpa [#allocation3 + $0x1], 1 }
 0x656   :  { %5037 = vsyncpa [#allocation6], 1 }
 0x657   :  { %5038 = vsyncpa [#allocation9], 1 }
 0x658   :  { %5039 = vsyncpa [#allocation4], 1 }
 0x659   :  { %5041 = vsyncpa [#allocation4 + $0x1], 1 }

</bundles_post_ra>
